<compile_context>
chip_gen: v7x
topology: tpu7x:2x2x1
jax: 0.10.0
libtpu: 0.0.40
codegen_flags: <defaults>
</compile_context>

<pallas_src>
import math
import jax
import jax.numpy as jnp
from jax.experimental import pallas as pl
from jax.experimental.pallas import tpu as pltpu


# ---------------- Pallas kernels ----------------

def _make_conv_kernel(has_res, apply_act, emit_raw):
    """Transposed GEMM with fused residual + folded-BN + ReLU epilogue.

    refs = [w(Cout,K), a(K,tm), (scale(Cout,1), shift(Cout,1))?, (res(Cout,tm))?,
            out_act(Cout,tm)?, out_raw(Cout,tm)?]
    """
    def kernel(*refs):
        w_ref, a_ref = refs[0], refs[1]
        i = 2
        if apply_act:
            scale = refs[i][...]
            shift = refs[i + 1][...]
            i += 2
        acc = jnp.dot(w_ref[...], a_ref[...],
                      preferred_element_type=jnp.float32)      # bf16 x bf16 -> f32
        if has_res:
            acc = acc + refs[i][...]
            i += 1
        if apply_act:
            refs[i][...] = jnp.maximum(acc * scale + shift, 0.0)
            if emit_raw:
                refs[i + 1][...] = acc
        else:
            refs[i][...] = acc
    return kernel


def _pool_fc_kernel(af_ref, w_ref, b_ref, o_ref):
    # af:(C, N, HW)  ->  pooled:(C, N)  ->  logits^T:(num_classes, N)
    pooled = jnp.mean(af_ref[...], axis=2)
    o_ref[...] = (jnp.dot(w_ref[...], pooled,
                          preferred_element_type=jnp.float32) + b_ref[...])


# ---------------- Pallas wrappers ----------------

def _pick_tm(m):
    """Largest lane tile <= 512 that still leaves >= 2 grid steps (megacore)."""
    for tm in (512, 256, 128):
        if m >= 2 * tm:
            return tm
    return 128


def fused_conv(a_mat, w_mat, scale=None, shift=None, res=None, emit_raw=False):
    """out(Cout, M) = W @ A  (+res)  then optional relu(scale*x + shift).

    a_mat : (K, M)    bf16   im2col patches (pixels on lanes)
    w_mat : (Cout, K) bf16   flattened conv weights
    scale, shift : (Cout,) f32 folded BN (None -> plain conv, no epilogue)
    res   : (Cout, M) f32 residual added before BN/ReLU
    emit_raw : also return the pre-BN (post-residual) tensor.
    """
    K, M = a_mat.shape
    Cout = w_mat.shape[0]
    apply_act = scale is not None
    tm = _pick_tm(M)
    grid = (pl.cdiv(M, tm),)

    in_specs = [pl.BlockSpec((Cout, K), lambda i: (0, 0)),
                pl.BlockSpec((K, tm), lambda i: (0, i))]
    args = [w_mat, a_mat]
    if apply_act:
        in_specs += [pl.BlockSpec((Cout, 1), lambda i: (0, 0)),
                     pl.BlockSpec((Cout, 1), lambda i: (0, 0))]
        args += [scale.reshape(Cout, 1).astype(jnp.float32),
                 shift.reshape(Cout, 1).astype(jnp.float32)]
    if res is not None:
        in_specs.append(pl.BlockSpec((Cout, tm), lambda i: (0, i)))
        args.append(res.astype(jnp.float32))

    io_spec = pl.BlockSpec((Cout, tm), lambda i: (0, i))
    two_outs = apply_act and emit_raw
    if two_outs:
        out_shape = (jax.ShapeDtypeStruct((Cout, M), jnp.float32),
                     jax.ShapeDtypeStruct((Cout, M), jnp.float32))
        out_specs = (io_spec, io_spec)
    else:
        out_shape = jax.ShapeDtypeStruct((Cout, M), jnp.float32)
        out_specs = io_spec

    return pl.pallas_call(
        _make_conv_kernel(res is not None, apply_act, two_outs),
        out_shape=out_shape,
        grid=grid,
        in_specs=in_specs,
        out_specs=out_specs,
        compiler_params=pltpu.CompilerParams(
            dimension_semantics=("parallel",)),
    )(*args)


def pallas_pool_fc(act, fc_w, fc_b):
    """act:(C, N, HW) -> logits^T:(num_classes, N). Fused global avgpool + FC."""
    C, N, HW = act.shape
    nc = fc_w.shape[0]
    return pl.pallas_call(
        _pool_fc_kernel,
        out_shape=jax.ShapeDtypeStruct((nc, N), jnp.float32),
    )(act, fc_w.astype(jnp.float32), fc_b.reshape(nc, 1).astype(jnp.float32))


# ---------------- JAX glue (layout / im2col / BN fold) ----------------

def _fold_bn(bn, eps=1e-5):
    scale = bn['gamma'] / jnp.sqrt(bn['var'] + eps)
    shift = bn['beta'] - bn['mean'] * scale
    return scale, shift


def _im2col3x3_T(x, stride):
    """x:(Cin, N, H, W) f32 -> A:(9*Cin, N*Ho*Wo) bf16, rows ordered (ky,kx,cin)."""
    Cin, N, H, W = x.shape
    xp = jnp.pad(x, ((0, 0), (0, 0), (1, 1), (1, 1)))
    Ho = (H + 2 - 3) // stride + 1
    Wo = (W + 2 - 3) // stride + 1
    taps = []
    for ky in range(3):
        for kx in range(3):
            taps.append(xp[:, :, ky:ky + stride * (Ho - 1) + 1:stride,
                           kx:kx + stride * (Wo - 1) + 1:stride])
    a = jnp.stack(taps, axis=0).reshape(9 * Cin, N * Ho * Wo)
    return a.astype(jnp.bfloat16), Ho, Wo


def conv3x3_fused(x, w, stride, bn=None, res=None, emit_raw=False):
    """3x3 conv (pad=1, no bias) with fused residual + BN/ReLU epilogue.

    x : (Cin, N, H, W) f32;  w : (Cout, Cin, 3, 3) torch layout.
    Returns (act, raw_or_None), each (Cout, N, Ho, Wo).
    """
    Cin, N, H, W = x.shape
    Cout = w.shape[0]
    a, Ho, Wo = _im2col3x3_T(x, stride)
    wt = jnp.transpose(w, (0, 2, 3, 1)).reshape(Cout, 9 * Cin).astype(jnp.bfloat16)
    M = N * Ho * Wo
    scale = shift = None
    if bn is not None:
        scale, shift = _fold_bn(bn)
    res2 = None if res is None else res.reshape(Cout, M)
    out = fused_conv(a, wt, scale=scale, shift=shift, res=res2,
                     emit_raw=emit_raw and bn is not None)
    if bn is not None and emit_raw:
        act, raw = out
        return (act.reshape(Cout, N, Ho, Wo), raw.reshape(Cout, N, Ho, Wo))
    return out.reshape(Cout, N, Ho, Wo), None


def conv1x1_plain(x, w, stride):
    """1x1 shortcut conv, no epilogue. x:(Cin,N,H,W); w:(Cout,Cin,1,1)."""
    Cin, N, H, W = x.shape
    Cout = w.shape[0]
    xs = x[:, :, ::stride, ::stride]
    Ho, Wo = xs.shape[2], xs.shape[3]
    M = N * Ho * Wo
    a = xs.reshape(Cin, M).astype(jnp.bfloat16)
    wt = w.reshape(Cout, Cin).astype(jnp.bfloat16)
    return fused_conv(a, wt).reshape(Cout, N, Ho, Wo)


# ---------------- Model forward ----------------

def wideresnet_forward(params, x_nchw):
    # NCHW -> (C, N, H, W): channels on sublanes, pixels flattened onto lanes.
    x = jnp.transpose(x_nchw, (1, 0, 2, 3)).astype(jnp.float32)
    blocks = params['blocks']

    # Stem conv; fuse blocks[0].bn1 + ReLU as epilogue. If block 0 is
    # equalInOut, its residual is the *pre-BN* stem output -> emit raw too.
    act, raw = conv3x3_fused(x, params['conv1'], 1,
                             bn=blocks[0]['bn1'], emit_raw=blocks[0]['equal'])

    for i, blk in enumerate(blocks):
        nxt_bn = blocks[i + 1]['bn1'] if i + 1 < len(blocks) else params['bn_final']
        nxt_raw = (i + 1 < len(blocks)) and blocks[i + 1]['equal']

        if blk['equal']:
            residual = raw                                      # pre-BN block input
        else:
            residual = conv1x1_plain(act, blk['shortcut'], blk['stride'])

        # conv1 (+ bn2/relu2 fused)
        a2, _ = conv3x3_fused(act, blk['conv1'], blk['stride'], bn=blk['bn2'])
        # conv2 + residual (+ next block's bn1/relu1, or final bn/relu, fused)
        act, raw = conv3x3_fused(a2, blk['conv2'], 1, bn=nxt_bn,
                                 res=residual, emit_raw=nxt_raw)

    # act == relu(bn_final(.)); fused global avgpool (== avg_pool2d(out, 8)
    # for 32x32 inputs) + FC + bias.
    C, N, Hf, Wf = act.shape
    logits_t = pallas_pool_fc(act.reshape(C, N, Hf * Wf),
                              params['fc_w'], params['fc_b'])
    return logits_t.T                                           # (N, num_classes)


# ---------------- Params (matches torch init scheme) ----------------

def init_params(key, depth=10, widen_factor=1, num_classes=10):
    assert (depth - 4) % 6 == 0
    n = (depth - 4) // 6
    nCh = [16, 16 * widen_factor, 32 * widen_factor, 64 * widen_factor]
    ki = iter(jax.random.split(key, 64))

    def conv_w(cout, cin, k):
        std = math.sqrt(2.0 / (k * k * cout))
        return std * jax.random.normal(next(ki), (cout, cin, k, k), jnp.float32)

    def bn_p(c):
        return dict(gamma=jnp.ones((c,), jnp.float32),
                    beta=jnp.zeros((c,), jnp.float32),
                    mean=jnp.zeros((c,), jnp.float32),
                    var=jnp.ones((c,), jnp.float32))

    params = {'conv1': conv_w(nCh[0], 3, 3), 'blocks': []}
    cfgs = [(n, nCh[0], nCh[1], 1), (n, nCh[1], nCh[2], 2), (n, nCh[2], nCh[3], 2)]
    for nb, inp, outp, stride in cfgs:
        for i in range(nb):
            ip = inp if i == 0 else outp
            st = stride if i == 0 else 1
            equal = (ip == outp)
            params['blocks'].append(dict(
                equal=equal, stride=st,
                bn1=bn_p(ip),
                conv1=conv_w(outp, ip, 3),
                bn2=bn_p(outp),
                conv2=conv_w(outp, outp, 3),
                shortcut=None if equal else conv_w(outp, ip, 1),
            ))
    params['bn_final'] = bn_p(nCh[3])
    bound = 1.0 / math.sqrt(nCh[3])
    params['fc_w'] = jax.random.uniform(next(ki), (num_classes, nCh[3]),
                                        jnp.float32, -bound, bound)
    params['fc_b'] = jnp.zeros((num_classes,), jnp.float32)
    return params


# ---------------- Pure-JAX reference (correctness guard) ----------------

def _ref_forward(params, x_nchw):
    def bn_relu(x, bn, eps=1e-5):
        s = bn['gamma'] / jnp.sqrt(bn['var'] + eps)
        b = bn['beta'] - bn['mean'] * s
        return jnp.maximum(x * s[None, :, None, None] + b[None, :, None, None], 0.0)

    def conv(x, w, stride, pad):
        return jax.lax.conv_general_dilated(
            x, w, (stride, stride), [(pad, pad), (pad, pad)],
            dimension_numbers=('NCHW', 'OIHW', 'NCHW'))

    out = conv(x_nchw, params['conv1'], 1, 1)
    for p in params['blocks']:
        if p['equal']:
            o = bn_relu(out, p['bn1'])
            o = conv(o, p['conv1'], p['stride'], 1)
            o = bn_relu(o, p['bn2'])
            o = conv(o, p['conv2'], 1, 1)
            out = out + o
        else:
            xa = bn_relu(out, p['bn1'])
            o = conv(xa, p['conv1'], p['stride'], 1)
            o = bn_relu(o, p['bn2'])
            o = conv(o, p['conv2'], 1, 1)
            out = conv(xa, p['shortcut'], p['stride'], 0) + o
    out = bn_relu(out, params['bn_final'])
    pooled = jnp.mean(out, axis=(2, 3))
    return pooled @ params['fc_w'].T + params['fc_b']


if __name__ == "__main__":
    key = jax.random.PRNGKey(0)
    pkey, xkey = jax.random.split(key)
    # depth=10, widen_factor=1 -> channels [16, 16, 32, 64], one BasicBlock/stage.
    params = init_params(pkey, depth=10, widen_factor=1, num_classes=10)
    # F.avg_pool2d(out, 8) implies CIFAR-style 32x32 inputs.
    x = jax.random.normal(xkey, (2, 3, 32, 32), jnp.float32)

    fwd = jax.jit(lambda inp: wideresnet_forward(params, inp))
    logits = fwd(x)
    jax.block_until_ready(logits)
    assert logits.shape == (2, 10)
    assert bool(jnp.all(jnp.isfinite(logits)))

    # Cross-check against pure-XLA reference (loose tol: bf16 GEMM operands).
    ref = _ref_forward(params, x)
    max_err = float(jnp.max(jnp.abs(logits - ref)))
    tol = 0.1 * max(1.0, float(jnp.max(jnp.abs(ref))))
    assert max_err < tol, f"mismatch vs reference: {max_err} (tol {tol})"

    print("KERNEL_OK")
</pallas_src>

<mosaic_0001>
module attributes {stable_mosaic.version = 11 : i64} {
  func.func @kernel(%arg0: i32, %arg1: memref<16x27xbf16, #tpu.memory_space<vmem>>, %arg2: memref<27x512xbf16, #tpu.memory_space<vmem>>, %arg3: memref<16x1xf32, #tpu.memory_space<vmem>>, %arg4: memref<16x1xf32, #tpu.memory_space<vmem>>, %arg5: memref<16x512xf32, #tpu.memory_space<vmem>>, %arg6: memref<16x512xf32, #tpu.memory_space<vmem>>) attributes {dimension_semantics = [#tpu.dimension_semantics<parallel>], iteration_bounds = array<i64: 4>, scalar_prefetch = 0 : i64, scratch_operands = 0 : i64, tpu.core_type = #tpu.core_type<tc>, window_params = [{pipeline_mode = #tpu.pipeline_mode<synchronous>, transform_indices = @transform_0, window_bounds = array<i64: 16, 27>}, {transform_indices = @transform_1, window_bounds = array<i64: 27, 512>}, {pipeline_mode = #tpu.pipeline_mode<synchronous>, transform_indices = @transform_2, window_bounds = array<i64: 16, 1>}, {pipeline_mode = #tpu.pipeline_mode<synchronous>, transform_indices = @transform_3, window_bounds = array<i64: 16, 1>}, {transform_indices = @transform_4, window_bounds = array<i64: 16, 512>}, {transform_indices = @transform_5, window_bounds = array<i64: 16, 512>}]} {
    %c0 = arith.constant 0 : index
    %c0_0 = arith.constant 0 : index
    %0 = vector.load %arg3[%c0, %c0_0] : memref<16x1xf32, #tpu.memory_space<vmem>>, vector<16x1xf32>
    %c0_1 = arith.constant 0 : index
    %c0_2 = arith.constant 0 : index
    %1 = vector.load %arg4[%c0_1, %c0_2] : memref<16x1xf32, #tpu.memory_space<vmem>>, vector<16x1xf32>
    %c0_3 = arith.constant 0 : index
    %c0_4 = arith.constant 0 : index
    %2 = vector.load %arg1[%c0_3, %c0_4] : memref<16x27xbf16, #tpu.memory_space<vmem>>, vector<16x27xbf16>
    %c0_5 = arith.constant 0 : index
    %c0_6 = arith.constant 0 : index
    %3 = vector.load %arg2[%c0_5, %c0_6] : memref<27x512xbf16, #tpu.memory_space<vmem>>, vector<27x512xbf16>
    %cst = arith.constant dense<0.000000e+00> : vector<16x512xf32>
    %4 = tpu.matmul %2, %3, %cst {dimension_numbers = #tpu.dot_dimension_numbers<[1], [0], [0], [1], [0, 0, 1, 1], [], []>} : vector<16x27xbf16>, vector<27x512xbf16>, vector<16x512xf32> -> vector<16x512xf32>
    %5 = vector.broadcast %0 : vector<16x1xf32> to vector<16x512xf32>
    %6 = arith.mulf %4, %5 : vector<16x512xf32>
    %7 = vector.broadcast %1 : vector<16x1xf32> to vector<16x512xf32>
    %8 = arith.addf %6, %7 : vector<16x512xf32>
    %cst_7 = arith.constant 0.000000e+00 : f32
    %9 = vector.broadcast %cst_7 : f32 to vector<16x512xf32>
    %10 = arith.maximumf %8, %9 : vector<16x512xf32>
    %c0_8 = arith.constant 0 : index
    %c0_9 = arith.constant 0 : index
    %11 = vector.load %arg5[%c0_8, %c0_9] : memref<16x512xf32, #tpu.memory_space<vmem>>, vector<16x512xf32>
    tpu.vector_store %arg5[%c0_8, %c0_9], %10 {strides = array<i32>} : memref<16x512xf32, #tpu.memory_space<vmem>>, vector<16x512xf32>,
    %c0_10 = arith.constant 0 : index
    %c0_11 = arith.constant 0 : index
    %12 = vector.load %arg6[%c0_10, %c0_11] : memref<16x512xf32, #tpu.memory_space<vmem>>, vector<16x512xf32>
    tpu.vector_store %arg6[%c0_10, %c0_11], %4 {strides = array<i32>} : memref<16x512xf32, #tpu.memory_space<vmem>>, vector<16x512xf32>,
    return
  }
  func.func @transform_0(%arg0: i32) -> (i32, i32) {
    %c0_i32 = arith.constant 0 : i32
    %c0_i32_0 = arith.constant 0 : i32
    %c0_i32_1 = arith.constant 0 : i32
    return %c0_i32, %c0_i32_0 : i32, i32
  }
  func.func @transform_1(%arg0: i32) -> (i32, i32) {
    %c0_i32 = arith.constant 0 : i32
    %c0_i32_0 = arith.constant 0 : i32
    return %c0_i32, %arg0 : i32, i32
  }
  func.func @transform_2(%arg0: i32) -> (i32, i32) {
    %c0_i32 = arith.constant 0 : i32
    %c0_i32_0 = arith.constant 0 : i32
    %c0_i32_1 = arith.constant 0 : i32
    return %c0_i32, %c0_i32_0 : i32, i32
  }
  func.func @transform_3(%arg0: i32) -> (i32, i32) {
    %c0_i32 = arith.constant 0 : i32
    %c0_i32_0 = arith.constant 0 : i32
    %c0_i32_1 = arith.constant 0 : i32
    return %c0_i32, %c0_i32_0 : i32, i32
  }
  func.func @transform_4(%arg0: i32) -> (i32, i32) {
    %c0_i32 = arith.constant 0 : i32
    %c0_i32_0 = arith.constant 0 : i32
    return %c0_i32, %arg0 : i32, i32
  }
  func.func @transform_5(%arg0: i32) -> (i32, i32) {
    %c0_i32 = arith.constant 0 : i32
    %c0_i32_0 = arith.constant 0 : i32
    return %c0_i32, %arg0 : i32, i32
  }
}

module attributes {stable_mosaic.version = 11 : i64} {
  func.func @kernel(%arg0: i32, %arg1: memref<16x144xbf16, #tpu.memory_space<vmem>>, %arg2: memref<144x512xbf16, #tpu.memory_space<vmem>>, %arg3: memref<16x1xf32, #tpu.memory_space<vmem>>, %arg4: memref<16x1xf32, #tpu.memory_space<vmem>>, %arg5: memref<16x512xf32, #tpu.memory_space<vmem>>) attributes {dimension_semantics = [#tpu.dimension_semantics<parallel>], iteration_bounds = array<i64: 4>, scalar_prefetch = 0 : i64, scratch_operands = 0 : i64, tpu.core_type = #tpu.core_type<tc>, window_params = [{pipeline_mode = #tpu.pipeline_mode<synchronous>, transform_indices = @transform_0, window_bounds = array<i64: 16, 144>}, {transform_indices = @transform_1, window_bounds = array<i64: 144, 512>}, {pipeline_mode = #tpu.pipeline_mode<synchronous>, transform_indices = @transform_2, window_bounds = array<i64: 16, 1>}, {pipeline_mode = #tpu.pipeline_mode<synchronous>, transform_indices = @transform_3, window_bounds = array<i64: 16, 1>}, {transform_indices = @transform_4, window_bounds = array<i64: 16, 512>}]} {
    %c0 = arith.constant 0 : index
    %c0_0 = arith.constant 0 : index
    %0 = vector.load %arg3[%c0, %c0_0] : memref<16x1xf32, #tpu.memory_space<vmem>>, vector<16x1xf32>
    %c0_1 = arith.constant 0 : index
    %c0_2 = arith.constant 0 : index
    %1 = vector.load %arg4[%c0_1, %c0_2] : memref<16x1xf32, #tpu.memory_space<vmem>>, vector<16x1xf32>
    %c0_3 = arith.constant 0 : index
    %c0_4 = arith.constant 0 : index
    %2 = vector.load %arg1[%c0_3, %c0_4] : memref<16x144xbf16, #tpu.memory_space<vmem>>, vector<16x144xbf16>
    %c0_5 = arith.constant 0 : index
    %c0_6 = arith.constant 0 : index
    %3 = vector.load %arg2[%c0_5, %c0_6] : memref<144x512xbf16, #tpu.memory_space<vmem>>, vector<144x512xbf16>
    %cst = arith.constant dense<0.000000e+00> : vector<16x512xf32>
    %4 = tpu.matmul %2, %3, %cst {dimension_numbers = #tpu.dot_dimension_numbers<[1], [0], [0], [1], [0, 0, 1, 1], [], []>} : vector<16x144xbf16>, vector<144x512xbf16>, vector<16x512xf32> -> vector<16x512xf32>
    %5 = vector.broadcast %0 : vector<16x1xf32> to vector<16x512xf32>
    %6 = arith.mulf %4, %5 : vector<16x512xf32>
    %7 = vector.broadcast %1 : vector<16x1xf32> to vector<16x512xf32>
    %8 = arith.addf %6, %7 : vector<16x512xf32>
    %cst_7 = arith.constant 0.000000e+00 : f32
    %9 = vector.broadcast %cst_7 : f32 to vector<16x512xf32>
    %10 = arith.maximumf %8, %9 : vector<16x512xf32>
    %c0_8 = arith.constant 0 : index
    %c0_9 = arith.constant 0 : index
    %11 = vector.load %arg5[%c0_8, %c0_9] : memref<16x512xf32, #tpu.memory_space<vmem>>, vector<16x512xf32>
    tpu.vector_store %arg5[%c0_8, %c0_9], %10 {strides = array<i32>} : memref<16x512xf32, #tpu.memory_space<vmem>>, vector<16x512xf32>,
    return
  }
  func.func @transform_0(%arg0: i32) -> (i32, i32) {
    %c0_i32 = arith.constant 0 : i32
    %c0_i32_0 = arith.constant 0 : i32
    %c0_i32_1 = arith.constant 0 : i32
    return %c0_i32, %c0_i32_0 : i32, i32
  }
  func.func @transform_1(%arg0: i32) -> (i32, i32) {
    %c0_i32 = arith.constant 0 : i32
    %c0_i32_0 = arith.constant 0 : i32
    return %c0_i32, %arg0 : i32, i32
  }
  func.func @transform_2(%arg0: i32) -> (i32, i32) {
    %c0_i32 = arith.constant 0 : i32
    %c0_i32_0 = arith.constant 0 : i32
    %c0_i32_1 = arith.constant 0 : i32
    return %c0_i32, %c0_i32_0 : i32, i32
  }
  func.func @transform_3(%arg0: i32) -> (i32, i32) {
    %c0_i32 = arith.constant 0 : i32
    %c0_i32_0 = arith.constant 0 : i32
    %c0_i32_1 = arith.constant 0 : i32
    return %c0_i32, %c0_i32_0 : i32, i32
  }
  func.func @transform_4(%arg0: i32) -> (i32, i32) {
    %c0_i32 = arith.constant 0 : i32
    %c0_i32_0 = arith.constant 0 : i32
    return %c0_i32, %arg0 : i32, i32
  }
}

module attributes {stable_mosaic.version = 11 : i64} {
  func.func @kernel(%arg0: i32, %arg1: memref<16x144xbf16, #tpu.memory_space<vmem>>, %arg2: memref<144x512xbf16, #tpu.memory_space<vmem>>, %arg3: memref<16x1xf32, #tpu.memory_space<vmem>>, %arg4: memref<16x1xf32, #tpu.memory_space<vmem>>, %arg5: memref<16x512xf32, #tpu.memory_space<vmem>>, %arg6: memref<16x512xf32, #tpu.memory_space<vmem>>) attributes {dimension_semantics = [#tpu.dimension_semantics<parallel>], iteration_bounds = array<i64: 4>, scalar_prefetch = 0 : i64, scratch_operands = 0 : i64, tpu.core_type = #tpu.core_type<tc>, window_params = [{pipeline_mode = #tpu.pipeline_mode<synchronous>, transform_indices = @transform_0, window_bounds = array<i64: 16, 144>}, {transform_indices = @transform_1, window_bounds = array<i64: 144, 512>}, {pipeline_mode = #tpu.pipeline_mode<synchronous>, transform_indices = @transform_2, window_bounds = array<i64: 16, 1>}, {pipeline_mode = #tpu.pipeline_mode<synchronous>, transform_indices = @transform_3, window_bounds = array<i64: 16, 1>}, {transform_indices = @transform_4, window_bounds = array<i64: 16, 512>}, {transform_indices = @transform_5, window_bounds = array<i64: 16, 512>}]} {
    %c0 = arith.constant 0 : index
    %c0_0 = arith.constant 0 : index
    %0 = vector.load %arg3[%c0, %c0_0] : memref<16x1xf32, #tpu.memory_space<vmem>>, vector<16x1xf32>
    %c0_1 = arith.constant 0 : index
    %c0_2 = arith.constant 0 : index
    %1 = vector.load %arg4[%c0_1, %c0_2] : memref<16x1xf32, #tpu.memory_space<vmem>>, vector<16x1xf32>
    %c0_3 = arith.constant 0 : index
    %c0_4 = arith.constant 0 : index
    %2 = vector.load %arg1[%c0_3, %c0_4] : memref<16x144xbf16, #tpu.memory_space<vmem>>, vector<16x144xbf16>
    %c0_5 = arith.constant 0 : index
    %c0_6 = arith.constant 0 : index
    %3 = vector.load %arg2[%c0_5, %c0_6] : memref<144x512xbf16, #tpu.memory_space<vmem>>, vector<144x512xbf16>
    %cst = arith.constant dense<0.000000e+00> : vector<16x512xf32>
    %4 = tpu.matmul %2, %3, %cst {dimension_numbers = #tpu.dot_dimension_numbers<[1], [0], [0], [1], [0, 0, 1, 1], [], []>} : vector<16x144xbf16>, vector<144x512xbf16>, vector<16x512xf32> -> vector<16x512xf32>
    %c0_7 = arith.constant 0 : index
    %c0_8 = arith.constant 0 : index
    %5 = vector.load %arg5[%c0_7, %c0_8] : memref<16x512xf32, #tpu.memory_space<vmem>>, vector<16x512xf32>
    %6 = arith.addf %4, %5 : vector<16x512xf32>
    %7 = vector.broadcast %0 : vector<16x1xf32> to vector<16x512xf32>
    %8 = arith.mulf %6, %7 : vector<16x512xf32>
    %9 = vector.broadcast %1 : vector<16x1xf32> to vector<16x512xf32>
    %10 = arith.addf %8, %9 : vector<16x512xf32>
    %cst_9 = arith.constant 0.000000e+00 : f32
    %11 = vector.broadcast %cst_9 : f32 to vector<16x512xf32>
    %12 = arith.maximumf %10, %11 : vector<16x512xf32>
    %c0_10 = arith.constant 0 : index
    %c0_11 = arith.constant 0 : index
    %13 = vector.load %arg6[%c0_10, %c0_11] : memref<16x512xf32, #tpu.memory_space<vmem>>, vector<16x512xf32>
    tpu.vector_store %arg6[%c0_10, %c0_11], %12 {strides = array<i32>} : memref<16x512xf32, #tpu.memory_space<vmem>>, vector<16x512xf32>,
    return
  }
  func.func @transform_0(%arg0: i32) -> (i32, i32) {
    %c0_i32 = arith.constant 0 : i32
    %c0_i32_0 = arith.constant 0 : i32
    %c0_i32_1 = arith.constant 0 : i32
    return %c0_i32, %c0_i32_0 : i32, i32
  }
  func.func @transform_1(%arg0: i32) -> (i32, i32) {
    %c0_i32 = arith.constant 0 : i32
    %c0_i32_0 = arith.constant 0 : i32
    return %c0_i32, %arg0 : i32, i32
  }
  func.func @transform_2(%arg0: i32) -> (i32, i32) {
    %c0_i32 = arith.constant 0 : i32
    %c0_i32_0 = arith.constant 0 : i32
    %c0_i32_1 = arith.constant 0 : i32
    return %c0_i32, %c0_i32_0 : i32, i32
  }
  func.func @transform_3(%arg0: i32) -> (i32, i32) {
    %c0_i32 = arith.constant 0 : i32
    %c0_i32_0 = arith.constant 0 : i32
    %c0_i32_1 = arith.constant 0 : i32
    return %c0_i32, %c0_i32_0 : i32, i32
  }
  func.func @transform_4(%arg0: i32) -> (i32, i32) {
    %c0_i32 = arith.constant 0 : i32
    %c0_i32_0 = arith.constant 0 : i32
    return %c0_i32, %arg0 : i32, i32
  }
  func.func @transform_5(%arg0: i32) -> (i32, i32) {
    %c0_i32 = arith.constant 0 : i32
    %c0_i32_0 = arith.constant 0 : i32
    return %c0_i32, %arg0 : i32, i32
  }
}

module attributes {stable_mosaic.version = 11 : i64} {
  func.func @kernel(%arg0: i32, %arg1: memref<32x144xbf16, #tpu.memory_space<vmem>>, %arg2: memref<144x256xbf16, #tpu.memory_space<vmem>>, %arg3: memref<32x1xf32, #tpu.memory_space<vmem>>, %arg4: memref<32x1xf32, #tpu.memory_space<vmem>>, %arg5: memref<32x256xf32, #tpu.memory_space<vmem>>) attributes {dimension_semantics = [#tpu.dimension_semantics<parallel>], iteration_bounds = array<i64: 2>, scalar_prefetch = 0 : i64, scratch_operands = 0 : i64, tpu.core_type = #tpu.core_type<tc>, window_params = [{pipeline_mode = #tpu.pipeline_mode<synchronous>, transform_indices = @transform_0, window_bounds = array<i64: 32, 144>}, {transform_indices = @transform_1, window_bounds = array<i64: 144, 256>}, {pipeline_mode = #tpu.pipeline_mode<synchronous>, transform_indices = @transform_2, window_bounds = array<i64: 32, 1>}, {pipeline_mode = #tpu.pipeline_mode<synchronous>, transform_indices = @transform_3, window_bounds = array<i64: 32, 1>}, {transform_indices = @transform_4, window_bounds = array<i64: 32, 256>}]} {
    %c0 = arith.constant 0 : index
    %c0_0 = arith.constant 0 : index
    %0 = vector.load %arg3[%c0, %c0_0] : memref<32x1xf32, #tpu.memory_space<vmem>>, vector<32x1xf32>
    %c0_1 = arith.constant 0 : index
    %c0_2 = arith.constant 0 : index
    %1 = vector.load %arg4[%c0_1, %c0_2] : memref<32x1xf32, #tpu.memory_space<vmem>>, vector<32x1xf32>
    %c0_3 = arith.constant 0 : index
    %c0_4 = arith.constant 0 : index
    %2 = vector.load %arg1[%c0_3, %c0_4] : memref<32x144xbf16, #tpu.memory_space<vmem>>, vector<32x144xbf16>
    %c0_5 = arith.constant 0 : index
    %c0_6 = arith.constant 0 : index
    %3 = vector.load %arg2[%c0_5, %c0_6] : memref<144x256xbf16, #tpu.memory_space<vmem>>, vector<144x256xbf16>
    %cst = arith.constant dense<0.000000e+00> : vector<32x256xf32>
    %4 = tpu.matmul %2, %3, %cst {dimension_numbers = #tpu.dot_dimension_numbers<[1], [0], [0], [1], [0, 0, 1, 1], [], []>} : vector<32x144xbf16>, vector<144x256xbf16>, vector<32x256xf32> -> vector<32x256xf32>
    %5 = vector.broadcast %0 : vector<32x1xf32> to vector<32x256xf32>
    %6 = arith.mulf %4, %5 : vector<32x256xf32>
    %7 = vector.broadcast %1 : vector<32x1xf32> to vector<32x256xf32>
    %8 = arith.addf %6, %7 : vector<32x256xf32>
    %cst_7 = arith.constant 0.000000e+00 : f32
    %9 = vector.broadcast %cst_7 : f32 to vector<32x256xf32>
    %10 = arith.maximumf %8, %9 : vector<32x256xf32>
    %c0_8 = arith.constant 0 : index
    %c0_9 = arith.constant 0 : index
    %11 = vector.load %arg5[%c0_8, %c0_9] : memref<32x256xf32, #tpu.memory_space<vmem>>, vector<32x256xf32>
    tpu.vector_store %arg5[%c0_8, %c0_9], %10 {strides = array<i32>} : memref<32x256xf32, #tpu.memory_space<vmem>>, vector<32x256xf32>,
    return
  }
  func.func @transform_0(%arg0: i32) -> (i32, i32) {
    %c0_i32 = arith.constant 0 : i32
    %c0_i32_0 = arith.constant 0 : i32
    %c0_i32_1 = arith.constant 0 : i32
    return %c0_i32, %c0_i32_0 : i32, i32
  }
  func.func @transform_1(%arg0: i32) -> (i32, i32) {
    %c0_i32 = arith.constant 0 : i32
    %c0_i32_0 = arith.constant 0 : i32
    return %c0_i32, %arg0 : i32, i32
  }
  func.func @transform_2(%arg0: i32) -> (i32, i32) {
    %c0_i32 = arith.constant 0 : i32
    %c0_i32_0 = arith.constant 0 : i32
    %c0_i32_1 = arith.constant 0 : i32
    return %c0_i32, %c0_i32_0 : i32, i32
  }
  func.func @transform_3(%arg0: i32) -> (i32, i32) {
    %c0_i32 = arith.constant 0 : i32
    %c0_i32_0 = arith.constant 0 : i32
    %c0_i32_1 = arith.constant 0 : i32
    return %c0_i32, %c0_i32_0 : i32, i32
  }
  func.func @transform_4(%arg0: i32) -> (i32, i32) {
    %c0_i32 = arith.constant 0 : i32
    %c0_i32_0 = arith.constant 0 : i32
    return %c0_i32, %arg0 : i32, i32
  }
}

module attributes {stable_mosaic.version = 11 : i64} {
  func.func @kernel(%arg0: i32, %arg1: memref<32x16xbf16, #tpu.memory_space<vmem>>, %arg2: memref<16x256xbf16, #tpu.memory_space<vmem>>, %arg3: memref<32x256xf32, #tpu.memory_space<vmem>>) attributes {dimension_semantics = [#tpu.dimension_semantics<parallel>], iteration_bounds = array<i64: 2>, scalar_prefetch = 0 : i64, scratch_operands = 0 : i64, tpu.core_type = #tpu.core_type<tc>, window_params = [{pipeline_mode = #tpu.pipeline_mode<synchronous>, transform_indices = @transform_0, window_bounds = array<i64: 32, 16>}, {transform_indices = @transform_1, window_bounds = array<i64: 16, 256>}, {transform_indices = @transform_2, window_bounds = array<i64: 32, 256>}]} {
    %c0 = arith.constant 0 : index
    %c0_0 = arith.constant 0 : index
    %0 = vector.load %arg1[%c0, %c0_0] : memref<32x16xbf16, #tpu.memory_space<vmem>>, vector<32x16xbf16>
    %c0_1 = arith.constant 0 : index
    %c0_2 = arith.constant 0 : index
    %1 = vector.load %arg2[%c0_1, %c0_2] : memref<16x256xbf16, #tpu.memory_space<vmem>>, vector<16x256xbf16>
    %cst = arith.constant dense<0.000000e+00> : vector<32x256xf32>
    %2 = tpu.matmul %0, %1, %cst {dimension_numbers = #tpu.dot_dimension_numbers<[1], [0], [0], [1], [0, 0, 1, 1], [], []>} : vector<32x16xbf16>, vector<16x256xbf16>, vector<32x256xf32> -> vector<32x256xf32>
    %c0_3 = arith.constant 0 : index
    %c0_4 = arith.constant 0 : index
    %3 = vector.load %arg3[%c0_3, %c0_4] : memref<32x256xf32, #tpu.memory_space<vmem>>, vector<32x256xf32>
    tpu.vector_store %arg3[%c0_3, %c0_4], %2 {strides = array<i32>} : memref<32x256xf32, #tpu.memory_space<vmem>>, vector<32x256xf32>,
    return
  }
  func.func @transform_0(%arg0: i32) -> (i32, i32) {
    %c0_i32 = arith.constant 0 : i32
    %c0_i32_0 = arith.constant 0 : i32
    %c0_i32_1 = arith.constant 0 : i32
    return %c0_i32, %c0_i32_0 : i32, i32
  }
  func.func @transform_1(%arg0: i32) -> (i32, i32) {
    %c0_i32 = arith.constant 0 : i32
    %c0_i32_0 = arith.constant 0 : i32
    return %c0_i32, %arg0 : i32, i32
  }
  func.func @transform_2(%arg0: i32) -> (i32, i32) {
    %c0_i32 = arith.constant 0 : i32
    %c0_i32_0 = arith.constant 0 : i32
    return %c0_i32, %arg0 : i32, i32
  }
}

module attributes {stable_mosaic.version = 11 : i64} {
  func.func @kernel(%arg0: i32, %arg1: memref<32x288xbf16, #tpu.memory_space<vmem>>, %arg2: memref<288x256xbf16, #tpu.memory_space<vmem>>, %arg3: memref<32x1xf32, #tpu.memory_space<vmem>>, %arg4: memref<32x1xf32, #tpu.memory_space<vmem>>, %arg5: memref<32x256xf32, #tpu.memory_space<vmem>>, %arg6: memref<32x256xf32, #tpu.memory_space<vmem>>) attributes {dimension_semantics = [#tpu.dimension_semantics<parallel>], iteration_bounds = array<i64: 2>, scalar_prefetch = 0 : i64, scratch_operands = 0 : i64, tpu.core_type = #tpu.core_type<tc>, window_params = [{pipeline_mode = #tpu.pipeline_mode<synchronous>, transform_indices = @transform_0, window_bounds = array<i64: 32, 288>}, {transform_indices = @transform_1, window_bounds = array<i64: 288, 256>}, {pipeline_mode = #tpu.pipeline_mode<synchronous>, transform_indices = @transform_2, window_bounds = array<i64: 32, 1>}, {pipeline_mode = #tpu.pipeline_mode<synchronous>, transform_indices = @transform_3, window_bounds = array<i64: 32, 1>}, {transform_indices = @transform_4, window_bounds = array<i64: 32, 256>}, {transform_indices = @transform_5, window_bounds = array<i64: 32, 256>}]} {
    %c0 = arith.constant 0 : index
    %c0_0 = arith.constant 0 : index
    %0 = vector.load %arg3[%c0, %c0_0] : memref<32x1xf32, #tpu.memory_space<vmem>>, vector<32x1xf32>
    %c0_1 = arith.constant 0 : index
    %c0_2 = arith.constant 0 : index
    %1 = vector.load %arg4[%c0_1, %c0_2] : memref<32x1xf32, #tpu.memory_space<vmem>>, vector<32x1xf32>
    %c0_3 = arith.constant 0 : index
    %c0_4 = arith.constant 0 : index
    %2 = vector.load %arg1[%c0_3, %c0_4] : memref<32x288xbf16, #tpu.memory_space<vmem>>, vector<32x288xbf16>
    %c0_5 = arith.constant 0 : index
    %c0_6 = arith.constant 0 : index
    %3 = vector.load %arg2[%c0_5, %c0_6] : memref<288x256xbf16, #tpu.memory_space<vmem>>, vector<288x256xbf16>
    %cst = arith.constant dense<0.000000e+00> : vector<32x256xf32>
    %4 = tpu.matmul %2, %3, %cst {dimension_numbers = #tpu.dot_dimension_numbers<[1], [0], [0], [1], [0, 0, 1, 1], [], []>} : vector<32x288xbf16>, vector<288x256xbf16>, vector<32x256xf32> -> vector<32x256xf32>
    %c0_7 = arith.constant 0 : index
    %c0_8 = arith.constant 0 : index
    %5 = vector.load %arg5[%c0_7, %c0_8] : memref<32x256xf32, #tpu.memory_space<vmem>>, vector<32x256xf32>
    %6 = arith.addf %4, %5 : vector<32x256xf32>
    %7 = vector.broadcast %0 : vector<32x1xf32> to vector<32x256xf32>
    %8 = arith.mulf %6, %7 : vector<32x256xf32>
    %9 = vector.broadcast %1 : vector<32x1xf32> to vector<32x256xf32>
    %10 = arith.addf %8, %9 : vector<32x256xf32>
    %cst_9 = arith.constant 0.000000e+00 : f32
    %11 = vector.broadcast %cst_9 : f32 to vector<32x256xf32>
    %12 = arith.maximumf %10, %11 : vector<32x256xf32>
    %c0_10 = arith.constant 0 : index
    %c0_11 = arith.constant 0 : index
    %13 = vector.load %arg6[%c0_10, %c0_11] : memref<32x256xf32, #tpu.memory_space<vmem>>, vector<32x256xf32>
    tpu.vector_store %arg6[%c0_10, %c0_11], %12 {strides = array<i32>} : memref<32x256xf32, #tpu.memory_space<vmem>>, vector<32x256xf32>,
    return
  }
  func.func @transform_0(%arg0: i32) -> (i32, i32) {
    %c0_i32 = arith.constant 0 : i32
    %c0_i32_0 = arith.constant 0 : i32
    %c0_i32_1 = arith.constant 0 : i32
    return %c0_i32, %c0_i32_0 : i32, i32
  }
  func.func @transform_1(%arg0: i32) -> (i32, i32) {
    %c0_i32 = arith.constant 0 : i32
    %c0_i32_0 = arith.constant 0 : i32
    return %c0_i32, %arg0 : i32, i32
  }
  func.func @transform_2(%arg0: i32) -> (i32, i32) {
    %c0_i32 = arith.constant 0 : i32
    %c0_i32_0 = arith.constant 0 : i32
    %c0_i32_1 = arith.constant 0 : i32
    return %c0_i32, %c0_i32_0 : i32, i32
  }
  func.func @transform_3(%arg0: i32) -> (i32, i32) {
    %c0_i32 = arith.constant 0 : i32
    %c0_i32_0 = arith.constant 0 : i32
    %c0_i32_1 = arith.constant 0 : i32
    return %c0_i32, %c0_i32_0 : i32, i32
  }
  func.func @transform_4(%arg0: i32) -> (i32, i32) {
    %c0_i32 = arith.constant 0 : i32
    %c0_i32_0 = arith.constant 0 : i32
    return %c0_i32, %arg0 : i32, i32
  }
  func.func @transform_5(%arg0: i32) -> (i32, i32) {
    %c0_i32 = arith.constant 0 : i32
    %c0_i32_0 = arith.constant 0 : i32
    return %c0_i32, %arg0 : i32, i32
  }
}

module attributes {stable_mosaic.version = 11 : i64} {
  func.func @kernel(%arg0: i32, %arg1: memref<64x288xbf16, #tpu.memory_space<vmem>>, %arg2: memref<288x128xbf16, #tpu.memory_space<vmem>>, %arg3: memref<64x1xf32, #tpu.memory_space<vmem>>, %arg4: memref<64x1xf32, #tpu.memory_space<vmem>>, %arg5: memref<64x128xf32, #tpu.memory_space<vmem>>) attributes {dimension_semantics = [#tpu.dimension_semantics<parallel>], iteration_bounds = array<i64: 1>, scalar_prefetch = 0 : i64, scratch_operands = 0 : i64, tpu.core_type = #tpu.core_type<tc>, window_params = [{pipeline_mode = #tpu.pipeline_mode<synchronous>, transform_indices = @transform_0, window_bounds = array<i64: 64, 288>}, {transform_indices = @transform_1, window_bounds = array<i64: 288, 128>}, {pipeline_mode = #tpu.pipeline_mode<synchronous>, transform_indices = @transform_2, window_bounds = array<i64: 64, 1>}, {pipeline_mode = #tpu.pipeline_mode<synchronous>, transform_indices = @transform_3, window_bounds = array<i64: 64, 1>}, {transform_indices = @transform_4, window_bounds = array<i64: 64, 128>}]} {
    %c0 = arith.constant 0 : index
    %c0_0 = arith.constant 0 : index
    %0 = vector.load %arg3[%c0, %c0_0] : memref<64x1xf32, #tpu.memory_space<vmem>>, vector<64x1xf32>
    %c0_1 = arith.constant 0 : index
    %c0_2 = arith.constant 0 : index
    %1 = vector.load %arg4[%c0_1, %c0_2] : memref<64x1xf32, #tpu.memory_space<vmem>>, vector<64x1xf32>
    %c0_3 = arith.constant 0 : index
    %c0_4 = arith.constant 0 : index
    %2 = vector.load %arg1[%c0_3, %c0_4] : memref<64x288xbf16, #tpu.memory_space<vmem>>, vector<64x288xbf16>
    %c0_5 = arith.constant 0 : index
    %c0_6 = arith.constant 0 : index
    %3 = vector.load %arg2[%c0_5, %c0_6] : memref<288x128xbf16, #tpu.memory_space<vmem>>, vector<288x128xbf16>
    %cst = arith.constant dense<0.000000e+00> : vector<64x128xf32>
    %4 = tpu.matmul %2, %3, %cst {dimension_numbers = #tpu.dot_dimension_numbers<[1], [0], [0], [1], [0, 0, 1, 1], [], []>} : vector<64x288xbf16>, vector<288x128xbf16>, vector<64x128xf32> -> vector<64x128xf32>
    %5 = vector.broadcast %0 : vector<64x1xf32> to vector<64x128xf32>
    %6 = arith.mulf %4, %5 : vector<64x128xf32>
    %7 = vector.broadcast %1 : vector<64x1xf32> to vector<64x128xf32>
    %8 = arith.addf %6, %7 : vector<64x128xf32>
    %cst_7 = arith.constant 0.000000e+00 : f32
    %9 = vector.broadcast %cst_7 : f32 to vector<64x128xf32>
    %10 = arith.maximumf %8, %9 : vector<64x128xf32>
    %c0_8 = arith.constant 0 : index
    %c0_9 = arith.constant 0 : index
    %11 = vector.load %arg5[%c0_8, %c0_9] : memref<64x128xf32, #tpu.memory_space<vmem>>, vector<64x128xf32>
    tpu.vector_store %arg5[%c0_8, %c0_9], %10 {strides = array<i32>} : memref<64x128xf32, #tpu.memory_space<vmem>>, vector<64x128xf32>,
    return
  }
  func.func @transform_0(%arg0: i32) -> (i32, i32) {
    %c0_i32 = arith.constant 0 : i32
    %c0_i32_0 = arith.constant 0 : i32
    %c0_i32_1 = arith.constant 0 : i32
    return %c0_i32, %c0_i32_0 : i32, i32
  }
  func.func @transform_1(%arg0: i32) -> (i32, i32) {
    %c0_i32 = arith.constant 0 : i32
    %c0_i32_0 = arith.constant 0 : i32
    return %c0_i32, %arg0 : i32, i32
  }
  func.func @transform_2(%arg0: i32) -> (i32, i32) {
    %c0_i32 = arith.constant 0 : i32
    %c0_i32_0 = arith.constant 0 : i32
    %c0_i32_1 = arith.constant 0 : i32
    return %c0_i32, %c0_i32_0 : i32, i32
  }
  func.func @transform_3(%arg0: i32) -> (i32, i32) {
    %c0_i32 = arith.constant 0 : i32
    %c0_i32_0 = arith.constant 0 : i32
    %c0_i32_1 = arith.constant 0 : i32
    return %c0_i32, %c0_i32_0 : i32, i32
  }
  func.func @transform_4(%arg0: i32) -> (i32, i32) {
    %c0_i32 = arith.constant 0 : i32
    %c0_i32_0 = arith.constant 0 : i32
    return %c0_i32, %arg0 : i32, i32
  }
}

module attributes {stable_mosaic.version = 11 : i64} {
  func.func @kernel(%arg0: i32, %arg1: memref<64x32xbf16, #tpu.memory_space<vmem>>, %arg2: memref<32x128xbf16, #tpu.memory_space<vmem>>, %arg3: memref<64x128xf32, #tpu.memory_space<vmem>>) attributes {dimension_semantics = [#tpu.dimension_semantics<parallel>], iteration_bounds = array<i64: 1>, scalar_prefetch = 0 : i64, scratch_operands = 0 : i64, tpu.core_type = #tpu.core_type<tc>, window_params = [{pipeline_mode = #tpu.pipeline_mode<synchronous>, transform_indices = @transform_0, window_bounds = array<i64: 64, 32>}, {transform_indices = @transform_1, window_bounds = array<i64: 32, 128>}, {transform_indices = @transform_2, window_bounds = array<i64: 64, 128>}]} {
    %c0 = arith.constant 0 : index
    %c0_0 = arith.constant 0 : index
    %0 = vector.load %arg1[%c0, %c0_0] : memref<64x32xbf16, #tpu.memory_space<vmem>>, vector<64x32xbf16>
    %c0_1 = arith.constant 0 : index
    %c0_2 = arith.constant 0 : index
    %1 = vector.load %arg2[%c0_1, %c0_2] : memref<32x128xbf16, #tpu.memory_space<vmem>>, vector<32x128xbf16>
    %cst = arith.constant dense<0.000000e+00> : vector<64x128xf32>
    %2 = tpu.matmul %0, %1, %cst {dimension_numbers = #tpu.dot_dimension_numbers<[1], [0], [0], [1], [0, 0, 1, 1], [], []>} : vector<64x32xbf16>, vector<32x128xbf16>, vector<64x128xf32> -> vector<64x128xf32>
    %c0_3 = arith.constant 0 : index
    %c0_4 = arith.constant 0 : index
    %3 = vector.load %arg3[%c0_3, %c0_4] : memref<64x128xf32, #tpu.memory_space<vmem>>, vector<64x128xf32>
    tpu.vector_store %arg3[%c0_3, %c0_4], %2 {strides = array<i32>} : memref<64x128xf32, #tpu.memory_space<vmem>>, vector<64x128xf32>,
    return
  }
  func.func @transform_0(%arg0: i32) -> (i32, i32) {
    %c0_i32 = arith.constant 0 : i32
    %c0_i32_0 = arith.constant 0 : i32
    %c0_i32_1 = arith.constant 0 : i32
    return %c0_i32, %c0_i32_0 : i32, i32
  }
  func.func @transform_1(%arg0: i32) -> (i32, i32) {
    %c0_i32 = arith.constant 0 : i32
    %c0_i32_0 = arith.constant 0 : i32
    return %c0_i32, %arg0 : i32, i32
  }
  func.func @transform_2(%arg0: i32) -> (i32, i32) {
    %c0_i32 = arith.constant 0 : i32
    %c0_i32_0 = arith.constant 0 : i32
    return %c0_i32, %arg0 : i32, i32
  }
}

module attributes {stable_mosaic.version = 11 : i64} {
  func.func @kernel(%arg0: i32, %arg1: memref<64x576xbf16, #tpu.memory_space<vmem>>, %arg2: memref<576x128xbf16, #tpu.memory_space<vmem>>, %arg3: memref<64x1xf32, #tpu.memory_space<vmem>>, %arg4: memref<64x1xf32, #tpu.memory_space<vmem>>, %arg5: memref<64x128xf32, #tpu.memory_space<vmem>>, %arg6: memref<64x128xf32, #tpu.memory_space<vmem>>) attributes {dimension_semantics = [#tpu.dimension_semantics<parallel>], iteration_bounds = array<i64: 1>, scalar_prefetch = 0 : i64, scratch_operands = 0 : i64, tpu.core_type = #tpu.core_type<tc>, window_params = [{pipeline_mode = #tpu.pipeline_mode<synchronous>, transform_indices = @transform_0, window_bounds = array<i64: 64, 576>}, {transform_indices = @transform_1, window_bounds = array<i64: 576, 128>}, {pipeline_mode = #tpu.pipeline_mode<synchronous>, transform_indices = @transform_2, window_bounds = array<i64: 64, 1>}, {pipeline_mode = #tpu.pipeline_mode<synchronous>, transform_indices = @transform_3, window_bounds = array<i64: 64, 1>}, {transform_indices = @transform_4, window_bounds = array<i64: 64, 128>}, {transform_indices = @transform_5, window_bounds = array<i64: 64, 128>}]} {
    %c0 = arith.constant 0 : index
    %c0_0 = arith.constant 0 : index
    %0 = vector.load %arg3[%c0, %c0_0] : memref<64x1xf32, #tpu.memory_space<vmem>>, vector<64x1xf32>
    %c0_1 = arith.constant 0 : index
    %c0_2 = arith.constant 0 : index
    %1 = vector.load %arg4[%c0_1, %c0_2] : memref<64x1xf32, #tpu.memory_space<vmem>>, vector<64x1xf32>
    %c0_3 = arith.constant 0 : index
    %c0_4 = arith.constant 0 : index
    %2 = vector.load %arg1[%c0_3, %c0_4] : memref<64x576xbf16, #tpu.memory_space<vmem>>, vector<64x576xbf16>
    %c0_5 = arith.constant 0 : index
    %c0_6 = arith.constant 0 : index
    %3 = vector.load %arg2[%c0_5, %c0_6] : memref<576x128xbf16, #tpu.memory_space<vmem>>, vector<576x128xbf16>
    %cst = arith.constant dense<0.000000e+00> : vector<64x128xf32>
    %4 = tpu.matmul %2, %3, %cst {dimension_numbers = #tpu.dot_dimension_numbers<[1], [0], [0], [1], [0, 0, 1, 1], [], []>} : vector<64x576xbf16>, vector<576x128xbf16>, vector<64x128xf32> -> vector<64x128xf32>
    %c0_7 = arith.constant 0 : index
    %c0_8 = arith.constant 0 : index
    %5 = vector.load %arg5[%c0_7, %c0_8] : memref<64x128xf32, #tpu.memory_space<vmem>>, vector<64x128xf32>
    %6 = arith.addf %4, %5 : vector<64x128xf32>
    %7 = vector.broadcast %0 : vector<64x1xf32> to vector<64x128xf32>
    %8 = arith.mulf %6, %7 : vector<64x128xf32>
    %9 = vector.broadcast %1 : vector<64x1xf32> to vector<64x128xf32>
    %10 = arith.addf %8, %9 : vector<64x128xf32>
    %cst_9 = arith.constant 0.000000e+00 : f32
    %11 = vector.broadcast %cst_9 : f32 to vector<64x128xf32>
    %12 = arith.maximumf %10, %11 : vector<64x128xf32>
    %c0_10 = arith.constant 0 : index
    %c0_11 = arith.constant 0 : index
    %13 = vector.load %arg6[%c0_10, %c0_11] : memref<64x128xf32, #tpu.memory_space<vmem>>, vector<64x128xf32>
    tpu.vector_store %arg6[%c0_10, %c0_11], %12 {strides = array<i32>} : memref<64x128xf32, #tpu.memory_space<vmem>>, vector<64x128xf32>,
    return
  }
  func.func @transform_0(%arg0: i32) -> (i32, i32) {
    %c0_i32 = arith.constant 0 : i32
    %c0_i32_0 = arith.constant 0 : i32
    %c0_i32_1 = arith.constant 0 : i32
    return %c0_i32, %c0_i32_0 : i32, i32
  }
  func.func @transform_1(%arg0: i32) -> (i32, i32) {
    %c0_i32 = arith.constant 0 : i32
    %c0_i32_0 = arith.constant 0 : i32
    return %c0_i32, %arg0 : i32, i32
  }
  func.func @transform_2(%arg0: i32) -> (i32, i32) {
    %c0_i32 = arith.constant 0 : i32
    %c0_i32_0 = arith.constant 0 : i32
    %c0_i32_1 = arith.constant 0 : i32
    return %c0_i32, %c0_i32_0 : i32, i32
  }
  func.func @transform_3(%arg0: i32) -> (i32, i32) {
    %c0_i32 = arith.constant 0 : i32
    %c0_i32_0 = arith.constant 0 : i32
    %c0_i32_1 = arith.constant 0 : i32
    return %c0_i32, %c0_i32_0 : i32, i32
  }
  func.func @transform_4(%arg0: i32) -> (i32, i32) {
    %c0_i32 = arith.constant 0 : i32
    %c0_i32_0 = arith.constant 0 : i32
    return %c0_i32, %arg0 : i32, i32
  }
  func.func @transform_5(%arg0: i32) -> (i32, i32) {
    %c0_i32 = arith.constant 0 : i32
    %c0_i32_0 = arith.constant 0 : i32
    return %c0_i32, %arg0 : i32, i32
  }
}

module attributes {stable_mosaic.version = 11 : i64} {
  func.func @_pool_fc_kernel(%arg0: memref<64x2x64xf32, #tpu.memory_space<vmem>>, %arg1: memref<10x64xf32, #tpu.memory_space<vmem>>, %arg2: memref<10x1xf32, #tpu.memory_space<vmem>>, %arg3: memref<10x2xf32, #tpu.memory_space<vmem>>) attributes {dimension_semantics = [], scalar_prefetch = 0 : i64, scratch_operands = 0 : i64, tpu.core_type = #tpu.core_type<tc>} {
    %c0 = arith.constant 0 : index
    %c0_0 = arith.constant 0 : index
    %c0_1 = arith.constant 0 : index
    %0 = vector.load %arg0[%c0, %c0_0, %c0_1] : memref<64x2x64xf32, #tpu.memory_space<vmem>>, vector<64x2x64xf32>
    %cst = arith.constant dense<0.000000e+00> : vector<64x2xf32>
    %1 = vector.multi_reduction <add>, %0, %cst [2] : vector<64x2x64xf32> to vector<64x2xf32>
    %cst_2 = arith.constant 6.400000e+01 : f32
    %2 = vector.broadcast %cst_2 : f32 to vector<64x2xf32>
    %3 = arith.divf %1, %2 : vector<64x2xf32>
    %c0_3 = arith.constant 0 : index
    %c0_4 = arith.constant 0 : index
    %4 = vector.load %arg1[%c0_3, %c0_4] : memref<10x64xf32, #tpu.memory_space<vmem>>, vector<10x64xf32>
    %cst_5 = arith.constant dense<0.000000e+00> : vector<10x2xf32>
    %5 = tpu.matmul %4, %3, %cst_5 {dimension_numbers = #tpu.dot_dimension_numbers<[1], [0], [0], [1], [0, 0, 1, 1], [], []>} : vector<10x64xf32>, vector<64x2xf32>, vector<10x2xf32> -> vector<10x2xf32>
    %c0_6 = arith.constant 0 : index
    %c0_7 = arith.constant 0 : index
    %6 = vector.load %arg2[%c0_6, %c0_7] : memref<10x1xf32, #tpu.memory_space<vmem>>, vector<10x1xf32>
    %7 = vector.broadcast %6 : vector<10x1xf32> to vector<10x2xf32>
    %8 = arith.addf %5, %7 : vector<10x2xf32>
    %c0_8 = arith.constant 0 : index
    %c0_9 = arith.constant 0 : index
    %9 = vector.load %arg3[%c0_8, %c0_9] : memref<10x2xf32, #tpu.memory_space<vmem>>, vector<10x2xf32>
    tpu.vector_store %arg3[%c0_8, %c0_9], %8 {strides = array<i32>} : memref<10x2xf32, #tpu.memory_space<vmem>>, vector<10x2xf32>,
    return
  }
}

</mosaic_0001>

<bundles_post_ra>
// kernel: _lambda_.10
= control target key start
LH: loop header
LB: loop body
LE: loop exit
PB: predicated region body
PF: predicated region fallthrough
CT: control target
= control target key end

     0   :  { %s781_s18 = smov 0   ;;  %s783_s19 = smov 0   ;;  %s885_s0 = inlined_call_operand.vmem [shape: bf16[16,27], index: 0, kind: input, shape index: {}]   ;;  %s886_s1 = inlined_call_operand.vmem [shape: bf16[27,2048], index: 1, kind: input, shape index: {}]   ;;  %s887_s2 = inlined_call_operand.vmem [shape: f32[16,1], index: 2, kind: input, shape index: {}]   ;;  %s888_s3 = inlined_call_operand.vmem [shape: f32[16,1], index: 3, kind: input, shape index: {}]   ;;  %s889_s4 = inlined_call_operand.vmem [shape: f32[16,2048], index: 4, kind: output, shape index: {0}]   ;;  %s890_s5 = inlined_call_operand.vmem [shape: f32[16,2048], index: 5, kind: output, shape index: {1}]  }
   0x1   :  { %s785_s20 = smov 0  }
   0x2 LB: > { %s797_s21 = sadd.s32 4294967295, %s747_s20   ;;  %s800_s22 = sadd.s32 1, %s747_s20   ;;  %s747_s20 = sphi %s785_s20, %s894_s20   ;;  %s743_s19 = sphi %s783_s19, %s893_s19   ;;  %s739_s18 = sphi %s781_s18, %s892_s18  }
   0x3   : > { %s41_s23 = ssub.s32 %s747_s20, %s800_s22  ;;  %s44_s24 = sadd.s32 1, %s743_s19 }
   0x4   : > { %p42_p0 = scmp.eq.s32.totalorder %s41_s23, 0  ;;  %p51_p1 = scmp.ne.s32.totalorder %s743_s19, %s739_s18 }
   0x5   : > { %p52_p2 = scmp.eq.s32.totalorder %s747_s20, 0  ;;  %p123_p3 = scmp.eq.s32.totalorder %s797_s21, 3 }
   0x6   : > { %s810_s25 = scalar_select %p42_p0, %s743_s19, %s44_s24  }
   0x7   : > { %p53_p4 = por %p52_p2, %p51_p1  ;;  %p812_p5 = por %p123_p3, %p51_p1 }
   0x8   : > { %p654_p6 = scmp.ge.s32.totalorder %s747_s20, 4 }
   0xa   : > { %180 = sbr.rel (%p654_p6) target bundleno = 25 (0x19), region = 28 }
  0x11   : > { %183 = sbr.rel (!%p53_p4) target bundleno = 25 (0x19), region = 32  ;;  %s185_s27 = sand.u32 (%p53_p4), 1, %s743_s19  }
  0x12   : > { %s681_s28 = sshll.u32 (%p53_p4), %s747_s20, 4  ;;  %s655_s29 = sshll.u32 (%p53_p4), %s185_s27, 6 }
  0x13   : > { %s190_s7 = scalar_lea.vmem (%p53_p4), %s886_s1, %s681_s28  ;;  %s187_s8 = scalar_lea.vmem (%p53_p4), [#allocation2], %s655_s29 }
  0x14   : > { %v203_v0 = vld [vmem:[%s190_s7] sm:$0xff] (%p53_p4)  ;;  %v205_v1 = vld [vmem:[%s190_s7 + $0x8] sm:$0xff] (%p53_p4) }
  0x15   : > { %v207_v2 = vld [vmem:[%s190_s7 + $0x40] sm:$0xff] (%p53_p4)  ;;  %204 = vst [vmem:[%s187_s8] sm:$0xff] (%p53_p4), %v203_v0  ;;  %206 = vst [vmem:[%s187_s8 + $0x8] sm:$0xff] (%p53_p4), %v205_v1  ;;  %v209_v3 = vld [vmem:[%s190_s7 + $0x48] sm:$0xff] (%p53_p4) }
  0x16   : > { %208 = vst [vmem:[%s187_s8 + $0x10] sm:$0xff] (%p53_p4), %v207_v2  ;;  %v211_v4 = vld [vmem:[%s190_s7 + $0x80] sm:$0xff] (%p53_p4)  ;;  %v213_v5 = vld [vmem:[%s190_s7 + $0x88] sm:$0xff] (%p53_p4)  ;;  %210 = vst [vmem:[%s187_s8 + $0x18] sm:$0xff] (%p53_p4), %v209_v3 }
  0x17   : > { %212 = vst [vmem:[%s187_s8 + $0x20] sm:$0xff] (%p53_p4), %v211_v4  ;;  %214 = vst [vmem:[%s187_s8 + $0x28] sm:$0xff] (%p53_p4), %v213_v5  ;;  %v215_v6 = vld [vmem:[%s190_s7 + $0xc0] sm:$0xff] (%p53_p4)  ;;  %v217_v7 = vld [vmem:[%s190_s7 + $0xc8] sm:$0xff] (%p53_p4) }
  0x18   : > { %216 = vst [vmem:[%s187_s8 + $0x30] sm:$0xff] %v215_v6  ;;  %218 = vst [vmem:[%s187_s8 + $0x38] sm:$0xff] %v217_v7 }
  0x19 PF: > { %p658_p7 = scmp.ge.s32.totalorder %s747_s20, 1  ;;  %p223_p8 = scmp.lt.s32.totalorder %s747_s20, 5 }
  0x1b   : > { %p224_p9 = pnand %p658_p7, %p223_p8 }
  0x1c   : > { %s230_s9 = sand.u32 (!%p224_p9), 1, %s739_s18   ;;  %vm323_vm0 = vcmask (!%p224_p9), 1044480   ;;  %v749_v8 = vmov (!%p224_p9), 0   ;;  %vm324_vm1 = vcmask (!%p224_p9), 1045504   ;;  %v750_v9 = vmov (!%p224_p9), 65535   ;;  %v264_v11 = vld [vmem:[%s887_s2] sm:$0xff] (!%p224_p9) }
  0x1d   : > { %227 = sbr.rel (%p224_p9) target bundleno = 278 (0x116), region = 55  ;;  %s825_s10 = sshll.u32 (!%p224_p9), %s230_s9, 6  ;;  %371 = vmatprep.mubr.bf16.mxu0 (!%p224_p9), %v749_v8  ;;  %414 = vmatprep.mubr.bf16.mxu1 (!%p224_p9), %v749_v8  ;;  %v325_v10 = vsel (!%p224_p9), %vm323_vm0, 4294967295, %v750_v9  ;;  %v266_v12 = vld [vmem:[%s888_s3] sm:$0xff] (!%p224_p9)  ;;  %v265_v20 = vld [vmem:[%s887_s2 + $0x8] sm:$0xff] (!%p224_p9)  ;;  %vm319_vm2 = vcmask (!%p224_p9), 220160  }
  0x1e   : > { %710 = vset.pattern.permute.xlu0 (!%p224_p9), %v749_v8  ;;  %711 = vset.pattern.permute.xlu1 (!%p224_p9), %v749_v8  ;;  %s232_s15 = scalar_lea.vmem (!%p224_p9), [#allocation2], %s825_s10  ;;  %v326_v17 = vsel (!%p224_p9), %vm324_vm1, %v325_v10, 0  ;;  %v267_v25 = vld [vmem:[%s888_s3 + $0x8] sm:$0xff] (!%p224_p9)  ;;  %v724_v28 = vld [vmem:[%s885_s0] sm:$0xff] (!%p224_p9)   ;;  %s844_s27 = scalar_lea.vmem (!%p224_p9), [#allocation4], %s825_s10 }
  0x1f   : > { %v712_v13 = vld [vmem:[%s232_s15 + $0x4] ss:$16 sps:$4 sm:$0xff] (!%p224_p9)   ;;  %427 = vperm.xlu0 (!%p224_p9), %710, %v264_v11   ;;  %445 = vperm.xlu1 (!%p224_p9), %711, %v266_v12   ;;  %v714_v14 = vld [vmem:[%s232_s15 + $0xc] ss:$16 sps:$4 sm:$0xff] (!%p224_p9)   ;;  %v716_v15 = vld [vmem:[%s232_s15] ss:$16 sps:$4 sm:$0xff] (!%p224_p9)  }
  0x20   : > { %339 = vmatprep.subr.bf16.mxu0 (!%p224_p9), %v712_v13  ;;  %v717_v16 = vld [vmem:[%s232_s15 + $0x8] ss:$16 sps:$4 sm:$0xff] (!%p224_p9)   ;;  %382 = vmatprep.subr.bf16.mxu1 (!%p224_p9), %v714_v14  ;;  %v718_v18 = vld [vmem:[%s232_s15 + $0x24] ss:$16 sps:$4 sm:$0x3f] (!%p224_p9)   ;;  %s253_s28 = scalar_lea.vmem (!%p224_p9), [#allocation3], %s825_s10 }
  0x21   : > { %340 = vmatpush1.bf16.msra.mxu0 (!%p224_p9), %v716_v15  ;;  %383 = vmatpush1.bf16.msra.mxu1 (!%p224_p9), %v717_v16  ;;  %v720_v19 = vld [vmem:[%s232_s15 + $0x2c] ss:$16 sps:$4 sm:$0x3f] (!%p224_p9)   ;;  %v331_v21 = vand.u32 (!%p224_p9), %v718_v18, %v326_v17  ;;  %v722_v22 = vld [vmem:[%s232_s15 + $0x20] ss:$16 sps:$4 sm:$0x3f] (!%p224_p9)  }
  0x22   : > { %v723_v23 = vld [vmem:[%s232_s15 + $0x28] ss:$16 sps:$4 sm:$0x3f] (!%p224_p9)   ;;  %v337_v24 = vand.u32 (!%p224_p9), %v720_v19, %v326_v17  ;;  %v328_v26 = vand.u32 (!%p224_p9), %v722_v22, %v326_v17 }
  0x23   : > { %432 = vperm.xlu0 (!%p224_p9), %710, %v265_v20   ;;  %341 = vmatprep.subr.bf16.mxu0 (!%p224_p9), %v331_v21  ;;  %v334_v27 = vand.u32 (!%p224_p9), %v723_v23, %v326_v17 }
  0x24   : > { %450 = vperm.xlu1 %711, %v267_v25   ;;  %384 = vmatprep.subr.bf16.mxu1 %v337_v24  ;;  %s682_s29 = sshll.u32 (%p812_p5), %s797_s21, 5 }
  0x25   : > { %342 = vmatpush1.bf16.msra.mxu0 %v328_v26  ;;  %385 = vmatpush1.bf16.msra.mxu1 %v334_v27  ;;  %s498_s7 = scalar_lea.vmem (%p812_p5), %s889_s4, %s682_s29 }
  0x28   : > { %671 = vmatmul.mubr.msk.bf16.vlgmr.msra.gmra.mrb[0].mxu0 %vm319_vm2, %v724_v28  ;;  %672 = vmatmul.mubr.msk.bf16.vlgmr.msra.gmra.mrb[0].mxu1 %vm319_vm2, %v724_v28 }
  0x9e   : > { %v428_v29 = vpop.permute.xlu0 %427  ;;  %v446_v30 = vpop.permute.xlu1 %445 }
  0xa2   : > { %v433_v31 = vpop.permute.xlu0 %432 }
  0xa3   : > { %v451_v48 = vpop.permute.xlu1 %450 }
  0xfb   : > { %v373_v32 = vpop.f32.mrb[0].mxu0  ;;  %v416_v33 = vpop.f32.mrb[0].mxu1 }
  0xfc   : > { %v435_v34 = vmul.f32 %v428_v29, %v373_v32  ;;  %477 = vst [vmem:[%s844_s27] sm:$0xff] %v373_v32  ;;  %v437_v35 = vmul.f32 %v428_v29, %v416_v33  ;;  %479 = vst [vmem:[%s844_s27 + $0x10] sm:$0xff] %v416_v33  ;;  %v375_v36 = vpop.f32.mrb[1].mxu0  ;;  %v418_v37 = vpop.f32.mrb[1].mxu1 }
  0xfd   : > { %v436_v38 = vmul.f32 %v428_v29, %v375_v36  ;;  %478 = vst [vmem:[%s844_s27 + $0x8] sm:$0xff] %v375_v36  ;;  %v438_v39 = vmul.f32 %v428_v29, %v418_v37  ;;  %480 = vst [vmem:[%s844_s27 + $0x18] sm:$0xff] %v418_v37  ;;  %v377_v40 = vpop.f32.mrb[2].mxu0  ;;  %v420_v41 = vpop.f32.mrb[2].mxu1 }
  0xfe   : > { %v453_v42 = vadd.f32 %v446_v30, %v435_v34  ;;  %v455_v43 = vadd.f32 %v446_v30, %v437_v35  ;;  %v439_v44 = vmul.f32 %v433_v31, %v377_v40  ;;  %481 = vst [vmem:[%s844_s27 + $0x20] sm:$0xff] %v377_v40  ;;  %v441_v45 = vmul.f32 %v433_v31, %v420_v41  ;;  %v379_v46 = vpop.f32.mrb[3].mxu0  ;;  %v422_v47 = vpop.f32.mrb[3].mxu1 }
  0xff   : > { %483 = vst [vmem:[%s844_s27 + $0x30] sm:$0xff] %v420_v41  ;;  %v454_v49 = vadd.f32 %v446_v30, %v436_v38  ;;  %v456_v50 = vadd.f32 %v446_v30, %v438_v39  ;;  %v440_v51 = vmul.f32 %v433_v31, %v379_v46  ;;  %482 = vst [vmem:[%s844_s27 + $0x28] sm:$0xff] %v379_v46 }
 0x100   : > { %v442_v52 = vmul.f32 %v433_v31, %v422_v47  ;;  %484 = vst [vmem:[%s844_s27 + $0x38] sm:$0xff] %v422_v47  ;;  %v461_v53 = vmax.f32 %v453_v42, 0.0  ;;  %v463_v54 = vmax.f32 %v455_v43, 0.0  ;;  %v457_v55 = vadd.f32 %v451_v48, %v439_v44  ;;  %495 = sbr.rel (!%p812_p5) target bundleno = 271 (0x10f), region = 63 }
 0x101   : > { %v459_v56 = vadd.f32 %v451_v48, %v441_v45  ;;  %v462_v57 = vmax.f32 %v454_v49, 0.0  ;;  %v464_v58 = vmax.f32 %v456_v50, 0.0  ;;  %v458_v59 = vadd.f32 %v451_v48, %v440_v51 }
 0x102   : > { %v460_v60 = vadd.f32 %v451_v48, %v442_v52  ;;  %469 = vst [vmem:[%s253_s28] sm:$0xff] %v461_v53  ;;  %471 = vst [vmem:[%s253_s28 + $0x10] sm:$0xff] %v463_v54  ;;  %v465_v61 = vmax.f32 %v457_v55, 0.0 }
 0x103   : > { %v467_v62 = vmax.f32 %v459_v56, 0.0  ;;  %470 = vst [vmem:[%s253_s28 + $0x8] sm:$0xff] %v462_v57  ;;  %472 = vst [vmem:[%s253_s28 + $0x18] sm:$0xff] %v464_v58  ;;  %v466_v63 = vmax.f32 %v458_v59, 0.0 }
 0x104   : > { %v468_v0 = vmax.f32 %v460_v60, 0.0  ;;  %473 = vst [vmem:[%s253_s28 + $0x20] sm:$0xff] %v465_v61 }
 0x105   : > { %475 = vst [vmem:[%s253_s28 + $0x30] sm:$0xff] %v467_v62  ;;  %474 = vst [vmem:[%s253_s28 + $0x28] sm:$0xff] %v466_v63 }
 0x106   : > { %476 = vst [vmem:[%s253_s28 + $0x38] sm:$0xff] %v468_v0 }
 0x109   : > { %v511_v1 = vld [vmem:[%s253_s28] sm:$0xff]  ;;  %v515_v3 = vld [vmem:[%s253_s28 + $0x10] sm:$0xff] }
 0x10a   : > { %v513_v2 = vld [vmem:[%s253_s28 + $0x8] sm:$0xff]  ;;  %v517_v4 = vld [vmem:[%s253_s28 + $0x18] sm:$0xff]  ;;  %512 = vst [vmem:[%s498_s7] sm:$0xff] %v511_v1  ;;  %516 = vst [vmem:[%s498_s7 + $0x10] sm:$0xff] %v515_v3 }
 0x10b   : > { %v519_v5 = vld [vmem:[%s253_s28 + $0x20] sm:$0xff]  ;;  %514 = vst [vmem:[%s498_s7 + $0x8] sm:$0xff] %v513_v2  ;;  %518 = vst [vmem:[%s498_s7 + $0x18] sm:$0xff] %v517_v4 }
 0x10c   : > { %v521_v6 = vld [vmem:[%s253_s28 + $0x28] sm:$0xff]  ;;  %520 = vst [vmem:[%s498_s7 + $0x80] sm:$0xff] %v519_v5  ;;  %v523_v7 = vld [vmem:[%s253_s28 + $0x30] sm:$0xff] }
 0x10d   : > { %522 = vst [vmem:[%s498_s7 + $0x88] sm:$0xff] %v521_v6  ;;  %v525_v8 = vld [vmem:[%s253_s28 + $0x38] sm:$0xff]  ;;  %524 = vst [vmem:[%s498_s7 + $0x90] sm:$0xff] %v523_v7 }
 0x10e   : > { %526 = vst [vmem:[%s498_s7 + $0x98] sm:$0xff] %v525_v8 }
 0x10f PF: > { %532 = sbr.rel (!%p812_p5) target bundleno = 278 (0x116), region = 86  ;;  %s683_s8 = sshll.u32 (%p812_p5), %s797_s21, 5  ;;  %v548_v9 = vld [vmem:[%s844_s27] sm:$0xff] (%p812_p5)  ;;  %v550_v10 = vld [vmem:[%s844_s27 + $0x8] sm:$0xff] (%p812_p5)  ;;  %v552_v11 = vld [vmem:[%s844_s27 + $0x10] sm:$0xff] (%p812_p5) }
 0x110   : > { %s535_s11 = scalar_lea.vmem (%p812_p5), %s890_s5, %s683_s8  ;;  %v554_v12 = vld [vmem:[%s844_s27 + $0x18] sm:$0xff] (%p812_p5)  ;;  %v556_v13 = vld [vmem:[%s844_s27 + $0x20] sm:$0xff] (%p812_p5)  ;;  %v558_v14 = vld [vmem:[%s844_s27 + $0x28] sm:$0xff] (%p812_p5) }
 0x111   : > { %549 = vst [vmem:[%s535_s11] sm:$0xff] (%p812_p5), %v548_v9  ;;  %551 = vst [vmem:[%s535_s11 + $0x8] sm:$0xff] (%p812_p5), %v550_v10  ;;  %v560_v15 = vld [vmem:[%s844_s27 + $0x30] sm:$0xff] (%p812_p5)  ;;  %v562_v16 = vld [vmem:[%s844_s27 + $0x38] sm:$0xff] (%p812_p5) }
 0x112   : > { %553 = vst [vmem:[%s535_s11 + $0x10] sm:$0xff] (%p812_p5), %v552_v11  ;;  %555 = vst [vmem:[%s535_s11 + $0x18] sm:$0xff] (%p812_p5), %v554_v12 }
 0x113   : > { %557 = vst [vmem:[%s535_s11 + $0x80] sm:$0xff] (%p812_p5), %v556_v13  ;;  %559 = vst [vmem:[%s535_s11 + $0x88] sm:$0xff] (%p812_p5), %v558_v14 }
 0x114   : > { %561 = vst [vmem:[%s535_s11 + $0x90] sm:$0xff] (%p812_p5), %v560_v15  ;;  %563 = vst [vmem:[%s535_s11 + $0x98] sm:$0xff] (%p812_p5), %v562_v16 }
 0x116 PF: > { %p13_p10 = scmp.ge.s32.totalorder %s800_s22, 6   ;;  %s892_s18 = smov %s743_s19 }
 0x117   : > { %s893_s19 = smov %s810_s25  ;;  %s894_s20 = smov %s800_s22 }
 0x118   :  { %15 = sbr.rel (!%p13_p10) target bundleno = 2 (0x2), region = 152 }

// kernel: _lambda_.11
= control target key start
LH: loop header
LB: loop body
LE: loop exit
PB: predicated region body
PF: predicated region fallthrough
CT: control target
= control target key end

     0   :  { %s946_s15 = smov 0   ;;  %s948_s16 = smov 0   ;;  %s1142_s0 = inlined_call_operand.vmem [shape: bf16[16,144], index: 0, kind: input, shape index: {}]   ;;  %s1143_s1 = inlined_call_operand.vmem [shape: bf16[144,2048], index: 1, kind: input, shape index: {}]   ;;  %s1144_s2 = inlined_call_operand.vmem [shape: f32[16,1], index: 2, kind: input, shape index: {}]   ;;  %s1145_s3 = inlined_call_operand.vmem [shape: f32[16,1], index: 3, kind: input, shape index: {}]   ;;  %s1146_s4 = inlined_call_operand.vmem [shape: f32[16,2048], index: 4, kind: output, shape index: {}]  }
   0x1   :  { %s950_s17 = smov 0  }
   0x2 LB: > { %s755_s18 = sadd.s32 4294967295, %s918_s17   ;;  %s963_s19 = sadd.s32 1, %s918_s17   ;;  %s918_s17 = sphi %s950_s17, %s1150_s17   ;;  %s914_s16 = sphi %s948_s16, %s1149_s16   ;;  %s910_s15 = sphi %s946_s15, %s1148_s15  }
   0x3   : > { %s39_s20 = ssub.s32 %s918_s17, %s963_s19  ;;  %s42_s21 = sadd.s32 1, %s914_s16 }
   0x4   : > { %p40_p0 = scmp.eq.s32.totalorder %s39_s20, 0  ;;  %p49_p1 = scmp.ne.s32.totalorder %s914_s16, %s910_s15 }
   0x5   : > { %p50_p2 = scmp.eq.s32.totalorder %s918_s17, 0  ;;  %p121_p3 = scmp.eq.s32.totalorder %s755_s18, 3 }
   0x6   : > { %s974_s22 = scalar_select %p40_p0, %s914_s16, %s42_s21  }
   0x7   : > { %p51_p4 = por %p50_p2, %p49_p1  ;;  %p976_p5 = por %p121_p3, %p49_p1 }
   0x8   : > { %p758_p6 = scmp.ge.s32.totalorder %s918_s17, 4 }
   0xa   : > { %152 = sbr.rel (%p758_p6) target bundleno = 39 (0x27), region = 28 }
  0x11   : > { %155 = sbr.rel (!%p51_p4) target bundleno = 39 (0x27), region = 32  ;;  %s157_s24 = sand.u32 (%p51_p4), 1, %s914_s16  }
  0x12   : > { %s808_s25 = sshll.u32 (%p51_p4), %s918_s17, 4  ;;  %s810_s26 = smul.u32 (%p51_p4), 288, %s157_s24 }
  0x13   : > { %s986_s29 = scalar_lea.vmem (%p51_p4), %s1143_s1, %s808_s25 }
  0x14   : > { %v175_v0 = vld [vmem:[%s986_s29] sm:$0xff] (%p51_p4)  ;;  %v177_v1 = vld [vmem:[%s986_s29 + $0x8] sm:$0xff] (%p51_p4)  ;;  %s994_s30 = scalar_lea.vmem (%p51_p4), [#allocation2], %s810_s26 }
  0x15   : > { %v179_v2 = vld [vmem:[%s986_s29 + $0x40] sm:$0xff] (%p51_p4)  ;;  %v181_v3 = vld [vmem:[%s986_s29 + $0x48] sm:$0xff] (%p51_p4)  ;;  %176 = vst [vmem:[%s994_s30] sm:$0xff] (%p51_p4), %v175_v0  ;;  %178 = vst [vmem:[%s994_s30 + $0x8] sm:$0xff] (%p51_p4), %v177_v1 }
  0x16   : > { %v183_v4 = vld [vmem:[%s986_s29 + $0x80] sm:$0xff] (%p51_p4)  ;;  %v185_v5 = vld [vmem:[%s986_s29 + $0x88] sm:$0xff] (%p51_p4)  ;;  %180 = vst [vmem:[%s994_s30 + $0x10] sm:$0xff] (%p51_p4), %v179_v2  ;;  %182 = vst [vmem:[%s994_s30 + $0x18] sm:$0xff] (%p51_p4), %v181_v3 }
  0x17   : > { %184 = vst [vmem:[%s994_s30 + $0x20] sm:$0xff] (%p51_p4), %v183_v4  ;;  %186 = vst [vmem:[%s994_s30 + $0x28] sm:$0xff] (%p51_p4), %v185_v5  ;;  %v187_v6 = vld [vmem:[%s986_s29 + $0xc0] sm:$0xff] (%p51_p4)  ;;  %v189_v7 = vld [vmem:[%s986_s29 + $0xc8] sm:$0xff] (%p51_p4) }
  0x18   : > { %v191_v8 = vld [vmem:[%s986_s29 + $0x100] sm:$0xff]  ;;  %188 = vst [vmem:[%s994_s30 + $0x30] sm:$0xff] %v187_v6  ;;  %190 = vst [vmem:[%s994_s30 + $0x38] sm:$0xff] %v189_v7  ;;  %v193_v9 = vld [vmem:[%s986_s29 + $0x108] sm:$0xff] }
  0x19   : > { %192 = vst [vmem:[%s994_s30 + $0x40] sm:$0xff] %v191_v8  ;;  %v195_v10 = vld [vmem:[%s986_s29 + $0x140] sm:$0xff]  ;;  %v197_v11 = vld [vmem:[%s986_s29 + $0x148] sm:$0xff]  ;;  %194 = vst [vmem:[%s994_s30 + $0x48] sm:$0xff] %v193_v9 }
  0x1a   : > { %196 = vst [vmem:[%s994_s30 + $0x50] sm:$0xff] %v195_v10  ;;  %198 = vst [vmem:[%s994_s30 + $0x58] sm:$0xff] %v197_v11  ;;  %v199_v12 = vld [vmem:[%s986_s29 + $0x180] sm:$0xff]  ;;  %v201_v13 = vld [vmem:[%s986_s29 + $0x188] sm:$0xff] }
  0x1b   : > { %v203_v14 = vld [vmem:[%s986_s29 + $0x1c0] sm:$0xff]  ;;  %200 = vst [vmem:[%s994_s30 + $0x60] sm:$0xff] %v199_v12  ;;  %202 = vst [vmem:[%s994_s30 + $0x68] sm:$0xff] %v201_v13  ;;  %v205_v15 = vld [vmem:[%s986_s29 + $0x1c8] sm:$0xff] }
  0x1c   : > { %204 = vst [vmem:[%s994_s30 + $0x70] sm:$0xff] %v203_v14  ;;  %v207_v16 = vld [vmem:[%s986_s29 + $0x200] sm:$0xff]  ;;  %v209_v17 = vld [vmem:[%s986_s29 + $0x208] sm:$0xff]  ;;  %206 = vst [vmem:[%s994_s30 + $0x78] sm:$0xff] %v205_v15 }
  0x1d   : > { %208 = vst [vmem:[%s994_s30 + $0x80] sm:$0xff] %v207_v16  ;;  %210 = vst [vmem:[%s994_s30 + $0x88] sm:$0xff] %v209_v17  ;;  %v211_v18 = vld [vmem:[%s986_s29 + $0x240] sm:$0xff]  ;;  %v213_v19 = vld [vmem:[%s986_s29 + $0x248] sm:$0xff] }
  0x1e   : > { %v215_v20 = vld [vmem:[%s986_s29 + $0x280] sm:$0xff]  ;;  %212 = vst [vmem:[%s994_s30 + $0x90] sm:$0xff] %v211_v18  ;;  %214 = vst [vmem:[%s994_s30 + $0x98] sm:$0xff] %v213_v19  ;;  %v217_v21 = vld [vmem:[%s986_s29 + $0x288] sm:$0xff] }
  0x1f   : > { %216 = vst [vmem:[%s994_s30 + $0xa0] sm:$0xff] %v215_v20  ;;  %v219_v22 = vld [vmem:[%s986_s29 + $0x2c0] sm:$0xff]  ;;  %v221_v23 = vld [vmem:[%s986_s29 + $0x2c8] sm:$0xff]  ;;  %218 = vst [vmem:[%s994_s30 + $0xa8] sm:$0xff] %v217_v21 }
  0x20   : > { %220 = vst [vmem:[%s994_s30 + $0xb0] sm:$0xff] %v219_v22  ;;  %222 = vst [vmem:[%s994_s30 + $0xb8] sm:$0xff] %v221_v23  ;;  %v223_v24 = vld [vmem:[%s986_s29 + $0x300] sm:$0xff]  ;;  %v225_v25 = vld [vmem:[%s986_s29 + $0x308] sm:$0xff] }
  0x21   : > { %v227_v26 = vld [vmem:[%s986_s29 + $0x340] sm:$0xff]  ;;  %224 = vst [vmem:[%s994_s30 + $0xc0] sm:$0xff] %v223_v24  ;;  %226 = vst [vmem:[%s994_s30 + $0xc8] sm:$0xff] %v225_v25  ;;  %v229_v27 = vld [vmem:[%s986_s29 + $0x348] sm:$0xff] }
  0x22   : > { %228 = vst [vmem:[%s994_s30 + $0xd0] sm:$0xff] %v227_v26  ;;  %v231_v28 = vld [vmem:[%s986_s29 + $0x380] sm:$0xff]  ;;  %v233_v29 = vld [vmem:[%s986_s29 + $0x388] sm:$0xff]  ;;  %230 = vst [vmem:[%s994_s30 + $0xd8] sm:$0xff] %v229_v27 }
  0x23   : > { %232 = vst [vmem:[%s994_s30 + $0xe0] sm:$0xff] %v231_v28  ;;  %234 = vst [vmem:[%s994_s30 + $0xe8] sm:$0xff] %v233_v29  ;;  %v235_v30 = vld [vmem:[%s986_s29 + $0x3c0] sm:$0xff]  ;;  %v237_v31 = vld [vmem:[%s986_s29 + $0x3c8] sm:$0xff] }
  0x24   : > { %v239_v32 = vld [vmem:[%s986_s29 + $0x400] sm:$0xff]  ;;  %236 = vst [vmem:[%s994_s30 + $0xf0] sm:$0xff] %v235_v30  ;;  %238 = vst [vmem:[%s994_s30 + $0xf8] sm:$0xff] %v237_v31  ;;  %v241_v33 = vld [vmem:[%s986_s29 + $0x408] sm:$0xff] }
  0x25   : > { %240 = vst [vmem:[%s994_s30 + $0x100] sm:$0xff] %v239_v32  ;;  %v243_v34 = vld [vmem:[%s986_s29 + $0x440] sm:$0xff]  ;;  %v245_v35 = vld [vmem:[%s986_s29 + $0x448] sm:$0xff]  ;;  %242 = vst [vmem:[%s994_s30 + $0x108] sm:$0xff] %v241_v33 }
  0x26   : > { %244 = vst [vmem:[%s994_s30 + $0x110] sm:$0xff] %v243_v34  ;;  %246 = vst [vmem:[%s994_s30 + $0x118] sm:$0xff] %v245_v35 }
  0x27 PF: > { %p761_p7 = scmp.ge.s32.totalorder %s918_s17, 1  ;;  %p251_p8 = scmp.lt.s32.totalorder %s918_s17, 5 }
  0x29   : > { %p252_p9 = pnand %p761_p7, %p251_p8 }
  0x2a   : > { %s258_s5 = sand.u32 (!%p252_p9), 1, %s910_s15   ;;  %vm516_vm0 = vcmask (!%p252_p9), 130048   ;;  %v895_v36 = vld [vmem:[%s1142_s0 + $0x4] ss:$8 sps:$4 sm:$0xff] (!%p252_p9)   ;;  %v920_v39 = vmov (!%p252_p9), 0  }
  0x2b   : > { %255 = sbr.rel (%p252_p9) target bundleno = 314 (0x13a), region = 55  ;;  %v285_v37 = vld [vmem:[%s1144_s2] sm:$0xff] (!%p252_p9)  ;;  %837 = vset.pattern.permute.xlu0 (!%p252_p9), %v920_v39  ;;  %838 = vset.pattern.permute.xlu1 (!%p252_p9), %v920_v39  ;;  %v286_v41 = vld [vmem:[%s1144_s2 + $0x8] sm:$0xff] (!%p252_p9)  ;;  %s762_s27 = sshll.u32 (!%p252_p9), %s258_s5, 6 }
  0x2c   : > { %s811_s6 = smul.u32 (!%p252_p9), 288, %s258_s5  ;;  %v287_v38 = vld [vmem:[%s1145_s3] sm:$0xff] (!%p252_p9)  ;;  %801 = vmatprep.mubr.msk.bf16.mxu0 (!%p252_p9), %vm516_vm0, %v895_v36  ;;  %802 = vmatprep.mubr.msk.bf16.mxu1 (!%p252_p9), %vm516_vm0, %v895_v36  ;;  %v288_v43 = vld [vmem:[%s1145_s3 + $0x8] sm:$0xff] (!%p252_p9)  ;;  %s281_s15 = scalar_lea.vmem (!%p252_p9), [#allocation3], %s762_s27 }
  0x2d   : > { %608 = vperm.xlu0 (!%p252_p9), %837, %v285_v37   ;;  %626 = vperm.xlu1 (!%p252_p9), %838, %v287_v38   ;;  %v893_v14 = vld [vmem:[%s1142_s0] ss:$8 sps:$4 sm:$0xff] (!%p252_p9)  }
  0x2e   : > { %s1076_s13 = scalar_lea.vmem (!%p252_p9), [#allocation2], %s811_s6 }
  0x2f   : > { %v839_v40 = vld [vmem:[%s1076_s13 + $0x4] ss:$16 sps:$4 sm:$0xff] (!%p252_p9)   ;;  %v841_v42 = vld [vmem:[%s1076_s13 + $0xc] ss:$16 sps:$4 sm:$0xff] (!%p252_p9)   ;;  %v843_v44 = vld [vmem:[%s1076_s13] ss:$16 sps:$4 sm:$0xff] (!%p252_p9)  }
  0x30   : > { %520 = vmatprep.subr.bf16.mxu0 (!%p252_p9), %v839_v40  ;;  %v844_v45 = vld [vmem:[%s1076_s13 + $0x8] ss:$16 sps:$4 sm:$0xff] (!%p252_p9)   ;;  %563 = vmatprep.subr.bf16.mxu1 (!%p252_p9), %v841_v42  ;;  %v845_v46 = vld [vmem:[%s1076_s13 + $0x24] ss:$16 sps:$4 sm:$0xff] (!%p252_p9)   ;;  %v847_v47 = vld [vmem:[%s1076_s13 + $0x2c] ss:$16 sps:$4 sm:$0xff] (!%p252_p9)  }
  0x31   : > { %521 = vmatpush1.bf16.msra.mxu0 (!%p252_p9), %v843_v44  ;;  %564 = vmatpush1.bf16.msra.mxu1 (!%p252_p9), %v844_v45  ;;  %v849_v48 = vld [vmem:[%s1076_s13 + $0x20] ss:$16 sps:$4 sm:$0xff] (!%p252_p9)   ;;  %v850_v49 = vld [vmem:[%s1076_s13 + $0x28] ss:$16 sps:$4 sm:$0xff] (!%p252_p9)   ;;  %v851_v50 = vld [vmem:[%s1076_s13 + $0x44] ss:$16 sps:$4 sm:$0xff] (!%p252_p9)  }
  0x32   : > { %522 = vmatprep.subr.bf16.mxu0 %v845_v46  ;;  %613 = vperm.xlu0 %837, %v286_v41   ;;  %v853_v51 = vld [vmem:[%s1076_s13 + $0x4c] ss:$16 sps:$4 sm:$0xff]   ;;  %v855_v52 = vld [vmem:[%s1076_s13 + $0x40] ss:$16 sps:$4 sm:$0xff]   ;;  %v856_v53 = vld [vmem:[%s1076_s13 + $0x48] ss:$16 sps:$4 sm:$0xff]  }
  0x33   : > { %565 = vmatprep.subr.bf16.mxu1 %v847_v47  ;;  %631 = vperm.xlu1 %838, %v288_v43   ;;  %v857_v54 = vld [vmem:[%s1076_s13 + $0x64] ss:$16 sps:$4 sm:$0xff]   ;;  %v859_v55 = vld [vmem:[%s1076_s13 + $0x6c] ss:$16 sps:$4 sm:$0xff]   ;;  %v861_v56 = vld [vmem:[%s1076_s13 + $0x60] ss:$16 sps:$4 sm:$0xff]  }
  0x34   : > { %v862_v57 = vld [vmem:[%s1076_s13 + $0x68] ss:$16 sps:$4 sm:$0xff]   ;;  %v863_v58 = vld [vmem:[%s1076_s13 + $0x84] ss:$16 sps:$4 sm:$0xff]   ;;  %v865_v59 = vld [vmem:[%s1076_s13 + $0x8c] ss:$16 sps:$4 sm:$0xff]  }
  0x35   : > { %523 = vmatpush1.bf16.msra.mxu0 %v849_v48  ;;  %566 = vmatpush1.bf16.msra.mxu1 %v850_v49  ;;  %v867_v60 = vld [vmem:[%s1076_s13 + $0x80] ss:$16 sps:$4 sm:$0xff]   ;;  %v868_v61 = vld [vmem:[%s1076_s13 + $0x88] ss:$16 sps:$4 sm:$0xff]   ;;  %v869_v62 = vld [vmem:[%s1076_s13 + $0xa4] ss:$16 sps:$4 sm:$0xff]  }
  0x36   : > { %524 = vmatprep.subr.bf16.mxu0 %v851_v50  ;;  %567 = vmatprep.subr.bf16.mxu1 %v853_v51  ;;  %v871_v63 = vld [vmem:[%s1076_s13 + $0xac] ss:$16 sps:$4 sm:$0xff]   ;;  %v873_v0 = vld [vmem:[%s1076_s13 + $0xa0] ss:$16 sps:$4 sm:$0xff]   ;;  %v874_v1 = vld [vmem:[%s1076_s13 + $0xa8] ss:$16 sps:$4 sm:$0xff]  }
  0x37   : > { %v875_v2 = vld [vmem:[%s1076_s13 + $0xc4] ss:$16 sps:$4 sm:$0xff]   ;;  %v877_v3 = vld [vmem:[%s1076_s13 + $0xcc] ss:$16 sps:$4 sm:$0xff]   ;;  %v879_v4 = vld [vmem:[%s1076_s13 + $0xc0] ss:$16 sps:$4 sm:$0xff]  }
  0x38   : > { %v880_v5 = vld [vmem:[%s1076_s13 + $0xc8] ss:$16 sps:$4 sm:$0xff]   ;;  %v881_v6 = vld [vmem:[%s1076_s13 + $0xe4] ss:$16 sps:$4 sm:$0xff]   ;;  %v883_v7 = vld [vmem:[%s1076_s13 + $0xec] ss:$16 sps:$4 sm:$0xff]  }
  0x39   : > { %525 = vmatpush1.bf16.msra.mxu0 %v855_v52  ;;  %568 = vmatpush1.bf16.msra.mxu1 %v856_v53  ;;  %v885_v8 = vld [vmem:[%s1076_s13 + $0xe0] ss:$16 sps:$4 sm:$0xff]   ;;  %v886_v9 = vld [vmem:[%s1076_s13 + $0xe8] ss:$16 sps:$4 sm:$0xff]   ;;  %v887_v10 = vld [vmem:[%s1076_s13 + $0x104] ss:$16 sps:$4 sm:$0xff]  }
  0x3a   : > { %526 = vmatprep.subr.bf16.mxu0 %v857_v54  ;;  %569 = vmatprep.subr.bf16.mxu1 %v859_v55  ;;  %v889_v11 = vld [vmem:[%s1076_s13 + $0x10c] ss:$16 sps:$4 sm:$0xff]   ;;  %v891_v12 = vld [vmem:[%s1076_s13 + $0x100] ss:$16 sps:$4 sm:$0xff]   ;;  %v892_v13 = vld [vmem:[%s1076_s13 + $0x108] ss:$16 sps:$4 sm:$0xff]  }
  0x3b   : > { %s809_s28 = sshll.u32 (%p976_p5), %s755_s18, 5 }
  0x3c   : > { %s667_s5 = scalar_lea.vmem (%p976_p5), %s1146_s4, %s809_s28 }
  0x3d   : > { %527 = vmatpush1.bf16.msra.mxu0 %v861_v56  ;;  %570 = vmatpush1.bf16.msra.mxu1 %v862_v57 }
  0x3e   : > { %528 = vmatprep.subr.bf16.mxu0 %v863_v58  ;;  %571 = vmatprep.subr.bf16.mxu1 %v865_v59 }
  0x41   : > { %529 = vmatpush1.bf16.msra.mxu0 %v867_v60  ;;  %572 = vmatpush1.bf16.msra.mxu1 %v868_v61 }
  0x42   : > { %530 = vmatprep.subr.bf16.mxu0 %v869_v62  ;;  %573 = vmatprep.subr.bf16.mxu1 %v871_v63 }
  0x45   : > { %531 = vmatpush1.bf16.msra.mxu0 %v873_v0  ;;  %574 = vmatpush1.bf16.msra.mxu1 %v874_v1 }
  0x46   : > { %532 = vmatprep.subr.bf16.mxu0 %v875_v2  ;;  %575 = vmatprep.subr.bf16.mxu1 %v877_v3 }
  0x49   : > { %533 = vmatpush1.bf16.msra.mxu0 %v879_v4  ;;  %576 = vmatpush1.bf16.msra.mxu1 %v880_v5 }
  0x4a   : > { %534 = vmatprep.subr.bf16.mxu0 %v881_v6  ;;  %577 = vmatprep.subr.bf16.mxu1 %v883_v7 }
  0x4d   : > { %535 = vmatpush1.bf16.msra.mxu0 %v885_v8  ;;  %578 = vmatpush1.bf16.msra.mxu1 %v886_v9 }
  0x4e   : > { %536 = vmatprep.subr.bf16.mxu0 %v887_v10  ;;  %579 = vmatprep.subr.bf16.mxu1 %v889_v11 }
  0x51   : > { %537 = vmatpush1.bf16.msra.mxu0 %v891_v12  ;;  %580 = vmatpush1.bf16.msra.mxu1 %v892_v13 }
  0x54   : > { %553 = vmatmul.mubr.bf16.vlgmr.msra.gmra.mrb[0].mxu0 %v893_v14  ;;  %596 = vmatmul.mubr.bf16.vlgmr.msra.gmra.mrb[0].mxu1 %v893_v14 }
  0xac   : > { %v609_v15 = vpop.permute.xlu0 %608  ;;  %v627_v16 = vpop.permute.xlu1 %626 }
  0xb1   : > { %v614_v17 = vpop.permute.xlu0 %613 }
  0xb2   : > { %v632_v34 = vpop.permute.xlu1 %631 }
 0x127   : > { %v554_v18 = vpop.f32.mrb[0].mxu0  ;;  %v597_v19 = vpop.f32.mrb[0].mxu1 }
 0x128   : > { %v616_v20 = vmul.f32 %v609_v15, %v554_v18  ;;  %v618_v21 = vmul.f32 %v609_v15, %v597_v19  ;;  %v556_v22 = vpop.f32.mrb[1].mxu0  ;;  %v599_v23 = vpop.f32.mrb[1].mxu1 }
 0x129   : > { %v617_v24 = vmul.f32 %v609_v15, %v556_v22  ;;  %v619_v25 = vmul.f32 %v609_v15, %v599_v23  ;;  %v558_v26 = vpop.f32.mrb[2].mxu0  ;;  %v601_v27 = vpop.f32.mrb[2].mxu1 }
 0x12a   : > { %v634_v28 = vadd.f32 %v627_v16, %v616_v20  ;;  %v636_v29 = vadd.f32 %v627_v16, %v618_v21  ;;  %v620_v30 = vmul.f32 %v614_v17, %v558_v26  ;;  %v622_v31 = vmul.f32 %v614_v17, %v601_v27  ;;  %v560_v32 = vpop.f32.mrb[3].mxu0  ;;  %v603_v33 = vpop.f32.mrb[3].mxu1 }
 0x12b   : > { %v635_v35 = vadd.f32 %v627_v16, %v617_v24  ;;  %v637_v36 = vadd.f32 %v627_v16, %v619_v25  ;;  %v621_v37 = vmul.f32 %v614_v17, %v560_v32  ;;  %v623_v38 = vmul.f32 %v614_v17, %v603_v33  ;;  %664 = sbr.rel (!%p976_p5) target bundleno = 314 (0x13a), region = 63 }
 0x12c   : > { %v642_v39 = vmax.f32 %v634_v28, 0.0  ;;  %v644_v40 = vmax.f32 %v636_v29, 0.0  ;;  %v638_v41 = vadd.f32 %v632_v34, %v620_v30  ;;  %v640_v42 = vadd.f32 %v632_v34, %v622_v31 }
 0x12d   : > { %v643_v43 = vmax.f32 %v635_v35, 0.0  ;;  %v645_v44 = vmax.f32 %v637_v36, 0.0  ;;  %v639_v45 = vadd.f32 %v632_v34, %v621_v37  ;;  %v641_v46 = vadd.f32 %v632_v34, %v623_v38 }
 0x12e   : > { %650 = vst [vmem:[%s281_s15] sm:$0xff] %v642_v39  ;;  %652 = vst [vmem:[%s281_s15 + $0x10] sm:$0xff] %v644_v40  ;;  %v646_v47 = vmax.f32 %v638_v41, 0.0  ;;  %v648_v48 = vmax.f32 %v640_v42, 0.0 }
 0x12f   : > { %651 = vst [vmem:[%s281_s15 + $0x8] sm:$0xff] %v643_v43  ;;  %653 = vst [vmem:[%s281_s15 + $0x18] sm:$0xff] %v645_v44  ;;  %v647_v49 = vmax.f32 %v639_v45, 0.0  ;;  %v649_v50 = vmax.f32 %v641_v46, 0.0 }
 0x130   : > { %654 = vst [vmem:[%s281_s15 + $0x20] sm:$0xff] %v646_v47  ;;  %656 = vst [vmem:[%s281_s15 + $0x30] sm:$0xff] %v648_v48 }
 0x131   : > { %655 = vst [vmem:[%s281_s15 + $0x28] sm:$0xff] %v647_v49  ;;  %657 = vst [vmem:[%s281_s15 + $0x38] sm:$0xff] %v649_v50 }
 0x135   : > { %v680_v51 = vld [vmem:[%s281_s15] sm:$0xff]  ;;  %v684_v53 = vld [vmem:[%s281_s15 + $0x10] sm:$0xff] }
 0x136   : > { %v682_v52 = vld [vmem:[%s281_s15 + $0x8] sm:$0xff]  ;;  %v686_v54 = vld [vmem:[%s281_s15 + $0x18] sm:$0xff]  ;;  %681 = vst [vmem:[%s667_s5] sm:$0xff] %v680_v51  ;;  %685 = vst [vmem:[%s667_s5 + $0x10] sm:$0xff] %v684_v53 }
 0x137   : > { %v688_v55 = vld [vmem:[%s281_s15 + $0x20] sm:$0xff]  ;;  %683 = vst [vmem:[%s667_s5 + $0x8] sm:$0xff] %v682_v52  ;;  %687 = vst [vmem:[%s667_s5 + $0x18] sm:$0xff] %v686_v54  ;;  %v692_v57 = vld [vmem:[%s281_s15 + $0x30] sm:$0xff] }
 0x138   : > { %v690_v56 = vld [vmem:[%s281_s15 + $0x28] sm:$0xff]  ;;  %689 = vst [vmem:[%s667_s5 + $0x80] sm:$0xff] %v688_v55  ;;  %v694_v58 = vld [vmem:[%s281_s15 + $0x38] sm:$0xff]  ;;  %693 = vst [vmem:[%s667_s5 + $0x90] sm:$0xff] %v692_v57 }
 0x139   : > { %691 = vst [vmem:[%s667_s5 + $0x88] sm:$0xff] %v690_v56  ;;  %695 = vst [vmem:[%s667_s5 + $0x98] sm:$0xff] %v694_v58 }
 0x13a PF: > { %p11_p10 = scmp.ge.s32.totalorder %s963_s19, 6   ;;  %s1148_s15 = smov %s914_s16 }
 0x13b   : > { %s1149_s16 = smov %s974_s22  ;;  %s1150_s17 = smov %s963_s19 }
 0x13c   :  { %13 = sbr.rel (!%p11_p10) target bundleno = 2 (0x2), region = 117 }

// kernel: _lambda_.12
= control target key start
LH: loop header
LB: loop body
LE: loop exit
PB: predicated region body
PF: predicated region fallthrough
CT: control target
= control target key end

     0   :  { %s1064_s18 = smov 0   ;;  %s1066_s19 = smov 0   ;;  %s1277_s0 = inlined_call_operand.vmem [shape: bf16[16,144], index: 0, kind: input, shape index: {}]   ;;  %s1278_s1 = inlined_call_operand.vmem [shape: bf16[144,2048], index: 1, kind: input, shape index: {}]   ;;  %s1279_s2 = inlined_call_operand.vmem [shape: f32[16,1], index: 2, kind: input, shape index: {}]   ;;  %s1280_s3 = inlined_call_operand.vmem [shape: f32[16,1], index: 3, kind: input, shape index: {}]   ;;  %s1281_s4 = inlined_call_operand.vmem [shape: f32[16,2048], index: 4, kind: input, shape index: {}]   ;;  %s1282_s5 = inlined_call_operand.vmem [shape: f32[16,2048], index: 5, kind: output, shape index: {}]  }
   0x1   :  { %s1068_s20 = smov 0  }
   0x2 LB: > { %s863_s21 = sadd.s32 4294967295, %s1031_s20   ;;  %s1081_s22 = sadd.s32 1, %s1031_s20   ;;  %s1031_s20 = sphi %s1068_s20, %s1287_s20   ;;  %s1027_s19 = sphi %s1066_s19, %s1286_s19   ;;  %s1023_s18 = sphi %s1064_s18, %s1285_s18  }
   0x3   : > { %s40_s23 = ssub.s32 %s1031_s20, %s1081_s22  ;;  %s43_s24 = sadd.s32 1, %s1027_s19 }
   0x4   : > { %p41_p0 = scmp.eq.s32.totalorder %s40_s23, 0  ;;  %p50_p1 = scmp.ne.s32.totalorder %s1027_s19, %s1023_s18 }
   0x5   : > { %p51_p2 = scmp.eq.s32.totalorder %s1031_s20, 0  ;;  %p148_p3 = scmp.eq.s32.totalorder %s863_s21, 3 }
   0x6   : > { %s1092_s25 = scalar_select %p41_p0, %s1027_s19, %s43_s24  }
   0x7   : > { %p1094_p4 = por %p51_p2, %p50_p1  ;;  %p1098_p5 = por %p148_p3, %p50_p1 }
   0x8   : > { %p866_p6 = scmp.ge.s32.totalorder %s1031_s20, 4 }
   0xa   : > { %179 = sbr.rel (%p866_p6) target bundleno = 47 (0x2f), region = 28 }
  0x11   : > { %182 = sbr.rel (!%p1094_p4) target bundleno = 39 (0x27), region = 32  ;;  %s184_s28 = sand.u32 (%p1094_p4), 1, %s1027_s19  }
  0x12   : > { %s920_s29 = sshll.u32 (%p1094_p4), %s1031_s20, 4  ;;  %s923_s30 = smul.u32 (%p1094_p4), 288, %s184_s28 }
  0x13   : > { %s1110_s8 = scalar_lea.vmem (%p1094_p4), %s1278_s1, %s920_s29 }
  0x14   : > { %v202_v0 = vld [vmem:[%s1110_s8] sm:$0xff] (%p1094_p4)  ;;  %v204_v1 = vld [vmem:[%s1110_s8 + $0x8] sm:$0xff] (%p1094_p4)  ;;  %s1118_s9 = scalar_lea.vmem (%p1094_p4), [#allocation2], %s923_s30 }
  0x15   : > { %v206_v2 = vld [vmem:[%s1110_s8 + $0x40] sm:$0xff] (%p1094_p4)  ;;  %v208_v3 = vld [vmem:[%s1110_s8 + $0x48] sm:$0xff] (%p1094_p4)  ;;  %203 = vst [vmem:[%s1118_s9] sm:$0xff] (%p1094_p4), %v202_v0  ;;  %205 = vst [vmem:[%s1118_s9 + $0x8] sm:$0xff] (%p1094_p4), %v204_v1 }
  0x16   : > { %v210_v4 = vld [vmem:[%s1110_s8 + $0x80] sm:$0xff] (%p1094_p4)  ;;  %v212_v5 = vld [vmem:[%s1110_s8 + $0x88] sm:$0xff] (%p1094_p4)  ;;  %207 = vst [vmem:[%s1118_s9 + $0x10] sm:$0xff] (%p1094_p4), %v206_v2  ;;  %209 = vst [vmem:[%s1118_s9 + $0x18] sm:$0xff] (%p1094_p4), %v208_v3 }
  0x17   : > { %211 = vst [vmem:[%s1118_s9 + $0x20] sm:$0xff] (%p1094_p4), %v210_v4  ;;  %213 = vst [vmem:[%s1118_s9 + $0x28] sm:$0xff] (%p1094_p4), %v212_v5  ;;  %v214_v6 = vld [vmem:[%s1110_s8 + $0xc0] sm:$0xff] (%p1094_p4)  ;;  %v216_v7 = vld [vmem:[%s1110_s8 + $0xc8] sm:$0xff] (%p1094_p4) }
  0x18   : > { %v218_v8 = vld [vmem:[%s1110_s8 + $0x100] sm:$0xff]  ;;  %215 = vst [vmem:[%s1118_s9 + $0x30] sm:$0xff] %v214_v6  ;;  %217 = vst [vmem:[%s1118_s9 + $0x38] sm:$0xff] %v216_v7  ;;  %v220_v9 = vld [vmem:[%s1110_s8 + $0x108] sm:$0xff] }
  0x19   : > { %219 = vst [vmem:[%s1118_s9 + $0x40] sm:$0xff] %v218_v8  ;;  %v222_v10 = vld [vmem:[%s1110_s8 + $0x140] sm:$0xff]  ;;  %v224_v11 = vld [vmem:[%s1110_s8 + $0x148] sm:$0xff]  ;;  %221 = vst [vmem:[%s1118_s9 + $0x48] sm:$0xff] %v220_v9 }
  0x1a   : > { %223 = vst [vmem:[%s1118_s9 + $0x50] sm:$0xff] %v222_v10  ;;  %225 = vst [vmem:[%s1118_s9 + $0x58] sm:$0xff] %v224_v11  ;;  %v226_v12 = vld [vmem:[%s1110_s8 + $0x180] sm:$0xff]  ;;  %v228_v13 = vld [vmem:[%s1110_s8 + $0x188] sm:$0xff] }
  0x1b   : > { %v230_v14 = vld [vmem:[%s1110_s8 + $0x1c0] sm:$0xff]  ;;  %227 = vst [vmem:[%s1118_s9 + $0x60] sm:$0xff] %v226_v12  ;;  %229 = vst [vmem:[%s1118_s9 + $0x68] sm:$0xff] %v228_v13  ;;  %v232_v15 = vld [vmem:[%s1110_s8 + $0x1c8] sm:$0xff] }
  0x1c   : > { %231 = vst [vmem:[%s1118_s9 + $0x70] sm:$0xff] %v230_v14  ;;  %v234_v16 = vld [vmem:[%s1110_s8 + $0x200] sm:$0xff]  ;;  %v236_v17 = vld [vmem:[%s1110_s8 + $0x208] sm:$0xff]  ;;  %233 = vst [vmem:[%s1118_s9 + $0x78] sm:$0xff] %v232_v15 }
  0x1d   : > { %235 = vst [vmem:[%s1118_s9 + $0x80] sm:$0xff] %v234_v16  ;;  %237 = vst [vmem:[%s1118_s9 + $0x88] sm:$0xff] %v236_v17  ;;  %v238_v18 = vld [vmem:[%s1110_s8 + $0x240] sm:$0xff]  ;;  %v240_v19 = vld [vmem:[%s1110_s8 + $0x248] sm:$0xff] }
  0x1e   : > { %v242_v20 = vld [vmem:[%s1110_s8 + $0x280] sm:$0xff]  ;;  %239 = vst [vmem:[%s1118_s9 + $0x90] sm:$0xff] %v238_v18  ;;  %241 = vst [vmem:[%s1118_s9 + $0x98] sm:$0xff] %v240_v19  ;;  %v244_v21 = vld [vmem:[%s1110_s8 + $0x288] sm:$0xff] }
  0x1f   : > { %243 = vst [vmem:[%s1118_s9 + $0xa0] sm:$0xff] %v242_v20  ;;  %v246_v22 = vld [vmem:[%s1110_s8 + $0x2c0] sm:$0xff]  ;;  %v248_v23 = vld [vmem:[%s1110_s8 + $0x2c8] sm:$0xff]  ;;  %245 = vst [vmem:[%s1118_s9 + $0xa8] sm:$0xff] %v244_v21 }
  0x20   : > { %247 = vst [vmem:[%s1118_s9 + $0xb0] sm:$0xff] %v246_v22  ;;  %249 = vst [vmem:[%s1118_s9 + $0xb8] sm:$0xff] %v248_v23  ;;  %v250_v24 = vld [vmem:[%s1110_s8 + $0x300] sm:$0xff]  ;;  %v252_v25 = vld [vmem:[%s1110_s8 + $0x308] sm:$0xff] }
  0x21   : > { %v254_v26 = vld [vmem:[%s1110_s8 + $0x340] sm:$0xff]  ;;  %251 = vst [vmem:[%s1118_s9 + $0xc0] sm:$0xff] %v250_v24  ;;  %253 = vst [vmem:[%s1118_s9 + $0xc8] sm:$0xff] %v252_v25  ;;  %v256_v27 = vld [vmem:[%s1110_s8 + $0x348] sm:$0xff] }
  0x22   : > { %255 = vst [vmem:[%s1118_s9 + $0xd0] sm:$0xff] %v254_v26  ;;  %v258_v28 = vld [vmem:[%s1110_s8 + $0x380] sm:$0xff]  ;;  %v260_v29 = vld [vmem:[%s1110_s8 + $0x388] sm:$0xff]  ;;  %257 = vst [vmem:[%s1118_s9 + $0xd8] sm:$0xff] %v256_v27 }
  0x23   : > { %259 = vst [vmem:[%s1118_s9 + $0xe0] sm:$0xff] %v258_v28  ;;  %261 = vst [vmem:[%s1118_s9 + $0xe8] sm:$0xff] %v260_v29  ;;  %v262_v30 = vld [vmem:[%s1110_s8 + $0x3c0] sm:$0xff]  ;;  %v264_v31 = vld [vmem:[%s1110_s8 + $0x3c8] sm:$0xff] }
  0x24   : > { %v266_v32 = vld [vmem:[%s1110_s8 + $0x400] sm:$0xff]  ;;  %263 = vst [vmem:[%s1118_s9 + $0xf0] sm:$0xff] %v262_v30  ;;  %265 = vst [vmem:[%s1118_s9 + $0xf8] sm:$0xff] %v264_v31  ;;  %v268_v33 = vld [vmem:[%s1110_s8 + $0x408] sm:$0xff] }
  0x25   : > { %267 = vst [vmem:[%s1118_s9 + $0x100] sm:$0xff] %v266_v32  ;;  %v270_v34 = vld [vmem:[%s1110_s8 + $0x440] sm:$0xff]  ;;  %v272_v35 = vld [vmem:[%s1110_s8 + $0x448] sm:$0xff]  ;;  %269 = vst [vmem:[%s1118_s9 + $0x108] sm:$0xff] %v268_v33 }
  0x26   : > { %271 = vst [vmem:[%s1118_s9 + $0x110] sm:$0xff] %v270_v34  ;;  %273 = vst [vmem:[%s1118_s9 + $0x118] sm:$0xff] %v272_v35 }
  0x27 PF: > { %279 = sbr.rel (!%p1094_p4) target bundleno = 47 (0x2f), region = 55  ;;  %s281_s10 = sand.u32 (%p1094_p4), 1, %s1027_s19  }
  0x28   : > { %s921_s11 = sshll.u32 (%p1094_p4), %s1031_s20, 5  ;;  %s869_s12 = sshll.u32 (%p1094_p4), %s281_s10, 6 }
  0x29   : > { %s286_s15 = scalar_lea.vmem (%p1094_p4), %s1281_s4, %s921_s11  ;;  %s283_s16 = scalar_lea.vmem (%p1094_p4), [#allocation3], %s869_s12 }
  0x2a   : > { %v299_v36 = vld [vmem:[%s286_s15] sm:$0xff] (%p1094_p4)  ;;  %v301_v37 = vld [vmem:[%s286_s15 + $0x8] sm:$0xff] (%p1094_p4)  ;;  %v303_v38 = vld [vmem:[%s286_s15 + $0x10] sm:$0xff] (%p1094_p4) }
  0x2b   : > { %300 = vst [vmem:[%s283_s16] sm:$0xff] (%p1094_p4), %v299_v36  ;;  %302 = vst [vmem:[%s283_s16 + $0x8] sm:$0xff] (%p1094_p4), %v301_v37  ;;  %v305_v39 = vld [vmem:[%s286_s15 + $0x18] sm:$0xff] (%p1094_p4)  ;;  %v307_v40 = vld [vmem:[%s286_s15 + $0x80] sm:$0xff] (%p1094_p4) }
  0x2c   : > { %304 = vst [vmem:[%s283_s16 + $0x10] sm:$0xff] (%p1094_p4), %v303_v38  ;;  %v309_v41 = vld [vmem:[%s286_s15 + $0x88] sm:$0xff] (%p1094_p4)  ;;  %306 = vst [vmem:[%s283_s16 + $0x18] sm:$0xff] (%p1094_p4), %v305_v39  ;;  %v311_v42 = vld [vmem:[%s286_s15 + $0x90] sm:$0xff] (%p1094_p4) }
  0x2d   : > { %308 = vst [vmem:[%s283_s16 + $0x20] sm:$0xff] (%p1094_p4), %v307_v40  ;;  %310 = vst [vmem:[%s283_s16 + $0x28] sm:$0xff] (%p1094_p4), %v309_v41  ;;  %v313_v43 = vld [vmem:[%s286_s15 + $0x98] sm:$0xff] (%p1094_p4) }
  0x2e   : > { %312 = vst [vmem:[%s283_s16 + $0x30] sm:$0xff] %v311_v42  ;;  %314 = vst [vmem:[%s283_s16 + $0x38] sm:$0xff] %v313_v43 }
  0x2f PF: > { %p872_p7 = scmp.ge.s32.totalorder %s1031_s20, 1  ;;  %p319_p8 = scmp.lt.s32.totalorder %s1031_s20, 5 }
  0x31   : > { %p320_p9 = pnand %p872_p7, %p319_p8 }
  0x32   : > { %s326_s17 = sand.u32 (!%p320_p9), 1, %s1023_s18   ;;  %vm606_vm0 = vcmask (!%p320_p9), 130048   ;;  %v1008_v44 = vld [vmem:[%s1277_s0 + $0x4] ss:$8 sps:$4 sm:$0xff] (!%p320_p9)   ;;  %v1033_v47 = vmov (!%p320_p9), 0  }
  0x33   : > { %323 = sbr.rel (%p320_p9) target bundleno = 324 (0x144), region = 78  ;;  %v367_v45 = vld [vmem:[%s1279_s2] sm:$0xff] (!%p320_p9)  ;;  %950 = vset.pattern.permute.xlu0 (!%p320_p9), %v1033_v47  ;;  %951 = vset.pattern.permute.xlu1 (!%p320_p9), %v1033_v47  ;;  %v368_v49 = vld [vmem:[%s1279_s2 + $0x8] sm:$0xff] (!%p320_p9)  ;;  %s1256_s14 = sshll.u32 (!%p320_p9), %s326_s17, 6 }
  0x34   : > { %s924_s23 = smul.u32 (!%p320_p9), 288, %s326_s17  ;;  %v369_v46 = vld [vmem:[%s1280_s3] sm:$0xff] (!%p320_p9)  ;;  %913 = vmatprep.mubr.msk.bf16.mxu0 (!%p320_p9), %vm606_vm0, %v1008_v44  ;;  %914 = vmatprep.mubr.msk.bf16.mxu1 (!%p320_p9), %vm606_vm0, %v1008_v44  ;;  %v370_v51 = vld [vmem:[%s1280_s3 + $0x8] sm:$0xff] (!%p320_p9)  ;;  %s335_s15 = scalar_lea.vmem (!%p320_p9), [#allocation3], %s1256_s14 }
  0x35   : > { %698 = vperm.xlu0 (!%p320_p9), %950, %v367_v45   ;;  %716 = vperm.xlu1 (!%p320_p9), %951, %v369_v46   ;;  %v1006_v22 = vld [vmem:[%s1277_s0] ss:$8 sps:$4 sm:$0xff] (!%p320_p9)   ;;  %v411_v25 = vld [vmem:[%s335_s15 + $0x10] sm:$0xff] (!%p320_p9)  ;;  %v412_v28 = vld [vmem:[%s335_s15 + $0x18] sm:$0xff] (!%p320_p9)  ;;  %s362_s18 = scalar_lea.vmem (!%p320_p9), [#allocation4], %s1256_s14 }
  0x36   : > { %s1207_s7 = scalar_lea.vmem (!%p320_p9), [#allocation2], %s924_s23  ;;  %v409_v24 = vld [vmem:[%s335_s15] sm:$0xff] (!%p320_p9)  ;;  %v410_v27 = vld [vmem:[%s335_s15 + $0x8] sm:$0xff] (!%p320_p9)  ;;  %v415_v32 = vld [vmem:[%s335_s15 + $0x30] sm:$0xff] (!%p320_p9) }
  0x37   : > { %v952_v48 = vld [vmem:[%s1207_s7 + $0x4] ss:$16 sps:$4 sm:$0xff] (!%p320_p9)   ;;  %v954_v50 = vld [vmem:[%s1207_s7 + $0xc] ss:$16 sps:$4 sm:$0xff] (!%p320_p9)   ;;  %v956_v52 = vld [vmem:[%s1207_s7] ss:$16 sps:$4 sm:$0xff] (!%p320_p9)  }
  0x38   : > { %610 = vmatprep.subr.bf16.mxu0 (!%p320_p9), %v952_v48  ;;  %v957_v53 = vld [vmem:[%s1207_s7 + $0x8] ss:$16 sps:$4 sm:$0xff] (!%p320_p9)   ;;  %653 = vmatprep.subr.bf16.mxu1 (!%p320_p9), %v954_v50  ;;  %v958_v54 = vld [vmem:[%s1207_s7 + $0x24] ss:$16 sps:$4 sm:$0xff] (!%p320_p9)   ;;  %v960_v55 = vld [vmem:[%s1207_s7 + $0x2c] ss:$16 sps:$4 sm:$0xff] (!%p320_p9)  }
  0x39   : > { %611 = vmatpush1.bf16.msra.mxu0 (!%p320_p9), %v956_v52  ;;  %654 = vmatpush1.bf16.msra.mxu1 (!%p320_p9), %v957_v53  ;;  %v962_v56 = vld [vmem:[%s1207_s7 + $0x20] ss:$16 sps:$4 sm:$0xff] (!%p320_p9)   ;;  %v963_v57 = vld [vmem:[%s1207_s7 + $0x28] ss:$16 sps:$4 sm:$0xff] (!%p320_p9)   ;;  %v964_v58 = vld [vmem:[%s1207_s7 + $0x44] ss:$16 sps:$4 sm:$0xff] (!%p320_p9)  }
  0x3a   : > { %612 = vmatprep.subr.bf16.mxu0 %v958_v54  ;;  %703 = vperm.xlu0 %950, %v368_v49   ;;  %v966_v59 = vld [vmem:[%s1207_s7 + $0x4c] ss:$16 sps:$4 sm:$0xff]   ;;  %v968_v60 = vld [vmem:[%s1207_s7 + $0x40] ss:$16 sps:$4 sm:$0xff]   ;;  %v969_v61 = vld [vmem:[%s1207_s7 + $0x48] ss:$16 sps:$4 sm:$0xff]  }
  0x3b   : > { %655 = vmatprep.subr.bf16.mxu1 %v960_v55  ;;  %721 = vperm.xlu1 %951, %v370_v51   ;;  %v970_v62 = vld [vmem:[%s1207_s7 + $0x64] ss:$16 sps:$4 sm:$0xff]   ;;  %v972_v63 = vld [vmem:[%s1207_s7 + $0x6c] ss:$16 sps:$4 sm:$0xff]   ;;  %v974_v0 = vld [vmem:[%s1207_s7 + $0x60] ss:$16 sps:$4 sm:$0xff]  }
  0x3c   : > { %v975_v1 = vld [vmem:[%s1207_s7 + $0x68] ss:$16 sps:$4 sm:$0xff]   ;;  %v976_v2 = vld [vmem:[%s1207_s7 + $0x84] ss:$16 sps:$4 sm:$0xff]   ;;  %v978_v3 = vld [vmem:[%s1207_s7 + $0x8c] ss:$16 sps:$4 sm:$0xff]  }
  0x3d   : > { %613 = vmatpush1.bf16.msra.mxu0 %v962_v56  ;;  %656 = vmatpush1.bf16.msra.mxu1 %v963_v57  ;;  %v980_v4 = vld [vmem:[%s1207_s7 + $0x80] ss:$16 sps:$4 sm:$0xff]   ;;  %v981_v5 = vld [vmem:[%s1207_s7 + $0x88] ss:$16 sps:$4 sm:$0xff]   ;;  %v982_v6 = vld [vmem:[%s1207_s7 + $0xa4] ss:$16 sps:$4 sm:$0xff]  }
  0x3e   : > { %614 = vmatprep.subr.bf16.mxu0 %v964_v58  ;;  %657 = vmatprep.subr.bf16.mxu1 %v966_v59  ;;  %v984_v7 = vld [vmem:[%s1207_s7 + $0xac] ss:$16 sps:$4 sm:$0xff]   ;;  %v986_v8 = vld [vmem:[%s1207_s7 + $0xa0] ss:$16 sps:$4 sm:$0xff]   ;;  %v987_v9 = vld [vmem:[%s1207_s7 + $0xa8] ss:$16 sps:$4 sm:$0xff]  }
  0x3f   : > { %v988_v10 = vld [vmem:[%s1207_s7 + $0xc4] ss:$16 sps:$4 sm:$0xff]   ;;  %v990_v11 = vld [vmem:[%s1207_s7 + $0xcc] ss:$16 sps:$4 sm:$0xff]   ;;  %v992_v12 = vld [vmem:[%s1207_s7 + $0xc0] ss:$16 sps:$4 sm:$0xff]  }
  0x40   : > { %v993_v13 = vld [vmem:[%s1207_s7 + $0xc8] ss:$16 sps:$4 sm:$0xff]   ;;  %v994_v14 = vld [vmem:[%s1207_s7 + $0xe4] ss:$16 sps:$4 sm:$0xff]   ;;  %v996_v15 = vld [vmem:[%s1207_s7 + $0xec] ss:$16 sps:$4 sm:$0xff]  }
  0x41   : > { %615 = vmatpush1.bf16.msra.mxu0 %v968_v60  ;;  %658 = vmatpush1.bf16.msra.mxu1 %v969_v61  ;;  %v998_v16 = vld [vmem:[%s1207_s7 + $0xe0] ss:$16 sps:$4 sm:$0xff]   ;;  %v999_v17 = vld [vmem:[%s1207_s7 + $0xe8] ss:$16 sps:$4 sm:$0xff]   ;;  %v1000_v18 = vld [vmem:[%s1207_s7 + $0x104] ss:$16 sps:$4 sm:$0xff]  }
  0x42   : > { %616 = vmatprep.subr.bf16.mxu0 %v970_v62  ;;  %659 = vmatprep.subr.bf16.mxu1 %v972_v63  ;;  %v1002_v19 = vld [vmem:[%s1207_s7 + $0x10c] ss:$16 sps:$4 sm:$0xff]   ;;  %v1004_v20 = vld [vmem:[%s1207_s7 + $0x100] ss:$16 sps:$4 sm:$0xff]   ;;  %v1005_v21 = vld [vmem:[%s1207_s7 + $0x108] ss:$16 sps:$4 sm:$0xff]  }
  0x43   : > { %v413_v31 = vld [vmem:[%s335_s15 + $0x20] sm:$0xff]  ;;  %v414_v37 = vld [vmem:[%s335_s15 + $0x28] sm:$0xff]  ;;  %v416_v38 = vld [vmem:[%s335_s15 + $0x38] sm:$0xff]  ;;  %s922_s16 = sshll.u32 (%p1098_p5), %s863_s21, 5 }
  0x44   : > { %s757_s24 = scalar_lea.vmem (%p1098_p5), %s1282_s5, %s922_s16 }
  0x45   : > { %617 = vmatpush1.bf16.msra.mxu0 %v974_v0  ;;  %660 = vmatpush1.bf16.msra.mxu1 %v975_v1 }
  0x46   : > { %618 = vmatprep.subr.bf16.mxu0 %v976_v2  ;;  %661 = vmatprep.subr.bf16.mxu1 %v978_v3 }
  0x49   : > { %619 = vmatpush1.bf16.msra.mxu0 %v980_v4  ;;  %662 = vmatpush1.bf16.msra.mxu1 %v981_v5 }
  0x4a   : > { %620 = vmatprep.subr.bf16.mxu0 %v982_v6  ;;  %663 = vmatprep.subr.bf16.mxu1 %v984_v7 }
  0x4d   : > { %621 = vmatpush1.bf16.msra.mxu0 %v986_v8  ;;  %664 = vmatpush1.bf16.msra.mxu1 %v987_v9 }
  0x4e   : > { %622 = vmatprep.subr.bf16.mxu0 %v988_v10  ;;  %665 = vmatprep.subr.bf16.mxu1 %v990_v11 }
  0x51   : > { %623 = vmatpush1.bf16.msra.mxu0 %v992_v12  ;;  %666 = vmatpush1.bf16.msra.mxu1 %v993_v13 }
  0x52   : > { %624 = vmatprep.subr.bf16.mxu0 %v994_v14  ;;  %667 = vmatprep.subr.bf16.mxu1 %v996_v15 }
  0x55   : > { %625 = vmatpush1.bf16.msra.mxu0 %v998_v16  ;;  %668 = vmatpush1.bf16.msra.mxu1 %v999_v17 }
  0x56   : > { %626 = vmatprep.subr.bf16.mxu0 %v1000_v18  ;;  %669 = vmatprep.subr.bf16.mxu1 %v1002_v19 }
  0x59   : > { %627 = vmatpush1.bf16.msra.mxu0 %v1004_v20  ;;  %670 = vmatpush1.bf16.msra.mxu1 %v1005_v21 }
  0x5c   : > { %643 = vmatmul.mubr.bf16.vlgmr.msra.gmra.mrb[0].mxu0 %v1006_v22  ;;  %686 = vmatmul.mubr.bf16.vlgmr.msra.gmra.mrb[0].mxu1 %v1006_v22 }
  0xb4   : > { %v699_v23 = vpop.permute.xlu0 %698  ;;  %v717_v26 = vpop.permute.xlu1 %716 }
  0xb9   : > { %v704_v49 = vpop.permute.xlu0 %703 }
  0xba   : > { %v722_v60 = vpop.permute.xlu1 %721 }
 0x12f   : > { %v644_v29 = vpop.f32.mrb[0].mxu0  ;;  %v687_v30 = vpop.f32.mrb[0].mxu1 }
 0x130   : > { %v645_v33 = vadd.f32 %v644_v29, %v409_v24  ;;  %v688_v34 = vadd.f32 %v687_v30, %v411_v25  ;;  %v646_v35 = vpop.f32.mrb[1].mxu0  ;;  %v689_v36 = vpop.f32.mrb[1].mxu1 }
 0x131   : > { %v647_v39 = vadd.f32 %v646_v35, %v410_v27  ;;  %v690_v40 = vadd.f32 %v689_v36, %v412_v28  ;;  %v648_v41 = vpop.f32.mrb[2].mxu0  ;;  %v691_v42 = vpop.f32.mrb[2].mxu1 }
 0x132   : > { %v706_v43 = vmul.f32 %v699_v23, %v645_v33  ;;  %v708_v44 = vmul.f32 %v699_v23, %v688_v34  ;;  %v649_v45 = vadd.f32 %v648_v41, %v413_v31  ;;  %v692_v46 = vadd.f32 %v691_v42, %v415_v32  ;;  %v650_v47 = vpop.f32.mrb[3].mxu0  ;;  %v693_v48 = vpop.f32.mrb[3].mxu1 }
 0x133   : > { %v707_v50 = vmul.f32 %v699_v23, %v647_v39  ;;  %v709_v51 = vmul.f32 %v699_v23, %v690_v40  ;;  %v651_v52 = vadd.f32 %v650_v47, %v414_v37  ;;  %v694_v53 = vadd.f32 %v693_v48, %v416_v38 }
 0x134   : > { %v724_v54 = vadd.f32 %v717_v26, %v706_v43  ;;  %v726_v55 = vadd.f32 %v717_v26, %v708_v44  ;;  %v710_v56 = vmul.f32 %v704_v49, %v649_v45  ;;  %v712_v57 = vmul.f32 %v704_v49, %v692_v46 }
 0x135   : > { %v725_v58 = vadd.f32 %v717_v26, %v707_v50  ;;  %v727_v59 = vadd.f32 %v717_v26, %v709_v51  ;;  %v711_v61 = vmul.f32 %v704_v49, %v651_v52  ;;  %v713_v62 = vmul.f32 %v704_v49, %v694_v53  ;;  %754 = sbr.rel (!%p1098_p5) target bundleno = 324 (0x144), region = 90 }
 0x136   : > { %v732_v63 = vmax.f32 %v724_v54, 0.0  ;;  %v734_v0 = vmax.f32 %v726_v55, 0.0  ;;  %v728_v1 = vadd.f32 %v722_v60, %v710_v56  ;;  %v730_v2 = vadd.f32 %v722_v60, %v712_v57 }
 0x137   : > { %v733_v3 = vmax.f32 %v725_v58, 0.0  ;;  %v735_v4 = vmax.f32 %v727_v59, 0.0  ;;  %v729_v5 = vadd.f32 %v722_v60, %v711_v61  ;;  %v731_v6 = vadd.f32 %v722_v60, %v713_v62 }
 0x138   : > { %740 = vst [vmem:[%s362_s18] sm:$0xff] %v732_v63  ;;  %742 = vst [vmem:[%s362_s18 + $0x10] sm:$0xff] %v734_v0  ;;  %v736_v7 = vmax.f32 %v728_v1, 0.0  ;;  %v738_v8 = vmax.f32 %v730_v2, 0.0 }
 0x139   : > { %741 = vst [vmem:[%s362_s18 + $0x8] sm:$0xff] %v733_v3  ;;  %743 = vst [vmem:[%s362_s18 + $0x18] sm:$0xff] %v735_v4  ;;  %v737_v9 = vmax.f32 %v729_v5, 0.0  ;;  %v739_v10 = vmax.f32 %v731_v6, 0.0 }
 0x13a   : > { %744 = vst [vmem:[%s362_s18 + $0x20] sm:$0xff] %v736_v7  ;;  %746 = vst [vmem:[%s362_s18 + $0x30] sm:$0xff] %v738_v8 }
 0x13b   : > { %745 = vst [vmem:[%s362_s18 + $0x28] sm:$0xff] %v737_v9  ;;  %747 = vst [vmem:[%s362_s18 + $0x38] sm:$0xff] %v739_v10 }
 0x13f   : > { %v770_v11 = vld [vmem:[%s362_s18] sm:$0xff]  ;;  %v774_v13 = vld [vmem:[%s362_s18 + $0x10] sm:$0xff] }
 0x140   : > { %v772_v12 = vld [vmem:[%s362_s18 + $0x8] sm:$0xff]  ;;  %v776_v14 = vld [vmem:[%s362_s18 + $0x18] sm:$0xff]  ;;  %771 = vst [vmem:[%s757_s24] sm:$0xff] %v770_v11  ;;  %775 = vst [vmem:[%s757_s24 + $0x10] sm:$0xff] %v774_v13 }
 0x141   : > { %v778_v15 = vld [vmem:[%s362_s18 + $0x20] sm:$0xff]  ;;  %773 = vst [vmem:[%s757_s24 + $0x8] sm:$0xff] %v772_v12  ;;  %777 = vst [vmem:[%s757_s24 + $0x18] sm:$0xff] %v776_v14  ;;  %v782_v17 = vld [vmem:[%s362_s18 + $0x30] sm:$0xff] }
 0x142   : > { %v780_v16 = vld [vmem:[%s362_s18 + $0x28] sm:$0xff]  ;;  %779 = vst [vmem:[%s757_s24 + $0x80] sm:$0xff] %v778_v15  ;;  %v784_v18 = vld [vmem:[%s362_s18 + $0x38] sm:$0xff]  ;;  %783 = vst [vmem:[%s757_s24 + $0x90] sm:$0xff] %v782_v17 }
 0x143   : > { %781 = vst [vmem:[%s757_s24 + $0x88] sm:$0xff] %v780_v16  ;;  %785 = vst [vmem:[%s757_s24 + $0x98] sm:$0xff] %v784_v18 }
 0x144 PF: > { %p12_p10 = scmp.ge.s32.totalorder %s1081_s22, 6   ;;  %s1285_s18 = smov %s1027_s19 }
 0x145   : > { %s1286_s19 = smov %s1092_s25  ;;  %s1287_s20 = smov %s1081_s22 }
 0x146   :  { %14 = sbr.rel (!%p12_p10) target bundleno = 2 (0x2), region = 152 }

// kernel: _lambda_.14
= control target key start
LH: loop header
LB: loop body
LE: loop exit
PB: predicated region body
PF: predicated region fallthrough
CT: control target
= control target key end

     0   :  { %s834_s15 = smov 0   ;;  %s836_s16 = smov 0   ;;  %s974_s0 = inlined_call_operand.vmem [shape: bf16[32,144], index: 0, kind: input, shape index: {}]   ;;  %s975_s1 = inlined_call_operand.vmem [shape: bf16[144,512], index: 1, kind: input, shape index: {}]   ;;  %s976_s2 = inlined_call_operand.vmem [shape: f32[32,1], index: 2, kind: input, shape index: {}]   ;;  %s977_s3 = inlined_call_operand.vmem [shape: f32[32,1], index: 3, kind: input, shape index: {}]   ;;  %s978_s4 = inlined_call_operand.vmem [shape: f32[32,512], index: 4, kind: output, shape index: {}]  }
   0x1   :  { %s838_s17 = smov 0  }
   0x2 LB: > { %s665_s18 = sadd.s32 4294967295, %s806_s17   ;;  %s851_s19 = sadd.s32 1, %s806_s17   ;;  %s806_s17 = sphi %s838_s17, %s982_s17   ;;  %s802_s16 = sphi %s836_s16, %s981_s16   ;;  %s798_s15 = sphi %s834_s15, %s980_s15  }
   0x3   : > { %s39_s20 = ssub.s32 %s806_s17, %s851_s19  ;;  %s42_s21 = sadd.s32 1, %s802_s16 }
   0x4   : > { %p40_p0 = scmp.eq.s32.totalorder %s39_s20, 0  ;;  %p49_p1 = scmp.ne.s32.totalorder %s802_s16, %s798_s15 }
   0x5   : > { %p50_p2 = scmp.eq.s32.totalorder %s806_s17, 0  ;;  %p121_p3 = scmp.eq.s32.totalorder %s665_s18, 1 }
   0x6   : > { %s862_s22 = scalar_select %p40_p0, %s802_s16, %s42_s21  }
   0x7   : > { %p51_p4 = por %p50_p2, %p49_p1  ;;  %p864_p5 = por %p121_p3, %p49_p1 }
   0x8   : > { %p668_p6 = scmp.ge.s32.totalorder %s806_s17, 2 }
   0xa   : > { %152 = sbr.rel (%p668_p6) target bundleno = 30 (0x1e), region = 28 }
  0x11   : > { %155 = sbr.rel (!%p51_p4) target bundleno = 30 (0x1e), region = 32  ;;  %s157_s24 = sand.u32 (%p51_p4), 1, %s802_s16  }
  0x12   : > { %s702_s25 = sshll.u32 (%p51_p4), %s806_s17, 3  ;;  %s722_s26 = smul.u32 (%p51_p4), 144, %s157_s24 }
  0x13   : > { %s874_s29 = scalar_lea.vmem (%p51_p4), %s975_s1, %s702_s25 }
  0x14   : > { %v224_v0 = vld [vmem:[%s874_s29] sm:$0xff] (%p51_p4)  ;;  %v226_v1 = vld [vmem:[%s874_s29 + $0x10] sm:$0xff] (%p51_p4)  ;;  %s159_s30 = scalar_lea.vmem (%p51_p4), [#allocation2], %s722_s26 }
  0x15   : > { %v228_v2 = vld [vmem:[%s874_s29 + $0x20] sm:$0xff] (%p51_p4)  ;;  %v230_v3 = vld [vmem:[%s874_s29 + $0x30] sm:$0xff] (%p51_p4)  ;;  %225 = vst [vmem:[%s159_s30] sm:$0xff] (%p51_p4), %v224_v0  ;;  %227 = vst [vmem:[%s159_s30 + $0x8] sm:$0xff] (%p51_p4), %v226_v1 }
  0x16   : > { %v232_v4 = vld [vmem:[%s874_s29 + $0x40] sm:$0xff] (%p51_p4)  ;;  %v234_v5 = vld [vmem:[%s874_s29 + $0x50] sm:$0xff] (%p51_p4)  ;;  %229 = vst [vmem:[%s159_s30 + $0x10] sm:$0xff] (%p51_p4), %v228_v2  ;;  %231 = vst [vmem:[%s159_s30 + $0x18] sm:$0xff] (%p51_p4), %v230_v3 }
  0x17   : > { %233 = vst [vmem:[%s159_s30 + $0x20] sm:$0xff] (%p51_p4), %v232_v4  ;;  %235 = vst [vmem:[%s159_s30 + $0x28] sm:$0xff] (%p51_p4), %v234_v5  ;;  %v236_v6 = vld [vmem:[%s874_s29 + $0x60] sm:$0xff] (%p51_p4)  ;;  %v238_v7 = vld [vmem:[%s874_s29 + $0x70] sm:$0xff] (%p51_p4) }
  0x18   : > { %v240_v8 = vld [vmem:[%s874_s29 + $0x80] sm:$0xff]  ;;  %237 = vst [vmem:[%s159_s30 + $0x30] sm:$0xff] %v236_v6  ;;  %239 = vst [vmem:[%s159_s30 + $0x38] sm:$0xff] %v238_v7  ;;  %v242_v9 = vld [vmem:[%s874_s29 + $0x90] sm:$0xff] }
  0x19   : > { %241 = vst [vmem:[%s159_s30 + $0x40] sm:$0xff] %v240_v8  ;;  %v244_v10 = vld [vmem:[%s874_s29 + $0xa0] sm:$0xff]  ;;  %v246_v11 = vld [vmem:[%s874_s29 + $0xb0] sm:$0xff]  ;;  %243 = vst [vmem:[%s159_s30 + $0x48] sm:$0xff] %v242_v9 }
  0x1a   : > { %245 = vst [vmem:[%s159_s30 + $0x50] sm:$0xff] %v244_v10  ;;  %247 = vst [vmem:[%s159_s30 + $0x58] sm:$0xff] %v246_v11  ;;  %v248_v12 = vld [vmem:[%s874_s29 + $0xc0] sm:$0xff]  ;;  %v250_v13 = vld [vmem:[%s874_s29 + $0xd0] sm:$0xff] }
  0x1b   : > { %v252_v14 = vld [vmem:[%s874_s29 + $0xe0] sm:$0xff]  ;;  %249 = vst [vmem:[%s159_s30 + $0x60] sm:$0xff] %v248_v12  ;;  %251 = vst [vmem:[%s159_s30 + $0x68] sm:$0xff] %v250_v13  ;;  %v254_v15 = vld [vmem:[%s874_s29 + $0xf0] sm:$0xff] }
  0x1c   : > { %253 = vst [vmem:[%s159_s30 + $0x70] sm:$0xff] %v252_v14  ;;  %v256_v16 = vld [vmem:[%s874_s29 + $0x100] sm:$0xff]  ;;  %v258_v17 = vld [vmem:[%s874_s29 + $0x110] sm:$0xff]  ;;  %255 = vst [vmem:[%s159_s30 + $0x78] sm:$0xff] %v254_v15 }
  0x1d   : > { %257 = vst [vmem:[%s159_s30 + $0x80] sm:$0xff] %v256_v16  ;;  %259 = vst [vmem:[%s159_s30 + $0x88] sm:$0xff] %v258_v17 }
  0x1e PF: > { %p671_p7 = scmp.ge.s32.totalorder %s806_s17, 1  ;;  %p264_p8 = scmp.lt.s32.totalorder %s806_s17, 3 }
  0x20   : > { %p265_p9 = pnand %p671_p7, %p264_p8 }
  0x21   : > { %s271_s5 = sand.u32 (!%p265_p9), 1, %s798_s15   ;;  %vm436_vm0 = vcmask (!%p265_p9), 130048   ;;  %v780_v18 = vld [vmem:[%s974_s0 + $0x4] ss:$8 sps:$4 sm:$0xff] (!%p265_p9)   ;;  %v783_v19 = vld [vmem:[%s974_s0 + $0x14] ss:$8 sps:$4 sm:$0xff] (!%p265_p9)  }
  0x22   : > { %268 = sbr.rel (%p265_p9) target bundleno = 306 (0x132), region = 70  ;;  %v808_v20 = vmov (!%p265_p9), 0   ;;  %v300_v21 = vld [vmem:[%s976_s2 + $0x10] sm:$0xff] (!%p265_p9)  ;;  %695 = vmatprep.mubr.msk.bf16.mxu0 (!%p265_p9), %vm436_vm0, %v780_v18  ;;  %v298_v22 = vld [vmem:[%s976_s2] sm:$0xff] (!%p265_p9)  ;;  %696 = vmatprep.mubr.msk.bf16.mxu1 (!%p265_p9), %vm436_vm0, %v783_v19  ;;  %v301_v24 = vld [vmem:[%s976_s2 + $0x18] sm:$0xff] (!%p265_p9)  ;;  %s672_s14 = sshll.u32 (!%p265_p9), %s271_s5, 6 }
  0x23   : > { %s723_s6 = smul.u32 (!%p265_p9), 144, %s271_s5  ;;  %750 = vset.pattern.permute.xlu1 (!%p265_p9), %v808_v20  ;;  %749 = vset.pattern.permute.xlu0 (!%p265_p9), %v808_v20  ;;  %v299_v27 = vld [vmem:[%s976_s2 + $0x8] sm:$0xff] (!%p265_p9)  ;;  %v302_v35 = vld [vmem:[%s977_s3] sm:$0xff] (!%p265_p9)  ;;  %v305_v36 = vld [vmem:[%s977_s3 + $0x18] sm:$0xff] (!%p265_p9)  ;;  %s294_s15 = scalar_lea.vmem (!%p265_p9), [#allocation3], %s672_s14 }
  0x24   : > { %508 = vperm.xlu1 (!%p265_p9), %750, %v300_v21   ;;  %498 = vperm.xlu0 (!%p265_p9), %749, %v298_v22   ;;  %v303_v34 = vld [vmem:[%s977_s3 + $0x8] sm:$0xff] (!%p265_p9)  ;;  %v304_v37 = vld [vmem:[%s977_s3 + $0x10] sm:$0xff] (!%p265_p9) }
  0x25   : > { %s911_s20 = scalar_lea.vmem (!%p265_p9), [#allocation2], %s723_s6  ;;  %v778_v47 = vld [vmem:[%s974_s0] ss:$8 sps:$4 sm:$0xff] (!%p265_p9)   ;;  %v781_v48 = vld [vmem:[%s974_s0 + $0x10] ss:$8 sps:$4 sm:$0xff] (!%p265_p9)  }
  0x26   : > { %v751_v23 = vld [vmem:[%s911_s20 + $0x4] ss:$8 sps:$4 sm:$0xff] (!%p265_p9)   ;;  %v753_v25 = vld [vmem:[%s911_s20] ss:$8 sps:$4 sm:$0xff] (!%p265_p9)   ;;  %v754_v26 = vld [vmem:[%s911_s20 + $0x14] ss:$8 sps:$4 sm:$0xff] (!%p265_p9)  }
  0x27   : > { %443 = vmatprep.subr.bf16.mxu0 (!%p265_p9), %v751_v23  ;;  %704 = vmatprep.subr.bf16.mxu1 (!%p265_p9), %v751_v23  ;;  %v756_v28 = vld [vmem:[%s911_s20 + $0x10] ss:$8 sps:$4 sm:$0xff] (!%p265_p9)   ;;  %v757_v29 = vld [vmem:[%s911_s20 + $0x24] ss:$8 sps:$4 sm:$0xff] (!%p265_p9)   ;;  %v759_v30 = vld [vmem:[%s911_s20 + $0x20] ss:$8 sps:$4 sm:$0xff] (!%p265_p9)  }
  0x28   : > { %444 = vmatpush1.bf16.msra.mxu0 (!%p265_p9), %v753_v25  ;;  %713 = vmatpush1.bf16.msra.mxu1 (!%p265_p9), %v753_v25  ;;  %v760_v31 = vld [vmem:[%s911_s20 + $0x34] ss:$8 sps:$4 sm:$0xff] (!%p265_p9)   ;;  %v762_v32 = vld [vmem:[%s911_s20 + $0x30] ss:$8 sps:$4 sm:$0xff] (!%p265_p9)   ;;  %v763_v33 = vld [vmem:[%s911_s20 + $0x44] ss:$8 sps:$4 sm:$0xff] (!%p265_p9)  }
  0x29   : > { %445 = vmatprep.subr.bf16.mxu0 %v754_v26  ;;  %705 = vmatprep.subr.bf16.mxu1 %v754_v26  ;;  %v765_v38 = vld [vmem:[%s911_s20 + $0x40] ss:$8 sps:$4 sm:$0xff]   ;;  %v766_v39 = vld [vmem:[%s911_s20 + $0x54] ss:$8 sps:$4 sm:$0xff]   ;;  %v768_v40 = vld [vmem:[%s911_s20 + $0x50] ss:$8 sps:$4 sm:$0xff]  }
  0x2a   : > { %513 = vperm.xlu1 %750, %v301_v24   ;;  %503 = vperm.xlu0 %749, %v299_v27   ;;  %v769_v41 = vld [vmem:[%s911_s20 + $0x64] ss:$8 sps:$4 sm:$0xff]   ;;  %v771_v42 = vld [vmem:[%s911_s20 + $0x60] ss:$8 sps:$4 sm:$0xff]   ;;  %v772_v43 = vld [vmem:[%s911_s20 + $0x74] ss:$8 sps:$4 sm:$0xff]  }
  0x2b   : > { %v774_v44 = vld [vmem:[%s911_s20 + $0x70] ss:$8 sps:$4 sm:$0xff]   ;;  %v775_v45 = vld [vmem:[%s911_s20 + $0x84] ss:$8 sps:$4 sm:$0xff]   ;;  %v777_v46 = vld [vmem:[%s911_s20 + $0x80] ss:$8 sps:$4 sm:$0xff]  }
  0x2c   : > { %446 = vmatpush1.bf16.msra.mxu0 %v756_v28  ;;  %714 = vmatpush1.bf16.msra.mxu1 %v756_v28  ;;  %s703_s5 = sshll.u32 (%p864_p5), %s665_s18, 4 }
  0x2d   : > { %447 = vmatprep.subr.bf16.mxu0 %v757_v29  ;;  %706 = vmatprep.subr.bf16.mxu1 %v757_v29  ;;  %s577_s24 = scalar_lea.vmem (%p864_p5), %s978_s4, %s703_s5 }
  0x2e   : > { %531 = vperm.xlu1 %750, %v303_v34   ;;  %526 = vperm.xlu0 %749, %v302_v35  }
  0x30   : > { %448 = vmatpush1.bf16.msra.mxu0 %v759_v30  ;;  %715 = vmatpush1.bf16.msra.mxu1 %v759_v30 }
  0x31   : > { %449 = vmatprep.subr.bf16.mxu0 %v760_v31  ;;  %707 = vmatprep.subr.bf16.mxu1 %v760_v31 }
  0x32   : > { %541 = vperm.xlu1 %750, %v305_v36   ;;  %536 = vperm.xlu0 %749, %v304_v37  }
  0x34   : > { %450 = vmatpush1.bf16.msra.mxu0 %v762_v32  ;;  %716 = vmatpush1.bf16.msra.mxu1 %v762_v32 }
  0x35   : > { %451 = vmatprep.subr.bf16.mxu0 %v763_v33  ;;  %708 = vmatprep.subr.bf16.mxu1 %v763_v33 }
  0x38   : > { %452 = vmatpush1.bf16.msra.mxu0 %v765_v38  ;;  %717 = vmatpush1.bf16.msra.mxu1 %v765_v38 }
  0x39   : > { %453 = vmatprep.subr.bf16.mxu0 %v766_v39  ;;  %709 = vmatprep.subr.bf16.mxu1 %v766_v39 }
  0x3c   : > { %454 = vmatpush1.bf16.msra.mxu0 %v768_v40  ;;  %718 = vmatpush1.bf16.msra.mxu1 %v768_v40 }
  0x3d   : > { %455 = vmatprep.subr.bf16.mxu0 %v769_v41  ;;  %710 = vmatprep.subr.bf16.mxu1 %v769_v41 }
  0x40   : > { %456 = vmatpush1.bf16.msra.mxu0 %v771_v42  ;;  %719 = vmatpush1.bf16.msra.mxu1 %v771_v42 }
  0x41   : > { %457 = vmatprep.subr.bf16.mxu0 %v772_v43  ;;  %711 = vmatprep.subr.bf16.mxu1 %v772_v43 }
  0x44   : > { %458 = vmatpush1.bf16.msra.mxu0 %v774_v44  ;;  %720 = vmatpush1.bf16.msra.mxu1 %v774_v44 }
  0x45   : > { %459 = vmatprep.subr.bf16.mxu0 %v775_v45  ;;  %712 = vmatprep.subr.bf16.mxu1 %v775_v45 }
  0x48   : > { %460 = vmatpush1.bf16.msra.mxu0 %v777_v46  ;;  %721 = vmatpush1.bf16.msra.mxu1 %v777_v46 }
  0x4b   : > { %476 = vmatmul.mubr.bf16.vlgmr.msra.gmra.mrb[0].mxu0 %v778_v47  ;;  %486 = vmatmul.mubr.bf16.vlgmr.msra.gmra.mrb[0].mxu1 %v781_v48 }
  0xa3   : > { %v499_v49 = vpop.permute.xlu0 %498  ;;  %v509_v50 = vpop.permute.xlu1 %508 }
  0xa9   : > { %v504_v51 = vpop.permute.xlu0 %503  ;;  %v514_v52 = vpop.permute.xlu1 %513 }
  0xad   : > { %v527_v53 = vpop.permute.xlu0 %526  ;;  %v532_v54 = vpop.permute.xlu1 %531 }
  0xb1   : > { %v537_v55 = vpop.permute.xlu0 %536  ;;  %v542_v8 = vpop.permute.xlu1 %541 }
 0x11e   : > { %v477_v56 = vpop.f32.mrb[0].mxu0  ;;  %v487_v57 = vpop.f32.mrb[0].mxu1 }
 0x11f   : > { %v516_v58 = vmul.f32 %v499_v49, %v477_v56  ;;  %v520_v59 = vmul.f32 %v509_v50, %v487_v57  ;;  %v479_v60 = vpop.f32.mrb[1].mxu0  ;;  %v489_v61 = vpop.f32.mrb[1].mxu1 }
 0x120   : > { %v517_v62 = vmul.f32 %v499_v49, %v479_v60  ;;  %v521_v63 = vmul.f32 %v509_v50, %v489_v61  ;;  %v481_v0 = vpop.f32.mrb[2].mxu0  ;;  %v491_v1 = vpop.f32.mrb[2].mxu1 }
 0x121   : > { %v544_v2 = vadd.f32 %v527_v53, %v516_v58  ;;  %v548_v3 = vadd.f32 %v537_v55, %v520_v59  ;;  %v518_v4 = vmul.f32 %v504_v51, %v481_v0  ;;  %v522_v5 = vmul.f32 %v514_v52, %v491_v1  ;;  %v483_v6 = vpop.f32.mrb[3].mxu0  ;;  %v493_v7 = vpop.f32.mrb[3].mxu1 }
 0x122   : > { %v545_v9 = vadd.f32 %v527_v53, %v517_v62  ;;  %v549_v10 = vadd.f32 %v537_v55, %v521_v63  ;;  %v519_v11 = vmul.f32 %v504_v51, %v483_v6  ;;  %v523_v12 = vmul.f32 %v514_v52, %v493_v7  ;;  %574 = sbr.rel (!%p864_p5) target bundleno = 306 (0x132), region = 78 }
 0x123   : > { %v552_v13 = vmax.f32 %v544_v2, 0.0  ;;  %v556_v14 = vmax.f32 %v548_v3, 0.0  ;;  %v546_v15 = vadd.f32 %v532_v54, %v518_v4  ;;  %v550_v16 = vadd.f32 %v542_v8, %v522_v5 }
 0x124   : > { %v553_v17 = vmax.f32 %v545_v9, 0.0  ;;  %v557_v18 = vmax.f32 %v549_v10, 0.0  ;;  %v547_v19 = vadd.f32 %v532_v54, %v519_v11  ;;  %v551_v20 = vadd.f32 %v542_v8, %v523_v12 }
 0x125   : > { %560 = vst [vmem:[%s294_s15] sm:$0xff] %v552_v13  ;;  %564 = vst [vmem:[%s294_s15 + $0x20] sm:$0xff] %v556_v14  ;;  %v554_v21 = vmax.f32 %v546_v15, 0.0  ;;  %v558_v22 = vmax.f32 %v550_v16, 0.0 }
 0x126   : > { %561 = vst [vmem:[%s294_s15 + $0x8] sm:$0xff] %v553_v17  ;;  %565 = vst [vmem:[%s294_s15 + $0x28] sm:$0xff] %v557_v18  ;;  %v555_v23 = vmax.f32 %v547_v19, 0.0  ;;  %v559_v24 = vmax.f32 %v551_v20, 0.0 }
 0x127   : > { %562 = vst [vmem:[%s294_s15 + $0x10] sm:$0xff] %v554_v21  ;;  %566 = vst [vmem:[%s294_s15 + $0x30] sm:$0xff] %v558_v22 }
 0x128   : > { %563 = vst [vmem:[%s294_s15 + $0x18] sm:$0xff] %v555_v23  ;;  %567 = vst [vmem:[%s294_s15 + $0x38] sm:$0xff] %v559_v24 }
 0x12c   : > { %v590_v25 = vld [vmem:[%s294_s15] sm:$0xff] }
 0x12d   : > { %v592_v26 = vld [vmem:[%s294_s15 + $0x8] sm:$0xff]  ;;  %v598_v29 = vld [vmem:[%s294_s15 + $0x20] sm:$0xff]  ;;  %591 = vst [vmem:[%s577_s24] sm:$0xff] %v590_v25 }
 0x12e   : > { %v594_v27 = vld [vmem:[%s294_s15 + $0x10] sm:$0xff]  ;;  %v600_v30 = vld [vmem:[%s294_s15 + $0x28] sm:$0xff]  ;;  %593 = vst [vmem:[%s577_s24 + $0x8] sm:$0xff] %v592_v26  ;;  %599 = vst [vmem:[%s577_s24 + $0x40] sm:$0xff] %v598_v29 }
 0x12f   : > { %v596_v28 = vld [vmem:[%s294_s15 + $0x18] sm:$0xff]  ;;  %595 = vst [vmem:[%s577_s24 + $0x20] sm:$0xff] %v594_v27  ;;  %601 = vst [vmem:[%s577_s24 + $0x48] sm:$0xff] %v600_v30  ;;  %v602_v31 = vld [vmem:[%s294_s15 + $0x30] sm:$0xff] }
 0x130   : > { %597 = vst [vmem:[%s577_s24 + $0x28] sm:$0xff] %v596_v28  ;;  %v604_v32 = vld [vmem:[%s294_s15 + $0x38] sm:$0xff]  ;;  %603 = vst [vmem:[%s577_s24 + $0x60] sm:$0xff] %v602_v31 }
 0x131   : > { %605 = vst [vmem:[%s577_s24 + $0x68] sm:$0xff] %v604_v32 }
 0x132 PF: > { %p11_p10 = scmp.ge.s32.totalorder %s851_s19, 4   ;;  %s980_s15 = smov %s802_s16 }
 0x133   : > { %s981_s16 = smov %s862_s22  ;;  %s982_s17 = smov %s851_s19 }
 0x134   :  { %13 = sbr.rel (!%p11_p10) target bundleno = 2 (0x2), region = 132 }

// kernel: _lambda_.13
= control target key start
LH: loop header
LB: loop body
LE: loop exit
PB: predicated region body
PF: predicated region fallthrough
CT: control target
= control target key end

     0   :  { %s466_s9 = smov 0   ;;  %s468_s10 = smov 0   ;;  %s550_s0 = inlined_call_operand.vmem [shape: bf16[32,16], index: 0, kind: input, shape index: {}]   ;;  %s551_s1 = inlined_call_operand.vmem [shape: bf16[16,512], index: 1, kind: input, shape index: {}]   ;;  %s552_s2 = inlined_call_operand.vmem [shape: f32[32,512], index: 2, kind: output, shape index: {}]  }
   0x1   :  { %s470_s11 = smov 0  }
   0x2 LB: > { %s371_s12 = sadd.s32 4294967295, %s448_s11   ;;  %s483_s13 = sadd.s32 1, %s448_s11   ;;  %s448_s11 = sphi %s470_s11, %s556_s11   ;;  %s444_s10 = sphi %s468_s10, %s555_s10   ;;  %s440_s9 = sphi %s466_s9, %s554_s9  }
   0x3   : > { %s37_s14 = ssub.s32 %s448_s11, %s483_s13  ;;  %s40_s15 = sadd.s32 1, %s444_s10 }
   0x4   : > { %p38_p0 = scmp.eq.s32.totalorder %s37_s14, 0  ;;  %p47_p1 = scmp.ne.s32.totalorder %s444_s10, %s440_s9 }
   0x5   : > { %p48_p2 = scmp.eq.s32.totalorder %s448_s11, 0  ;;  %p77_p3 = scmp.eq.s32.totalorder %s371_s12, 1 }
   0x6   : > { %s494_s16 = scalar_select %p38_p0, %s444_s10, %s40_s15  }
   0x7   : > { %p49_p4 = por %p48_p2, %p47_p1  ;;  %p496_p5 = por %p77_p3, %p47_p1 }
   0x8   : > { %p374_p6 = scmp.ge.s32.totalorder %s448_s11, 2 }
   0xa   : > { %102 = sbr.rel (%p374_p6) target bundleno = 24 (0x18), region = 20 }
  0x11   : > { %105 = sbr.rel (!%p49_p4) target bundleno = 24 (0x18), region = 24  ;;  %s107_s18 = sand.u32 (%p49_p4), 1, %s444_s10  }
  0x12   : > { %s392_s19 = sshll.u32 (%p49_p4), %s448_s11, 3  ;;  %s375_s20 = sshll.u32 (%p49_p4), %s107_s18, 4 }
  0x13   : > { %s112_s23 = scalar_lea.vmem (%p49_p4), %s551_s1, %s392_s19  ;;  %s109_s24 = scalar_lea.vmem (%p49_p4), [#allocation2], %s375_s20 }
  0x14   : > { %v142_v0 = vld [vmem:[%s112_s23] sm:$0xff] (%p49_p4)  ;;  %v144_v1 = vld [vmem:[%s112_s23 + $0x10] sm:$0xff] (%p49_p4) }
  0x15   : > { %143 = vst [vmem:[%s109_s24] sm:$0xff] (%p49_p4), %v142_v0  ;;  %145 = vst [vmem:[%s109_s24 + $0x8] sm:$0xff] (%p49_p4), %v144_v1 }
  0x18 PF: > { %p378_p7 = scmp.ge.s32.totalorder %s448_s11, 1  ;;  %p150_p8 = scmp.lt.s32.totalorder %s448_s11, 3 }
  0x1a   : > { %p151_p9 = pnand %p378_p7, %p150_p8 }
  0x1b   : > { %s157_s25 = sand.u32 (!%p151_p9), 1, %s440_s9   ;;  %v450_v2 = vmov (!%p151_p9), 0   ;;  %v424_v5 = vld [vmem:[%s550_s0] sm:$0xff] (!%p151_p9)   ;;  %v425_v6 = vld [vmem:[%s550_s0 + $0x8] sm:$0xff] (!%p151_p9)   ;;  %vm206_vm0 = vcmask (!%p151_p9), 130048  }
  0x1c   : > { %154 = sbr.rel (%p151_p9) target bundleno = 260 (0x104), region = 62  ;;  %s379_s26 = sshll.u32 (!%p151_p9), %s157_s25, 4  ;;  %245 = vmatprep.mubr.bf16.mxu0 (!%p151_p9), %v450_v2  ;;  %255 = vmatprep.mubr.bf16.mxu1 (!%p151_p9), %v450_v2 }
  0x1d   : > { %s159_s27 = scalar_lea.vmem (!%p151_p9), [#allocation2], %s379_s26  ;;  %s380_s4 = sshll.u32 (!%p151_p9), %s157_s25, 6 }
  0x1e   : > { %v421_v3 = vld [vmem:[%s159_s27 + $0x4] ss:$8 sps:$4 sm:$0xff] (!%p151_p9)   ;;  %v423_v4 = vld [vmem:[%s159_s27] ss:$8 sps:$4 sm:$0xff] (!%p151_p9)   ;;  %s515_s5 = scalar_lea.vmem (!%p151_p9), [#allocation3], %s380_s4 }
  0x1f   : > { %213 = vmatprep.subr.bf16.mxu0 (!%p151_p9), %v421_v3  ;;  %394 = vmatprep.subr.bf16.mxu1 (!%p151_p9), %v421_v3 }
  0x20   : > { %214 = vmatpush1.bf16.msra.mxu0 (!%p151_p9), %v423_v4  ;;  %395 = vmatpush1.bf16.msra.mxu1 (!%p151_p9), %v423_v4 }
  0x23   : > { %385 = vmatmul.mubr.msk.bf16.vlgmr.msra.gmra.mrb[0].mxu0 %vm206_vm0, %v424_v5  ;;  %386 = vmatmul.mubr.msk.bf16.vlgmr.msra.gmra.mrb[0].mxu1 %vm206_vm0, %v425_v6  ;;  %s393_s6 = sshll.u32 (%p496_p5), %s371_s12, 4 }
  0x24   : > { %s283_s9 = scalar_lea.vmem (%p496_p5), %s552_s2, %s393_s6 }
  0xf4   : > { %280 = sbr.rel (!%p496_p5) target bundleno = 260 (0x104), region = 70 }
  0xf6   : > { %v247_v7 = vpop.f32.mrb[0].mxu0  ;;  %v257_v8 = vpop.f32.mrb[0].mxu1 }
  0xf7   : > { %266 = vst [vmem:[%s515_s5] sm:$0xff] %v247_v7  ;;  %270 = vst [vmem:[%s515_s5 + $0x20] sm:$0xff] %v257_v8  ;;  %v249_v9 = vpop.f32.mrb[1].mxu0  ;;  %v259_v10 = vpop.f32.mrb[1].mxu1 }
  0xf8   : > { %267 = vst [vmem:[%s515_s5 + $0x8] sm:$0xff] %v249_v9  ;;  %271 = vst [vmem:[%s515_s5 + $0x28] sm:$0xff] %v259_v10  ;;  %v251_v11 = vpop.f32.mrb[2].mxu0  ;;  %v261_v12 = vpop.f32.mrb[2].mxu1 }
  0xf9   : > { %268 = vst [vmem:[%s515_s5 + $0x10] sm:$0xff] %v251_v11  ;;  %272 = vst [vmem:[%s515_s5 + $0x30] sm:$0xff] %v261_v12  ;;  %v253_v13 = vpop.f32.mrb[3].mxu0  ;;  %v263_v14 = vpop.f32.mrb[3].mxu1 }
  0xfa   : > { %269 = vst [vmem:[%s515_s5 + $0x18] sm:$0xff] %v253_v13  ;;  %273 = vst [vmem:[%s515_s5 + $0x38] sm:$0xff] %v263_v14 }
  0xfe   : > { %v296_v15 = vld [vmem:[%s515_s5] sm:$0xff] }
  0xff   : > { %v298_v16 = vld [vmem:[%s515_s5 + $0x8] sm:$0xff]  ;;  %v304_v19 = vld [vmem:[%s515_s5 + $0x20] sm:$0xff]  ;;  %297 = vst [vmem:[%s283_s9] sm:$0xff] %v296_v15 }
 0x100   : > { %v300_v17 = vld [vmem:[%s515_s5 + $0x10] sm:$0xff]  ;;  %v306_v20 = vld [vmem:[%s515_s5 + $0x28] sm:$0xff]  ;;  %299 = vst [vmem:[%s283_s9 + $0x8] sm:$0xff] %v298_v16  ;;  %305 = vst [vmem:[%s283_s9 + $0x40] sm:$0xff] %v304_v19 }
 0x101   : > { %v302_v18 = vld [vmem:[%s515_s5 + $0x18] sm:$0xff]  ;;  %301 = vst [vmem:[%s283_s9 + $0x20] sm:$0xff] %v300_v17  ;;  %307 = vst [vmem:[%s283_s9 + $0x48] sm:$0xff] %v306_v20  ;;  %v308_v21 = vld [vmem:[%s515_s5 + $0x30] sm:$0xff] }
 0x102   : > { %303 = vst [vmem:[%s283_s9 + $0x28] sm:$0xff] %v302_v18  ;;  %v310_v22 = vld [vmem:[%s515_s5 + $0x38] sm:$0xff]  ;;  %309 = vst [vmem:[%s283_s9 + $0x60] sm:$0xff] %v308_v21 }
 0x103   : > { %311 = vst [vmem:[%s283_s9 + $0x68] sm:$0xff] %v310_v22 }
 0x104 PF: > { %p9_p10 = scmp.ge.s32.totalorder %s483_s13, 4   ;;  %s554_s9 = smov %s444_s10 }
 0x105   : > { %s555_s10 = smov %s494_s16  ;;  %s556_s11 = smov %s483_s13 }
 0x106   :  { %11 = sbr.rel (!%p9_p10) target bundleno = 2 (0x2), region = 124 }

// kernel: _lambda_.15
= control target key start
LH: loop header
LB: loop body
LE: loop exit
PB: predicated region body
PF: predicated region fallthrough
CT: control target
= control target key end

     0   :  { %s1248_s18 = smov 0   ;;  %s1250_s19 = smov 0   ;;  %s1515_s0 = inlined_call_operand.vmem [shape: bf16[32,288], index: 0, kind: input, shape index: {}]   ;;  %s1516_s1 = inlined_call_operand.vmem [shape: bf16[288,512], index: 1, kind: input, shape index: {}]   ;;  %s1517_s2 = inlined_call_operand.vmem [shape: f32[32,1], index: 2, kind: input, shape index: {}]   ;;  %s1518_s3 = inlined_call_operand.vmem [shape: f32[32,1], index: 3, kind: input, shape index: {}]   ;;  %s1519_s4 = inlined_call_operand.vmem [shape: f32[32,512], index: 4, kind: input, shape index: {}]   ;;  %s1520_s5 = inlined_call_operand.vmem [shape: f32[32,512], index: 5, kind: output, shape index: {}]  }
   0x1   :  { %s1252_s20 = smov 0  }
   0x2 LB: > { %s1022_s21 = sadd.s32 4294967295, %s1215_s20   ;;  %s1265_s22 = sadd.s32 1, %s1215_s20   ;;  %s1215_s20 = sphi %s1252_s20, %s1525_s20   ;;  %s1211_s19 = sphi %s1250_s19, %s1524_s19   ;;  %s1207_s18 = sphi %s1248_s18, %s1523_s18  }
   0x3   : > { %s40_s23 = ssub.s32 %s1215_s20, %s1265_s22  ;;  %s43_s24 = sadd.s32 1, %s1211_s19 }
   0x4   : > { %p41_p0 = scmp.eq.s32.totalorder %s40_s23, 0  ;;  %p50_p1 = scmp.ne.s32.totalorder %s1211_s19, %s1207_s18 }
   0x5   : > { %p51_p2 = scmp.eq.s32.totalorder %s1215_s20, 0  ;;  %p148_p3 = scmp.eq.s32.totalorder %s1022_s21, 1 }
   0x6   : > { %s1276_s25 = scalar_select %p41_p0, %s1211_s19, %s43_s24  }
   0x7   : > { %p1278_p4 = por %p51_p2, %p50_p1  ;;  %p1282_p5 = por %p148_p3, %p50_p1 }
   0x8   : > { %p1025_p6 = scmp.ge.s32.totalorder %s1215_s20, 2 }
   0xa   : > { %179 = sbr.rel (%p1025_p6) target bundleno = 47 (0x2f), region = 28 }
  0x11   : > { %182 = sbr.rel (!%p1278_p4) target bundleno = 39 (0x27), region = 32  ;;  %s184_s28 = sand.u32 (%p1278_p4), 1, %s1211_s19  }
  0x12   : > { %s1083_s29 = sshll.u32 (%p1278_p4), %s1215_s20, 3  ;;  %s1102_s30 = smul.u32 (%p1278_p4), 288, %s184_s28 }
  0x13   : > { %s1294_s8 = scalar_lea.vmem (%p1278_p4), %s1516_s1, %s1083_s29 }
  0x14   : > { %v287_v0 = vld [vmem:[%s1294_s8] sm:$0xff] (%p1278_p4)  ;;  %v289_v1 = vld [vmem:[%s1294_s8 + $0x10] sm:$0xff] (%p1278_p4)  ;;  %s1302_s9 = scalar_lea.vmem (%p1278_p4), [#allocation2], %s1102_s30 }
  0x15   : > { %v291_v2 = vld [vmem:[%s1294_s8 + $0x20] sm:$0xff] (%p1278_p4)  ;;  %v293_v3 = vld [vmem:[%s1294_s8 + $0x30] sm:$0xff] (%p1278_p4)  ;;  %288 = vst [vmem:[%s1302_s9] sm:$0xff] (%p1278_p4), %v287_v0  ;;  %290 = vst [vmem:[%s1302_s9 + $0x8] sm:$0xff] (%p1278_p4), %v289_v1 }
  0x16   : > { %v295_v4 = vld [vmem:[%s1294_s8 + $0x40] sm:$0xff] (%p1278_p4)  ;;  %v297_v5 = vld [vmem:[%s1294_s8 + $0x50] sm:$0xff] (%p1278_p4)  ;;  %292 = vst [vmem:[%s1302_s9 + $0x10] sm:$0xff] (%p1278_p4), %v291_v2  ;;  %294 = vst [vmem:[%s1302_s9 + $0x18] sm:$0xff] (%p1278_p4), %v293_v3 }
  0x17   : > { %296 = vst [vmem:[%s1302_s9 + $0x20] sm:$0xff] (%p1278_p4), %v295_v4  ;;  %298 = vst [vmem:[%s1302_s9 + $0x28] sm:$0xff] (%p1278_p4), %v297_v5  ;;  %v299_v6 = vld [vmem:[%s1294_s8 + $0x60] sm:$0xff] (%p1278_p4)  ;;  %v301_v7 = vld [vmem:[%s1294_s8 + $0x70] sm:$0xff] (%p1278_p4) }
  0x18   : > { %v303_v8 = vld [vmem:[%s1294_s8 + $0x80] sm:$0xff]  ;;  %300 = vst [vmem:[%s1302_s9 + $0x30] sm:$0xff] %v299_v6  ;;  %302 = vst [vmem:[%s1302_s9 + $0x38] sm:$0xff] %v301_v7  ;;  %v305_v9 = vld [vmem:[%s1294_s8 + $0x90] sm:$0xff] }
  0x19   : > { %304 = vst [vmem:[%s1302_s9 + $0x40] sm:$0xff] %v303_v8  ;;  %v307_v10 = vld [vmem:[%s1294_s8 + $0xa0] sm:$0xff]  ;;  %v309_v11 = vld [vmem:[%s1294_s8 + $0xb0] sm:$0xff]  ;;  %306 = vst [vmem:[%s1302_s9 + $0x48] sm:$0xff] %v305_v9 }
  0x1a   : > { %308 = vst [vmem:[%s1302_s9 + $0x50] sm:$0xff] %v307_v10  ;;  %310 = vst [vmem:[%s1302_s9 + $0x58] sm:$0xff] %v309_v11  ;;  %v311_v12 = vld [vmem:[%s1294_s8 + $0xc0] sm:$0xff]  ;;  %v313_v13 = vld [vmem:[%s1294_s8 + $0xd0] sm:$0xff] }
  0x1b   : > { %v315_v14 = vld [vmem:[%s1294_s8 + $0xe0] sm:$0xff]  ;;  %312 = vst [vmem:[%s1302_s9 + $0x60] sm:$0xff] %v311_v12  ;;  %314 = vst [vmem:[%s1302_s9 + $0x68] sm:$0xff] %v313_v13  ;;  %v317_v15 = vld [vmem:[%s1294_s8 + $0xf0] sm:$0xff] }
  0x1c   : > { %316 = vst [vmem:[%s1302_s9 + $0x70] sm:$0xff] %v315_v14  ;;  %v319_v16 = vld [vmem:[%s1294_s8 + $0x100] sm:$0xff]  ;;  %v321_v17 = vld [vmem:[%s1294_s8 + $0x110] sm:$0xff]  ;;  %318 = vst [vmem:[%s1302_s9 + $0x78] sm:$0xff] %v317_v15 }
  0x1d   : > { %320 = vst [vmem:[%s1302_s9 + $0x80] sm:$0xff] %v319_v16  ;;  %322 = vst [vmem:[%s1302_s9 + $0x88] sm:$0xff] %v321_v17  ;;  %v323_v18 = vld [vmem:[%s1294_s8 + $0x120] sm:$0xff]  ;;  %v325_v19 = vld [vmem:[%s1294_s8 + $0x130] sm:$0xff] }
  0x1e   : > { %v327_v20 = vld [vmem:[%s1294_s8 + $0x140] sm:$0xff]  ;;  %324 = vst [vmem:[%s1302_s9 + $0x90] sm:$0xff] %v323_v18  ;;  %326 = vst [vmem:[%s1302_s9 + $0x98] sm:$0xff] %v325_v19  ;;  %v329_v21 = vld [vmem:[%s1294_s8 + $0x150] sm:$0xff] }
  0x1f   : > { %328 = vst [vmem:[%s1302_s9 + $0xa0] sm:$0xff] %v327_v20  ;;  %v331_v22 = vld [vmem:[%s1294_s8 + $0x160] sm:$0xff]  ;;  %v333_v23 = vld [vmem:[%s1294_s8 + $0x170] sm:$0xff]  ;;  %330 = vst [vmem:[%s1302_s9 + $0xa8] sm:$0xff] %v329_v21 }
  0x20   : > { %332 = vst [vmem:[%s1302_s9 + $0xb0] sm:$0xff] %v331_v22  ;;  %334 = vst [vmem:[%s1302_s9 + $0xb8] sm:$0xff] %v333_v23  ;;  %v335_v24 = vld [vmem:[%s1294_s8 + $0x180] sm:$0xff]  ;;  %v337_v25 = vld [vmem:[%s1294_s8 + $0x190] sm:$0xff] }
  0x21   : > { %v339_v26 = vld [vmem:[%s1294_s8 + $0x1a0] sm:$0xff]  ;;  %336 = vst [vmem:[%s1302_s9 + $0xc0] sm:$0xff] %v335_v24  ;;  %338 = vst [vmem:[%s1302_s9 + $0xc8] sm:$0xff] %v337_v25  ;;  %v341_v27 = vld [vmem:[%s1294_s8 + $0x1b0] sm:$0xff] }
  0x22   : > { %340 = vst [vmem:[%s1302_s9 + $0xd0] sm:$0xff] %v339_v26  ;;  %v343_v28 = vld [vmem:[%s1294_s8 + $0x1c0] sm:$0xff]  ;;  %v345_v29 = vld [vmem:[%s1294_s8 + $0x1d0] sm:$0xff]  ;;  %342 = vst [vmem:[%s1302_s9 + $0xd8] sm:$0xff] %v341_v27 }
  0x23   : > { %344 = vst [vmem:[%s1302_s9 + $0xe0] sm:$0xff] %v343_v28  ;;  %346 = vst [vmem:[%s1302_s9 + $0xe8] sm:$0xff] %v345_v29  ;;  %v347_v30 = vld [vmem:[%s1294_s8 + $0x1e0] sm:$0xff]  ;;  %v349_v31 = vld [vmem:[%s1294_s8 + $0x1f0] sm:$0xff] }
  0x24   : > { %v351_v32 = vld [vmem:[%s1294_s8 + $0x200] sm:$0xff]  ;;  %348 = vst [vmem:[%s1302_s9 + $0xf0] sm:$0xff] %v347_v30  ;;  %350 = vst [vmem:[%s1302_s9 + $0xf8] sm:$0xff] %v349_v31  ;;  %v353_v33 = vld [vmem:[%s1294_s8 + $0x210] sm:$0xff] }
  0x25   : > { %352 = vst [vmem:[%s1302_s9 + $0x100] sm:$0xff] %v351_v32  ;;  %v355_v34 = vld [vmem:[%s1294_s8 + $0x220] sm:$0xff]  ;;  %v357_v35 = vld [vmem:[%s1294_s8 + $0x230] sm:$0xff]  ;;  %354 = vst [vmem:[%s1302_s9 + $0x108] sm:$0xff] %v353_v33 }
  0x26   : > { %356 = vst [vmem:[%s1302_s9 + $0x110] sm:$0xff] %v355_v34  ;;  %358 = vst [vmem:[%s1302_s9 + $0x118] sm:$0xff] %v357_v35 }
  0x27 PF: > { %364 = sbr.rel (!%p1278_p4) target bundleno = 47 (0x2f), region = 70  ;;  %s366_s10 = sand.u32 (%p1278_p4), 1, %s1211_s19  }
  0x28   : > { %s1084_s11 = sshll.u32 (%p1278_p4), %s1215_s20, 4  ;;  %s1028_s12 = sshll.u32 (%p1278_p4), %s366_s10, 6 }
  0x29   : > { %s371_s15 = scalar_lea.vmem (%p1278_p4), %s1519_s4, %s1084_s11  ;;  %s368_s16 = scalar_lea.vmem (%p1278_p4), [#allocation3], %s1028_s12 }
  0x2a   : > { %v384_v36 = vld [vmem:[%s371_s15] sm:$0xff] (%p1278_p4)  ;;  %v386_v37 = vld [vmem:[%s371_s15 + $0x8] sm:$0xff] (%p1278_p4) }
  0x2b   : > { %v388_v38 = vld [vmem:[%s371_s15 + $0x20] sm:$0xff] (%p1278_p4)  ;;  %385 = vst [vmem:[%s368_s16] sm:$0xff] (%p1278_p4), %v384_v36  ;;  %387 = vst [vmem:[%s368_s16 + $0x8] sm:$0xff] (%p1278_p4), %v386_v37  ;;  %v390_v39 = vld [vmem:[%s371_s15 + $0x28] sm:$0xff] (%p1278_p4) }
  0x2c   : > { %389 = vst [vmem:[%s368_s16 + $0x10] sm:$0xff] (%p1278_p4), %v388_v38  ;;  %v392_v40 = vld [vmem:[%s371_s15 + $0x40] sm:$0xff] (%p1278_p4)  ;;  %v394_v41 = vld [vmem:[%s371_s15 + $0x48] sm:$0xff] (%p1278_p4)  ;;  %391 = vst [vmem:[%s368_s16 + $0x18] sm:$0xff] (%p1278_p4), %v390_v39 }
  0x2d   : > { %393 = vst [vmem:[%s368_s16 + $0x20] sm:$0xff] (%p1278_p4), %v392_v40  ;;  %395 = vst [vmem:[%s368_s16 + $0x28] sm:$0xff] (%p1278_p4), %v394_v41  ;;  %v396_v42 = vld [vmem:[%s371_s15 + $0x60] sm:$0xff] (%p1278_p4)  ;;  %v398_v43 = vld [vmem:[%s371_s15 + $0x68] sm:$0xff] (%p1278_p4) }
  0x2e   : > { %397 = vst [vmem:[%s368_s16 + $0x30] sm:$0xff] %v396_v42  ;;  %399 = vst [vmem:[%s368_s16 + $0x38] sm:$0xff] %v398_v43 }
  0x2f PF: > { %p1031_p7 = scmp.ge.s32.totalorder %s1215_s20, 1  ;;  %p404_p8 = scmp.lt.s32.totalorder %s1215_s20, 3 }
  0x31   : > { %p405_p9 = pnand %p1031_p7, %p404_p8 }
  0x32   : > { %s411_s17 = sand.u32 (!%p405_p9), 1, %s1207_s18   ;;  %v1217_v44 = vmov (!%p405_p9), 0   ;;  %v1187_v45 = vld [vmem:[%s1515_s0 + $0x4] ss:$12 sps:$4 sm:$0xff] (!%p405_p9)   ;;  %v1188_v1 = vld [vmem:[%s1515_s0 + $0x8] ss:$12 sps:$4 sm:$0xff] (!%p405_p9)  }
  0x33   : > { %408 = sbr.rel (%p405_p9) target bundleno = 362 (0x16a), region = 93  ;;  %814 = vmatprep.mubr.bf16.mxu0 (!%p405_p9), %v1217_v44  ;;  %1130 = vset.pattern.permute.xlu1 (!%p405_p9), %v1217_v44  ;;  %v454_v2 = vld [vmem:[%s1517_s2 + $0x10] sm:$0xff] (!%p405_p9)  ;;  %v452_v3 = vld [vmem:[%s1517_s2] sm:$0xff] (!%p405_p9)  ;;  %vm722_vm0 = vcmask (!%p405_p9), 261120   ;;  %v455_v5 = vld [vmem:[%s1517_s2 + $0x18] sm:$0xff] (!%p405_p9) }
  0x34   : > { %s1103_s23 = smul.u32 (!%p405_p9), 288, %s411_s17  ;;  %1129 = vset.pattern.permute.xlu0 (!%p405_p9), %v1217_v44  ;;  %761 = vmatprep.mubr.bf16.mxu1 (!%p405_p9), %v1187_v45  ;;  %v453_v7 = vld [vmem:[%s1517_s2 + $0x8] sm:$0xff] (!%p405_p9)  ;;  %v456_v11 = vld [vmem:[%s1518_s3] sm:$0xff] (!%p405_p9)  ;;  %v459_v14 = vld [vmem:[%s1518_s3 + $0x18] sm:$0xff] (!%p405_p9) }
  0x35   : > { %847 = vperm.xlu1 (!%p405_p9), %1130, %v454_v2   ;;  %837 = vperm.xlu0 (!%p405_p9), %1129, %v452_v3   ;;  %v457_v9 = vld [vmem:[%s1518_s3 + $0x8] sm:$0xff] (!%p405_p9)  ;;  %v458_v16 = vld [vmem:[%s1518_s3 + $0x10] sm:$0xff] (!%p405_p9)  ;;  %v1192_v30 = vld [vmem:[%s1515_s0 + $0x18] ss:$12 sps:$4 sm:$0xff] (!%p405_p9)  }
  0x36   : > { %s1385_s28 = scalar_lea.vmem (!%p405_p9), [#allocation2], %s1103_s23  ;;  %v1191_v12 = vld [vmem:[%s1515_s0 + $0x20] ss:$12 sps:$4 sm:$0xff] (!%p405_p9)   ;;  %v1189_v29 = vld [vmem:[%s1515_s0 + $0x1c] ss:$12 sps:$4 sm:$0xff] (!%p405_p9)  }
  0x37   : > { %v1131_v46 = vld [vmem:[%s1385_s28 + $0x4] ss:$8 sps:$4 sm:$0xff] (!%p405_p9)   ;;  %v1133_v47 = vld [vmem:[%s1385_s28] ss:$8 sps:$4 sm:$0xff] (!%p405_p9)   ;;  %v1134_v48 = vld [vmem:[%s1385_s28 + $0x14] ss:$8 sps:$4 sm:$0xff] (!%p405_p9)  }
  0x38   : > { %729 = vmatprep.subr.bf16.mxu1 (!%p405_p9), %v1131_v46  ;;  %v1136_v49 = vld [vmem:[%s1385_s28 + $0x10] ss:$8 sps:$4 sm:$0xff] (!%p405_p9)   ;;  %v1137_v50 = vld [vmem:[%s1385_s28 + $0x24] ss:$8 sps:$4 sm:$0xff] (!%p405_p9)   ;;  %v1139_v51 = vld [vmem:[%s1385_s28 + $0x20] ss:$8 sps:$4 sm:$0xff] (!%p405_p9)  }
  0x39   : > { %730 = vmatpush1.bf16.msra.mxu1 (!%p405_p9), %v1133_v47  ;;  %v1140_v52 = vld [vmem:[%s1385_s28 + $0x34] ss:$8 sps:$4 sm:$0xff] (!%p405_p9)   ;;  %v1142_v53 = vld [vmem:[%s1385_s28 + $0x30] ss:$8 sps:$4 sm:$0xff] (!%p405_p9)   ;;  %v1143_v54 = vld [vmem:[%s1385_s28 + $0x44] ss:$8 sps:$4 sm:$0xff] (!%p405_p9)   ;;  %852 = vperm.xlu1 (!%p405_p9), %1130, %v455_v5  }
  0x3a   : > { %731 = vmatprep.subr.bf16.mxu1 %v1134_v48  ;;  %v1145_v55 = vld [vmem:[%s1385_s28 + $0x40] ss:$8 sps:$4 sm:$0xff]   ;;  %v1146_v56 = vld [vmem:[%s1385_s28 + $0x54] ss:$8 sps:$4 sm:$0xff]   ;;  %v1148_v57 = vld [vmem:[%s1385_s28 + $0x50] ss:$8 sps:$4 sm:$0xff]   ;;  %842 = vperm.xlu0 %1129, %v453_v7  }
  0x3b   : > { %v1173_v58 = vld [vmem:[%s1385_s28 + $0x104] ss:$8 sps:$4 sm:$0xff]   ;;  %v1177_v60 = vld [vmem:[%s1385_s28 + $0x100] ss:$8 sps:$4 sm:$0xff]   ;;  %v1179_v61 = vld [vmem:[%s1385_s28 + $0x114] ss:$8 sps:$4 sm:$0xff]  }
  0x3c   : > { %v1149_v59 = vld [vmem:[%s1385_s28 + $0x64] ss:$8 sps:$4 sm:$0xff]   ;;  %782 = vmatprep.subr.bf16.mxu0 %v1173_v58  ;;  %v1151_v62 = vld [vmem:[%s1385_s28 + $0x60] ss:$8 sps:$4 sm:$0xff]   ;;  %v1183_v63 = vld [vmem:[%s1385_s28 + $0x110] ss:$8 sps:$4 sm:$0xff]  }
  0x3d   : > { %732 = vmatpush1.bf16.msra.mxu1 %v1136_v49  ;;  %783 = vmatpush1.bf16.msra.mxu0 %v1177_v60  ;;  %v1152_v0 = vld [vmem:[%s1385_s28 + $0x74] ss:$8 sps:$4 sm:$0xff]   ;;  %v1154_v4 = vld [vmem:[%s1385_s28 + $0x70] ss:$8 sps:$4 sm:$0xff]   ;;  %v1155_v6 = vld [vmem:[%s1385_s28 + $0x84] ss:$8 sps:$4 sm:$0xff]  }
  0x3e   : > { %733 = vmatprep.subr.bf16.mxu1 %v1137_v50  ;;  %784 = vmatprep.subr.bf16.mxu0 %v1179_v61  ;;  %v1157_v8 = vld [vmem:[%s1385_s28 + $0x80] ss:$8 sps:$4 sm:$0xff]   ;;  %v1158_v10 = vld [vmem:[%s1385_s28 + $0x94] ss:$8 sps:$4 sm:$0xff]   ;;  %v1160_v13 = vld [vmem:[%s1385_s28 + $0x90] ss:$8 sps:$4 sm:$0xff]  }
  0x3f   : > { %870 = vperm.xlu1 %1130, %v457_v9   ;;  %865 = vperm.xlu0 %1129, %v456_v11   ;;  %v1161_v15 = vld [vmem:[%s1385_s28 + $0xa4] ss:$8 sps:$4 sm:$0xff]   ;;  %v1163_v17 = vld [vmem:[%s1385_s28 + $0xa0] ss:$8 sps:$4 sm:$0xff]   ;;  %v1164_v18 = vld [vmem:[%s1385_s28 + $0xb4] ss:$8 sps:$4 sm:$0xff]  }
  0x40   : > { %v1166_v19 = vld [vmem:[%s1385_s28 + $0xb0] ss:$8 sps:$4 sm:$0xff]   ;;  %v1167_v20 = vld [vmem:[%s1385_s28 + $0xc4] ss:$8 sps:$4 sm:$0xff]   ;;  %v1169_v21 = vld [vmem:[%s1385_s28 + $0xc0] ss:$8 sps:$4 sm:$0xff]  }
  0x41   : > { %734 = vmatpush1.bf16.msra.mxu1 %v1139_v51  ;;  %785 = vmatpush1.bf16.msra.mxu0 %v1183_v63  ;;  %v1170_v22 = vld [vmem:[%s1385_s28 + $0xd4] ss:$8 sps:$4 sm:$0xff]   ;;  %v1172_v23 = vld [vmem:[%s1385_s28 + $0xd0] ss:$8 sps:$4 sm:$0xff]   ;;  %v1175_v24 = vld [vmem:[%s1385_s28 + $0xe4] ss:$8 sps:$4 sm:$0xff]  }
  0x42   : > { %735 = vmatprep.subr.bf16.mxu1 %v1140_v52  ;;  %v1178_v25 = vld [vmem:[%s1385_s28 + $0xe0] ss:$8 sps:$4 sm:$0xff]   ;;  %v1181_v26 = vld [vmem:[%s1385_s28 + $0xf4] ss:$8 sps:$4 sm:$0xff]   ;;  %v1184_v27 = vld [vmem:[%s1385_s28 + $0xf0] ss:$8 sps:$4 sm:$0xff]  }
  0x43   : > { %880 = vperm.xlu1 %1130, %v459_v14   ;;  %875 = vperm.xlu0 %1129, %v458_v16   ;;  %v1185_v28 = vld [vmem:[%s1515_s0] ss:$12 sps:$4 sm:$0xff]   ;;  %s1466_s28 = sshll.u32 %s411_s17, 6  ;;  %s1085_s17 = sshll.u32 (%p1282_p5), %s1022_s21, 4 }
  0x44   : > { %1076 = vmatmul.mubr.msk.bf16.vlgmr.msra.gmra.mrb[0].mxu0 %vm722_vm0, %v1188_v1  ;;  %s1469_s14 = scalar_lea.vmem [#allocation3], %s1466_s28  ;;  %s1480_s18 = scalar_lea.vmem [#allocation4], %s1466_s28 }
  0x45   : > { %736 = vmatpush1.bf16.msra.mxu1 %v1142_v53  ;;  %824 = vmatprep.mubr.bf16.mxu0 %v1217_v44  ;;  %v504_v41 = vld [vmem:[%s1469_s14] sm:$0xff]  ;;  %v505_v42 = vld [vmem:[%s1469_s14 + $0x8] sm:$0xff]  ;;  %v506_v45 = vld [vmem:[%s1469_s14 + $0x10] sm:$0xff]  ;;  %s916_s23 = scalar_lea.vmem (%p1282_p5), %s1520_s5, %s1085_s17 }
  0x46   : > { %737 = vmatprep.subr.bf16.mxu1 %v1143_v54  ;;  %v507_v48 = vld [vmem:[%s1469_s14 + $0x18] sm:$0xff]  ;;  %v509_v1 = vld [vmem:[%s1469_s14 + $0x28] sm:$0xff] }
  0x47   : > { %v511_v11 = vld [vmem:[%s1469_s14 + $0x38] sm:$0xff] }
  0x49   : > { %738 = vmatpush1.bf16.msra.mxu1 %v1145_v55 }
  0x4a   : > { %739 = vmatprep.subr.bf16.mxu1 %v1146_v56 }
  0x4c   : > { %1077 = vmatmul.mubr.msk.bf16.gmra.mrb[4].mxu0 %vm722_vm0, %v1191_v12 }
  0x4d   : > { %740 = vmatpush1.bf16.msra.mxu1 %v1148_v57 }
  0x4e   : > { %741 = vmatprep.subr.bf16.mxu1 %v1149_v59 }
  0x51   : > { %742 = vmatpush1.bf16.msra.mxu1 %v1151_v62  ;;  %v508_v62 = vld [vmem:[%s1469_s14 + $0x20] sm:$0xff] }
  0x52   : > { %743 = vmatprep.subr.bf16.mxu1 %v1152_v0 }
  0x55   : > { %744 = vmatpush1.bf16.msra.mxu1 %v1154_v4 }
  0x56   : > { %745 = vmatprep.subr.bf16.mxu1 %v1155_v6  ;;  %v510_v6 = vld [vmem:[%s1469_s14 + $0x30] sm:$0xff] }
  0x59   : > { %746 = vmatpush1.bf16.msra.mxu1 %v1157_v8 }
  0x5a   : > { %747 = vmatprep.subr.bf16.mxu1 %v1158_v10 }
  0x5d   : > { %748 = vmatpush1.bf16.msra.mxu1 %v1160_v13 }
  0x5e   : > { %749 = vmatprep.subr.bf16.mxu1 %v1161_v15 }
  0x61   : > { %750 = vmatpush1.bf16.msra.mxu1 %v1163_v17 }
  0x62   : > { %751 = vmatprep.subr.bf16.mxu1 %v1164_v18 }
  0x65   : > { %752 = vmatpush1.bf16.msra.mxu1 %v1166_v19 }
  0x66   : > { %753 = vmatprep.subr.bf16.mxu1 %v1167_v20 }
  0x69   : > { %754 = vmatpush1.bf16.msra.mxu1 %v1169_v21 }
  0x6a   : > { %755 = vmatprep.subr.bf16.mxu1 %v1170_v22 }
  0x6d   : > { %756 = vmatpush1.bf16.msra.mxu1 %v1172_v23 }
  0x6e   : > { %757 = vmatprep.subr.bf16.mxu1 %v1175_v24 }
  0x71   : > { %758 = vmatpush1.bf16.msra.mxu1 %v1178_v25 }
  0x72   : > { %759 = vmatprep.subr.bf16.mxu1 %v1181_v26 }
  0x75   : > { %760 = vmatpush1.bf16.msra.mxu1 %v1184_v27 }
  0x78   : > { %762 = vmatmul.mubr.bf16.vlgmr.msra.gmra.mrb[0].mxu1 %v1185_v28 }
  0x79   : > { %771 = vmatprep.mubr.bf16.mxu1 %v1189_v29 }
  0x80   : > { %772 = vmatmul.mubr.bf16.gmra.mrb[4].mxu1 %v1192_v30 }
  0xb4   : > { %v838_v39 = vpop.permute.xlu0 %837  ;;  %v848_v40 = vpop.permute.xlu1 %847 }
  0xb8   : > { %v853_v49 = vpop.permute.xlu1 %852 }
  0xb9   : > { %v843_v43 = vpop.permute.xlu0 %842 }
  0xbe   : > { %v866_v59 = vpop.permute.xlu0 %865  ;;  %v871_v2 = vpop.permute.xlu1 %870 }
  0xc2   : > { %v876_v25 = vpop.permute.xlu0 %875  ;;  %v881_v30 = vpop.permute.xlu1 %880 }
 0x117   : > { %v816_v31 = vpop.f32.mrb[0].mxu0 }
 0x118   : > { %v818_v32 = vpop.f32.mrb[1].mxu0 }
 0x119   : > { %v820_v33 = vpop.f32.mrb[2].mxu0 }
 0x11a   : > { %v822_v34 = vpop.f32.mrb[3].mxu0 }
 0x11f   : > { %v826_v35 = vpop.f32.mrb[4].mxu0 }
 0x120   : > { %v828_v36 = vpop.f32.mrb[5].mxu0 }
 0x121   : > { %v830_v37 = vpop.f32.mrb[6].mxu0 }
 0x122   : > { %v832_v38 = vpop.f32.mrb[7].mxu0 }
 0x14b   : > { %v763_v44 = vpop.f32.mrb[0].mxu1 }
 0x14c   : > { %v764_v46 = vadd.f32 %v763_v44, %v504_v41  ;;  %v765_v47 = vpop.f32.mrb[1].mxu1 }
 0x14d   : > { %v766_v50 = vadd.f32 %v765_v47, %v505_v42  ;;  %v767_v51 = vpop.f32.mrb[2].mxu1 }
 0x14e   : > { %v817_v52 = vadd.f32 %v816_v31, %v764_v46  ;;  %v768_v53 = vadd.f32 %v767_v51, %v506_v45  ;;  %v769_v54 = vpop.f32.mrb[3].mxu1 }
 0x14f   : > { %v819_v55 = vadd.f32 %v818_v32, %v766_v50  ;;  %v770_v56 = vadd.f32 %v769_v54, %v507_v48 }
 0x150   : > { %v855_v57 = vmul.f32 %v838_v39, %v817_v52  ;;  %v821_v58 = vadd.f32 %v820_v33, %v768_v53 }
 0x151   : > { %v856_v60 = vmul.f32 %v838_v39, %v819_v55  ;;  %v823_v61 = vadd.f32 %v822_v34, %v770_v56 }
 0x152   : > { %v883_v63 = vadd.f32 %v866_v59, %v855_v57  ;;  %v857_v0 = vmul.f32 %v843_v43, %v821_v58 }
 0x153   : > { %v884_v3 = vadd.f32 %v866_v59, %v856_v60  ;;  %v858_v4 = vmul.f32 %v843_v43, %v823_v61  ;;  %v773_v5 = vpop.f32.mrb[4].mxu1 }
 0x154   : > { %v891_v7 = vmax.f32 %v883_v63, 0.0  ;;  %v885_v8 = vadd.f32 %v871_v2, %v857_v0  ;;  %v774_v9 = vadd.f32 %v773_v5, %v508_v62  ;;  %v775_v10 = vpop.f32.mrb[5].mxu1 }
 0x155   : > { %v892_v12 = vmax.f32 %v884_v3, 0.0  ;;  %v886_v13 = vadd.f32 %v871_v2, %v858_v4  ;;  %v776_v14 = vadd.f32 %v775_v10, %v509_v1  ;;  %v777_v15 = vpop.f32.mrb[6].mxu1 }
 0x156   : > { %899 = vst [vmem:[%s1480_s18] sm:$0xff] %v891_v7  ;;  %v893_v16 = vmax.f32 %v885_v8, 0.0  ;;  %v827_v17 = vadd.f32 %v826_v35, %v774_v9  ;;  %v778_v18 = vadd.f32 %v777_v15, %v510_v6  ;;  %v779_v19 = vpop.f32.mrb[7].mxu1 }
 0x157   : > { %900 = vst [vmem:[%s1480_s18 + $0x8] sm:$0xff] %v892_v12  ;;  %v894_v20 = vmax.f32 %v886_v13, 0.0  ;;  %v829_v21 = vadd.f32 %v828_v36, %v776_v14  ;;  %v780_v22 = vadd.f32 %v779_v19, %v511_v11 }
 0x158   : > { %901 = vst [vmem:[%s1480_s18 + $0x10] sm:$0xff] %v893_v16  ;;  %v859_v23 = vmul.f32 %v848_v40, %v827_v17  ;;  %v831_v24 = vadd.f32 %v830_v37, %v778_v18 }
 0x159   : > { %902 = vst [vmem:[%s1480_s18 + $0x18] sm:$0xff] %v894_v20  ;;  %v860_v26 = vmul.f32 %v848_v40, %v829_v21  ;;  %v833_v27 = vadd.f32 %v832_v38, %v780_v22 }
 0x15a   : > { %v887_v28 = vadd.f32 %v876_v25, %v859_v23  ;;  %v861_v29 = vmul.f32 %v853_v49, %v831_v24 }
 0x15b   : > { %v888_v31 = vadd.f32 %v876_v25, %v860_v26  ;;  %v862_v32 = vmul.f32 %v853_v49, %v833_v27  ;;  %913 = sbr.rel (!%p1282_p5) target bundleno = 362 (0x16a), region = 105 }
 0x15c   : > { %v895_v33 = vmax.f32 %v887_v28, 0.0  ;;  %v889_v34 = vadd.f32 %v881_v30, %v861_v29 }
 0x15d   : > { %v896_v35 = vmax.f32 %v888_v31, 0.0  ;;  %v890_v36 = vadd.f32 %v881_v30, %v862_v32  ;;  %v929_v38 = vld [vmem:[%s1480_s18] sm:$0xff] (%p1282_p5) }
 0x15e   : > { %903 = vst [vmem:[%s1480_s18 + $0x20] sm:$0xff] %v895_v33  ;;  %v897_v39 = vmax.f32 %v889_v34, 0.0  ;;  %v931_v40 = vld [vmem:[%s1480_s18 + $0x8] sm:$0xff] (%p1282_p5)  ;;  %930 = vst [vmem:[%s916_s23] sm:$0xff] (%p1282_p5), %v929_v38 }
 0x15f   : > { %904 = vst [vmem:[%s1480_s18 + $0x28] sm:$0xff] %v896_v35  ;;  %v898_v37 = vmax.f32 %v890_v36, 0.0  ;;  %v933_v41 = vld [vmem:[%s1480_s18 + $0x10] sm:$0xff] (%p1282_p5)  ;;  %932 = vst [vmem:[%s916_s23 + $0x8] sm:$0xff] (%p1282_p5), %v931_v40 }
 0x160   : > { %905 = vst [vmem:[%s1480_s18 + $0x30] sm:$0xff] %v897_v39  ;;  %v935_v42 = vld [vmem:[%s1480_s18 + $0x18] sm:$0xff] (%p1282_p5)  ;;  %934 = vst [vmem:[%s916_s23 + $0x20] sm:$0xff] (%p1282_p5), %v933_v41 }
 0x161   : > { %906 = vst [vmem:[%s1480_s18 + $0x38] sm:$0xff] %v898_v37  ;;  %936 = vst [vmem:[%s916_s23 + $0x28] sm:$0xff] (%p1282_p5), %v935_v42 }
 0x165   : > { %v937_v43 = vld [vmem:[%s1480_s18 + $0x20] sm:$0xff] }
 0x166   : > { %v939_v44 = vld [vmem:[%s1480_s18 + $0x28] sm:$0xff]  ;;  %938 = vst [vmem:[%s916_s23 + $0x40] sm:$0xff] %v937_v43 }
 0x167   : > { %940 = vst [vmem:[%s916_s23 + $0x48] sm:$0xff] %v939_v44  ;;  %v941_v45 = vld [vmem:[%s1480_s18 + $0x30] sm:$0xff] }
 0x168   : > { %v943_v46 = vld [vmem:[%s1480_s18 + $0x38] sm:$0xff]  ;;  %942 = vst [vmem:[%s916_s23 + $0x60] sm:$0xff] %v941_v45 }
 0x169   : > { %944 = vst [vmem:[%s916_s23 + $0x68] sm:$0xff] %v943_v46 }
 0x16a PF: > { %p12_p10 = scmp.ge.s32.totalorder %s1265_s22, 4   ;;  %s1523_s18 = smov %s1211_s19 }
 0x16b   : > { %s1524_s19 = smov %s1276_s25  ;;  %s1525_s20 = smov %s1265_s22 }
 0x16c   :  { %14 = sbr.rel (!%p12_p10) target bundleno = 2 (0x2), region = 167 }

// kernel: _lambda_.17
= control target key start
LH: loop header
LB: loop body
LE: loop exit
PB: predicated region body
PF: predicated region fallthrough
CT: control target
= control target key end

     0   :  { %v658_v1 = vmov 0   ;;  %vm254_vm0 = vcmask 261120   ;;  %s859_s1 = inlined_call_operand.vmem [shape: bf16[288,128], index: 1, kind: input, shape index: {}]   ;;  %s860_s0 = inlined_call_operand.vmem [shape: bf16[64,288], index: 0, kind: input, shape index: {}]   ;;  %s861_s2 = inlined_call_operand.vmem [shape: f32[64,1], index: 2, kind: input, shape index: {}]   ;;  %s862_s3 = inlined_call_operand.vmem [shape: f32[64,1], index: 3, kind: input, shape index: {}]   ;;  %s863_s4 = inlined_call_operand.vmem [shape: f32[64,128], index: 4, kind: output, shape index: {}]  }
   0x1   :  { %v624_v0 = vld [vmem:[%s859_s1 + $0x40] sm:$0xff]   ;;  %623 = vset.pattern.permute.xlu1 %v658_v1  ;;  %622 = vset.pattern.permute.xlu0 %v658_v1  ;;  %v626_v3 = vld [vmem:[%s859_s1 + $0x48] sm:$0xff]   ;;  %v628_v5 = vld [vmem:[%s859_s1 + $0x50] sm:$0xff]  }
   0x2   :  { %v625_v2 = vld [vmem:[%s859_s1] sm:$0xff]   ;;  %547 = vmatprep.subr.bf16.mxu0 %v624_v0  ;;  %605 = vmatprep.subr.bf16.mxu1 %v624_v0  ;;  %v627_v4 = vld [vmem:[%s859_s1 + $0x8] sm:$0xff]   ;;  %v629_v6 = vld [vmem:[%s859_s1 + $0x10] sm:$0xff]  }
   0x3   :  { %548 = vmatpush3.bf16.msra.mxu0 %v625_v2  ;;  %613 = vmatpush3.bf16.msra.mxu1 %v625_v2  ;;  %v630_v7 = vld [vmem:[%s859_s1 + $0x58] sm:$0xff]   ;;  %v632_v9 = vld [vmem:[%s859_s1 + $0x60] sm:$0xff]   ;;  %v634_v11 = vld [vmem:[%s859_s1 + $0x68] sm:$0xff]  }
   0x4   :  { %549 = vmatprep.subr.bf16.mxu0 %v626_v3  ;;  %606 = vmatprep.subr.bf16.mxu1 %v626_v3  ;;  %v631_v8 = vld [vmem:[%s859_s1 + $0x18] sm:$0xff]   ;;  %v633_v10 = vld [vmem:[%s859_s1 + $0x20] sm:$0xff]   ;;  %v635_v14 = vld [vmem:[%s859_s1 + $0x28] sm:$0xff]  }
   0x5   :  { %v642_v12 = vld [vmem:[%s860_s0 + $0x4] ss:$12 sps:$4 sm:$0xff]   ;;  %v645_v13 = vld [vmem:[%s860_s0 + $0x4c] ss:$12 sps:$4 sm:$0xff]   ;;  %v643_v23 = vld [vmem:[%s860_s0 + $0x48] ss:$12 sps:$4 sm:$0xff]  }
   0x6   :  { %v636_v15 = vld [vmem:[%s859_s1 + $0x70] sm:$0xff]   ;;  %299 = vmatprep.mubr.bf16.mxu0 %v642_v12  ;;  %323 = vmatprep.mubr.bf16.mxu1 %v645_v13  ;;  %v638_v17 = vld [vmem:[%s859_s1 + $0x78] sm:$0xff]   ;;  %v18_v20 = vld [vmem:[%s861_s2] sm:$0xff] }
   0x7   :  { %550 = vmatpush3.bf16.msra.mxu0 %v627_v4  ;;  %614 = vmatpush3.bf16.msra.mxu1 %v627_v4  ;;  %v637_v16 = vld [vmem:[%s859_s1 + $0x30] sm:$0xff]   ;;  %v639_v18 = vld [vmem:[%s859_s1 + $0x38] sm:$0xff]   ;;  %v646_v21 = vld [vmem:[%s859_s1 + $0x80] sm:$0xff]  }
   0x8   :  { %551 = vmatprep.subr.bf16.mxu0 %v628_v5  ;;  %607 = vmatprep.subr.bf16.mxu1 %v628_v5  ;;  %v20_v19 = vld [vmem:[%s861_s2 + $0x10] sm:$0xff]  ;;  %v640_v22 = vld [vmem:[%s860_s0] ss:$12 sps:$4 sm:$0xff]   ;;  %v21_v24 = vld [vmem:[%s861_s2 + $0x18] sm:$0xff] }
   0x9   :  { %409 = vperm.xlu1 %623, %v20_v19   ;;  %399 = vperm.xlu0 %622, %v18_v20   ;;  %v19_v25 = vld [vmem:[%s861_s2 + $0x8] sm:$0xff]  ;;  %v22_v30 = vld [vmem:[%s861_s2 + $0x20] sm:$0xff]  ;;  %v25_v33 = vld [vmem:[%s861_s2 + $0x38] sm:$0xff] }
   0xa   :  { %v648_v26 = vld [vmem:[%s860_s0 + $0x1c] ss:$12 sps:$4 sm:$0xff]   ;;  %v651_v31 = vld [vmem:[%s860_s0 + $0x18] ss:$12 sps:$4 sm:$0xff]   ;;  %v652_v32 = vld [vmem:[%s860_s0 + $0x20] ss:$12 sps:$4 sm:$0xff]  }
   0xb   :  { %552 = vmatpush3.bf16.msra.mxu0 %v629_v6  ;;  %615 = vmatpush3.bf16.msra.mxu1 %v629_v6  ;;  %v647_v27 = vld [vmem:[%s859_s1 + $0x88] sm:$0xff]   ;;  %v24_v34 = vld [vmem:[%s861_s2 + $0x30] sm:$0xff]  ;;  %v655_v36 = vld [vmem:[%s860_s0 + $0x38] ss:$12 sps:$4 sm:$0xff]  }
   0xc   :  { %553 = vmatprep.subr.bf16.mxu0 %v630_v7  ;;  %608 = vmatprep.subr.bf16.mxu1 %v630_v7  ;;  %v650_v28 = vld [vmem:[%s860_s0 + $0x8] ss:$12 sps:$4 sm:$0xff]   ;;  %v26_v38 = vld [vmem:[%s862_s3] sm:$0xff]  ;;  %v656_v39 = vld [vmem:[%s860_s0 + $0x30] ss:$12 sps:$4 sm:$0xff]  }
   0xd   :  { %414 = vperm.xlu1 %623, %v21_v24   ;;  %404 = vperm.xlu0 %622, %v19_v25   ;;  %v23_v29 = vld [vmem:[%s861_s2 + $0x28] sm:$0xff]  ;;  %v653_v35 = vld [vmem:[%s860_s0 + $0x34] ss:$12 sps:$4 sm:$0xff]   ;;  %v657_v40 = vld [vmem:[%s860_s0 + $0x50] ss:$12 sps:$4 sm:$0xff]  }
   0xe   :  { %v27_v37 = vld [vmem:[%s862_s3 + $0x8] sm:$0xff]  ;;  %v29_v41 = vld [vmem:[%s862_s3 + $0x18] sm:$0xff]  ;;  %v28_v42 = vld [vmem:[%s862_s3 + $0x10] sm:$0xff] }
   0xf   :  { %554 = vmatpush3.bf16.msra.mxu0 %v631_v8  ;;  %616 = vmatpush3.bf16.msra.mxu1 %v631_v8  ;;  %v31_v43 = vld [vmem:[%s862_s3 + $0x28] sm:$0xff]  ;;  %v30_v44 = vld [vmem:[%s862_s3 + $0x20] sm:$0xff]  ;;  %v33_v45 = vld [vmem:[%s862_s3 + $0x38] sm:$0xff] }
  0x10   :  { %555 = vmatprep.subr.bf16.mxu0 %v632_v9  ;;  %609 = vmatprep.subr.bf16.mxu1 %v632_v9  ;;  %v32_v46 = vld [vmem:[%s862_s3 + $0x30] sm:$0xff] }
  0x11   :  { %424 = vperm.xlu1 %623, %v23_v29   ;;  %419 = vperm.xlu0 %622, %v22_v30  }
  0x13   :  { %556 = vmatpush3.bf16.msra.mxu0 %v633_v10  ;;  %617 = vmatpush3.bf16.msra.mxu1 %v633_v10 }
  0x14   :  { %557 = vmatprep.subr.bf16.mxu0 %v634_v11  ;;  %610 = vmatprep.subr.bf16.mxu1 %v634_v11 }
  0x15   :  { %434 = vperm.xlu1 %623, %v25_v33   ;;  %429 = vperm.xlu0 %622, %v24_v34  }
  0x17   :  { %558 = vmatpush3.bf16.msra.mxu0 %v635_v14  ;;  %618 = vmatpush3.bf16.msra.mxu1 %v635_v14 }
  0x18   :  { %559 = vmatprep.subr.bf16.mxu0 %v636_v15  ;;  %611 = vmatprep.subr.bf16.mxu1 %v636_v15 }
  0x19   :  { %452 = vperm.xlu1 %623, %v27_v37   ;;  %447 = vperm.xlu0 %622, %v26_v38  }
  0x1b   :  { %560 = vmatpush3.bf16.msra.mxu0 %v637_v16  ;;  %619 = vmatpush3.bf16.msra.mxu1 %v637_v16 }
  0x1c   :  { %561 = vmatprep.subr.bf16.mxu0 %v638_v17  ;;  %612 = vmatprep.subr.bf16.mxu1 %v638_v17 }
  0x1d   :  { %462 = vperm.xlu1 %623, %v29_v41   ;;  %457 = vperm.xlu0 %622, %v28_v42  }
  0x1f   :  { %562 = vmatpush3.bf16.msra.mxu0 %v639_v18  ;;  %620 = vmatpush3.bf16.msra.mxu1 %v639_v18 }
  0x20   :  { %593 = vmatprep.subr.bf16.mxu1 %v646_v21 }
  0x21   :  { %472 = vperm.xlu1 %623, %v31_v43   ;;  %467 = vperm.xlu0 %622, %v30_v44  }
  0x22   :  { %300 = vmatmul.mubr.bf16.vlgmr.msra.gmra.mrb[0].mxu0 %v640_v22  ;;  %324 = vmatmul.mubr.bf16.vlgmr.msra.gmra.mrb[0].mxu1 %v643_v23 }
  0x23   :  { %594 = vmatpush3.bf16.msra.mxu1 %v646_v21  ;;  %307 = vmatprep.mubr.bf16.mxu0 %v648_v26 }
  0x24   :  { %595 = vmatprep.subr.bf16.mxu1 %v647_v27  ;;  %597 = vmatprep.mubr.msk.bf16.mxu1 %vm254_vm0, %v650_v28 }
  0x25   :  { %482 = vperm.xlu1 %623, %v33_v45   ;;  %477 = vperm.xlu0 %622, %v32_v46  }
  0x27   :  { %596 = vmatpush3.bf16.msra.mxu1 %v647_v27 }
  0x2a   :  { %308 = vmatmul.mubr.bf16.gmra.mrb[4].mxu0 %v651_v31  ;;  %598 = vmatmul.mubr.msk.bf16.vlgmr.msra.gmra.mrb[4].mxu1 %vm254_vm0, %v652_v32 }
  0x2b   :  { %315 = vmatprep.mubr.bf16.mxu0 %v653_v35  ;;  %601 = vmatprep.mubr.msk.bf16.mxu1 %vm254_vm0, %v655_v36 }
  0x32   :  { %316 = vmatmul.mubr.bf16.gmra.mrb[8].mxu0 %v656_v39  ;;  %602 = vmatmul.mubr.msk.bf16.gmra.mrb[8].mxu1 %vm254_vm0, %v657_v40 }
  0x88   :  { %v410_v47 = vpop.permute.xlu1 %409  ;;  %v400_v48 = vpop.permute.xlu0 %399 }
  0x8c   :  { %v415_v49 = vpop.permute.xlu1 %414  ;;  %v405_v50 = vpop.permute.xlu0 %404 }
  0x90   :  { %v826_v51 = vpop.permute.xlu1 %424  ;;  %v828_v52 = vpop.permute.xlu0 %419 }
  0x94   :  { %v830_v53 = vpop.permute.xlu1 %434  ;;  %v430_v54 = vpop.permute.xlu0 %429 }
  0x98   :  { %v453_v55 = vpop.permute.xlu1 %452  ;;  %v448_v56 = vpop.permute.xlu0 %447 }
  0x9c   :  { %v463_v5 = vpop.permute.xlu1 %462  ;;  %v458_v6 = vpop.permute.xlu0 %457 }
  0xa0   :  { %v468_v21 = vpop.permute.xlu0 %467  ;;  %v473_v26 = vpop.permute.xlu1 %472 }
  0xa4   :  { %v478_v46 = vpop.permute.xlu0 %477 }
  0xf5   :  { %v563_v57 = vpop.f32.mrb[0].mxu0  ;;  %v581_v58 = vpop.f32.mrb[0].mxu1 }
  0xf6   :  { %v564_v59 = vpop.f32.mrb[1].mxu0  ;;  %v582_v60 = vpop.f32.mrb[1].mxu1 }
  0xf7   :  { %v565_v61 = vadd.f32 %v564_v59, %v563_v57  ;;  %v583_v62 = vadd.f32 %v582_v60, %v581_v58  ;;  %v566_v63 = vpop.f32.mrb[2].mxu0  ;;  %v584_v0 = vpop.f32.mrb[2].mxu1 }
  0xf8   :  { %v567_v1 = vpop.f32.mrb[3].mxu0  ;;  %v585_v2 = vpop.f32.mrb[3].mxu1 }
  0xf9   :  { %v568_v3 = vadd.f32 %v567_v1, %v566_v63  ;;  %v586_v4 = vadd.f32 %v585_v2, %v584_v0 }
  0xfd   :  { %v569_v7 = vpop.f32.mrb[4].mxu0  ;;  %v599_v8 = vpop.f32.mrb[4].mxu1 }
  0xfe   :  { %v570_v9 = vpop.f32.mrb[5].mxu0  ;;  %v366_v10 = vpop.f32.mrb[5].mxu1 }
  0xff   :  { %v571_v11 = vadd.f32 %v570_v9, %v569_v7  ;;  %v367_v12 = vadd.f32 %v565_v61, %v366_v10  ;;  %v572_v13 = vpop.f32.mrb[6].mxu0  ;;  %v600_v14 = vpop.f32.mrb[6].mxu1 }
 0x100   :  { %v573_v15 = vpop.f32.mrb[7].mxu0  ;;  %v369_v16 = vpop.f32.mrb[7].mxu1 }
 0x101   :  { %v375_v17 = vadd.f32 %v599_v8, %v571_v11  ;;  %v437_v18 = vmul.f32 %v400_v48, %v367_v12  ;;  %v574_v19 = vadd.f32 %v573_v15, %v572_v13  ;;  %v370_v20 = vadd.f32 %v568_v3, %v369_v16 }
 0x103   :  { %v439_v22 = vmul.f32 %v410_v47, %v375_v17  ;;  %v485_v23 = vadd.f32 %v448_v56, %v437_v18  ;;  %v378_v24 = vadd.f32 %v600_v14, %v574_v19  ;;  %v438_v25 = vmul.f32 %v405_v50, %v370_v20  ;;  %v483_v56 = vpop.permute.xlu1 %482 }
 0x105   :  { %v487_v27 = vadd.f32 %v458_v6, %v439_v22  ;;  %v493_v28 = vmax.f32 %v485_v23, 0.0  ;;  %v440_v29 = vmul.f32 %v415_v49, %v378_v24  ;;  %v486_v30 = vadd.f32 %v453_v55, %v438_v25  ;;  %v575_v31 = vpop.f32.mrb[8].mxu0  ;;  %v603_v32 = vpop.f32.mrb[8].mxu1 }
 0x106   :  { %v391_v33 = vadd.f32 %v603_v32, %v583_v62  ;;  %v576_v34 = vpop.f32.mrb[9].mxu0  ;;  %v382_v35 = vpop.f32.mrb[9].mxu1 }
 0x107   :  { %v495_v36 = vmax.f32 %v487_v27, 0.0  ;;  %501 = vst [vmem:[%s863_s4] sm:$0xff] %v493_v28  ;;  %v488_v37 = vadd.f32 %v463_v5, %v440_v29  ;;  %v494_v38 = vmax.f32 %v486_v30, 0.0  ;;  %v577_v39 = vadd.f32 %v576_v34, %v575_v31  ;;  %v578_v40 = vpop.f32.mrb[10].mxu0  ;;  %v604_v41 = vpop.f32.mrb[10].mxu1 }
 0x108   :  { %v443_v42 = vmul.f32 %v430_v54, %v391_v33  ;;  %v394_v43 = vadd.f32 %v604_v41, %v586_v4  ;;  %v579_v44 = vpop.f32.mrb[11].mxu0  ;;  %v385_v45 = vpop.f32.mrb[11].mxu1 }
 0x109   :  { %503 = vst [vmem:[%s863_s4 + $0x10] sm:$0xff] %v495_v36  ;;  %v496_v47 = vmax.f32 %v488_v37, 0.0  ;;  %502 = vst [vmem:[%s863_s4 + $0x8] sm:$0xff] %v494_v38  ;;  %v383_v48 = vadd.f32 %v577_v39, %v382_v35  ;;  %v580_v49 = vadd.f32 %v579_v44, %v578_v40 }
 0x10a   :  { %v491_v50 = vadd.f32 %v478_v46, %v443_v42  ;;  %v444_v55 = vmul.f32 %v830_v53, %v394_v43 }
 0x10b   :  { %504 = vst [vmem:[%s863_s4 + $0x18] sm:$0xff] %v496_v47  ;;  %v441_v54 = vmul.f32 %v828_v52, %v383_v48  ;;  %v386_v57 = vadd.f32 %v580_v49, %v385_v45 }
 0x10c   :  { %v499_v58 = vmax.f32 %v491_v50, 0.0  ;;  %v492_v59 = vadd.f32 %v483_v56, %v444_v55 }
 0x10d   :  { %v489_v60 = vadd.f32 %v468_v21, %v441_v54  ;;  %v442_v61 = vmul.f32 %v826_v51, %v386_v57 }
 0x10e   :  { %507 = vst [vmem:[%s863_s4 + $0x30] sm:$0xff] %v499_v58  ;;  %v500_v62 = vmax.f32 %v492_v59, 0.0 }
 0x10f   :  { %v497_v63 = vmax.f32 %v489_v60, 0.0  ;;  %v490_v53 = vadd.f32 %v473_v26, %v442_v61 }
 0x110   :  { %508 = vst [vmem:[%s863_s4 + $0x38] sm:$0xff] %v500_v62 }
 0x111   :  { %505 = vst [vmem:[%s863_s4 + $0x20] sm:$0xff] %v497_v63  ;;  %v498_v52 = vmax.f32 %v490_v53, 0.0 }
 0x113   :  { %506 = vst [vmem:[%s863_s4 + $0x28] sm:$0xff] %v498_v52 }

// kernel: _lambda_.16
= control target key start
LH: loop header
LB: loop body
LE: loop exit
PB: predicated region body
PF: predicated region fallthrough
CT: control target
= control target key end

     0   :  { %vm56_vm0 = vcmask 261120   ;;  %s241_s1 = inlined_call_operand.vmem [shape: bf16[32,128], index: 1, kind: input, shape index: {}]   ;;  %s242_s0 = inlined_call_operand.vmem [shape: bf16[64,32], index: 0, kind: input, shape index: {}]   ;;  %s243_s2 = inlined_call_operand.vmem [shape: f32[64,128], index: 2, kind: output, shape index: {}]  }
   0x1   :  { %v178_v0 = vld [vmem:[%s241_s1] sm:$0xff]   ;;  %v179_v1 = vld [vmem:[%s241_s1 + $0x8] sm:$0xff]   ;;  %v181_v3 = vld [vmem:[%s242_s0 + $0x10] sm:$0xff]  }
   0x2   :  { %162 = vmatprep.subr.bf16.mxu0 %v178_v0  ;;  %174 = vmatprep.subr.bf16.mxu1 %v178_v0  ;;  %v180_v2 = vld [vmem:[%s242_s0] sm:$0xff]   ;;  %v182_v4 = vld [vmem:[%s242_s0 + $0x8] sm:$0xff]   ;;  %v183_v5 = vld [vmem:[%s242_s0 + $0x18] sm:$0xff]  }
   0x3   :  { %163 = vmatpush3.bf16.msra.mxu0 %v178_v0  ;;  %176 = vmatpush3.bf16.msra.mxu1 %v178_v0 }
   0x4   :  { %164 = vmatprep.subr.bf16.mxu0 %v179_v1  ;;  %175 = vmatprep.subr.bf16.mxu1 %v179_v1 }
   0x5   :  { %166 = vmatprep.mubr.msk.bf16.mxu0 %vm56_vm0, %v180_v2  ;;  %170 = vmatprep.mubr.msk.bf16.mxu1 %vm56_vm0, %v181_v3 }
   0x7   :  { %165 = vmatpush3.bf16.msra.mxu0 %v179_v1  ;;  %177 = vmatpush3.bf16.msra.mxu1 %v179_v1 }
   0xa   :  { %167 = vmatmul.mubr.msk.bf16.vlgmr.msra.gmra.mrb[0].mxu0 %vm56_vm0, %v182_v4  ;;  %171 = vmatmul.mubr.msk.bf16.vlgmr.msra.gmra.mrb[0].mxu1 %vm56_vm0, %v183_v5 }
  0xdd   :  { %v168_v6 = vpop.f32.mrb[0].mxu0  ;;  %v172_v7 = vpop.f32.mrb[0].mxu1 }
  0xde   :  { %136 = vst [vmem:[%s243_s2 + $0x10] sm:$0xff] %v168_v6  ;;  %140 = vst [vmem:[%s243_s2 + $0x30] sm:$0xff] %v172_v7  ;;  %v103_v8 = vpop.f32.mrb[1].mxu0  ;;  %v119_v9 = vpop.f32.mrb[1].mxu1 }
  0xdf   :  { %134 = vst [vmem:[%s243_s2] sm:$0xff] %v103_v8  ;;  %138 = vst [vmem:[%s243_s2 + $0x20] sm:$0xff] %v119_v9  ;;  %v169_v10 = vpop.f32.mrb[2].mxu0  ;;  %v173_v11 = vpop.f32.mrb[2].mxu1 }
  0xe0   :  { %137 = vst [vmem:[%s243_s2 + $0x18] sm:$0xff] %v169_v10  ;;  %141 = vst [vmem:[%s243_s2 + $0x38] sm:$0xff] %v173_v11  ;;  %v106_v12 = vpop.f32.mrb[3].mxu0  ;;  %v122_v13 = vpop.f32.mrb[3].mxu1 }
  0xe1   :  { %135 = vst [vmem:[%s243_s2 + $0x8] sm:$0xff] %v106_v12  ;;  %139 = vst [vmem:[%s243_s2 + $0x28] sm:$0xff] %v122_v13 }

// kernel: _lambda_.18
= control target key start
LH: loop header
LB: loop body
LE: loop exit
PB: predicated region body
PF: predicated region fallthrough
CT: control target
= control target key end

     0   :  { %v1020_v1 = vmov 0   ;;  %vm457_vm0 = vcmask 523264   ;;  %s1355_s1 = inlined_call_operand.vmem [shape: bf16[576,128], index: 1, kind: input, shape index: {}]   ;;  %s1356_s0 = inlined_call_operand.vmem [shape: bf16[64,576], index: 0, kind: input, shape index: {}]   ;;  %s1357_s2 = inlined_call_operand.vmem [shape: f32[64,1], index: 2, kind: input, shape index: {}]   ;;  %s1358_s3 = inlined_call_operand.vmem [shape: f32[64,1], index: 3, kind: input, shape index: {}]   ;;  %s1359_s4 = inlined_call_operand.vmem [shape: f32[64,128], index: 4, kind: input, shape index: {}]   ;;  %s1360_s5 = inlined_call_operand.vmem [shape: f32[64,128], index: 5, kind: output, shape index: {}]  }
   0x1   :  { %v956_v0 = vld [vmem:[%s1355_s1 + $0x40] sm:$0xff]   ;;  %955 = vset.pattern.permute.xlu1 %v1020_v1  ;;  %954 = vset.pattern.permute.xlu0 %v1020_v1  ;;  %v960_v5 = vld [vmem:[%s1355_s1 + $0x48] sm:$0xff]   ;;  %v964_v9 = vld [vmem:[%s1355_s1 + $0x50] sm:$0xff]  }
   0x2   :  { %v957_v2 = vld [vmem:[%s1355_s1 + $0xc0] sm:$0xff]   ;;  %841 = vmatprep.subr.bf16.mxu0 %v956_v0  ;;  %v961_v6 = vld [vmem:[%s1355_s1 + $0xc8] sm:$0xff]   ;;  %v965_v10 = vld [vmem:[%s1355_s1 + $0xd0] sm:$0xff]  }
   0x3   :  { %v958_v3 = vld [vmem:[%s1355_s1] sm:$0xff]   ;;  %881 = vmatprep.subr.bf16.mxu1 %v957_v2  ;;  %v962_v7 = vld [vmem:[%s1355_s1 + $0x8] sm:$0xff]   ;;  %v966_v11 = vld [vmem:[%s1355_s1 + $0x10] sm:$0xff]  }
   0x4   :  { %v959_v4 = vld [vmem:[%s1355_s1 + $0x80] sm:$0xff]   ;;  %842 = vmatpush3.bf16.msra.mxu0 %v958_v3  ;;  %v963_v8 = vld [vmem:[%s1355_s1 + $0x88] sm:$0xff]   ;;  %v967_v12 = vld [vmem:[%s1355_s1 + $0x90] sm:$0xff]  }
   0x5   :  { %882 = vmatpush3.bf16.msra.mxu1 %v959_v4  ;;  %843 = vmatprep.subr.bf16.mxu0 %v960_v5  ;;  %v968_v13 = vld [vmem:[%s1355_s1 + $0x58] sm:$0xff]   ;;  %v972_v17 = vld [vmem:[%s1355_s1 + $0x60] sm:$0xff]   ;;  %v976_v21 = vld [vmem:[%s1355_s1 + $0x68] sm:$0xff]  }
   0x6   :  { %883 = vmatprep.subr.bf16.mxu1 %v961_v6  ;;  %v969_v14 = vld [vmem:[%s1355_s1 + $0xd8] sm:$0xff]   ;;  %v973_v18 = vld [vmem:[%s1355_s1 + $0xe0] sm:$0xff]   ;;  %v977_v22 = vld [vmem:[%s1355_s1 + $0xe8] sm:$0xff]  }
   0x7   :  { %v970_v15 = vld [vmem:[%s1355_s1 + $0x18] sm:$0xff]   ;;  %v974_v19 = vld [vmem:[%s1355_s1 + $0x20] sm:$0xff]   ;;  %v978_v23 = vld [vmem:[%s1355_s1 + $0x28] sm:$0xff]  }
   0x8   :  { %844 = vmatpush3.bf16.msra.mxu0 %v962_v7  ;;  %v971_v16 = vld [vmem:[%s1355_s1 + $0x98] sm:$0xff]   ;;  %v975_v20 = vld [vmem:[%s1355_s1 + $0xa0] sm:$0xff]   ;;  %v979_v24 = vld [vmem:[%s1355_s1 + $0xa8] sm:$0xff]  }
   0x9   :  { %884 = vmatpush3.bf16.msra.mxu1 %v963_v8  ;;  %845 = vmatprep.subr.bf16.mxu0 %v964_v9  ;;  %v980_v25 = vld [vmem:[%s1355_s1 + $0x70] sm:$0xff]   ;;  %v984_v29 = vld [vmem:[%s1355_s1 + $0x78] sm:$0xff]   ;;  %v993_v36 = vld [vmem:[%s1356_s0 + $0xc] ss:$20 sps:$4 sm:$0xff]  }
   0xa   :  { %885 = vmatprep.subr.bf16.mxu1 %v965_v10  ;;  %v981_v26 = vld [vmem:[%s1355_s1 + $0xf0] sm:$0xff]   ;;  %v985_v30 = vld [vmem:[%s1355_s1 + $0xf8] sm:$0xff]   ;;  %v994_v37 = vld [vmem:[%s1355_s1 + $0x100] sm:$0xff]   ;;  %567 = vmatprep.mubr.bf16.mxu1 %v993_v36 }
   0xb   :  { %v982_v27 = vld [vmem:[%s1355_s1 + $0x30] sm:$0xff]   ;;  %v986_v31 = vld [vmem:[%s1355_s1 + $0x38] sm:$0xff]   ;;  %v995_v38 = vld [vmem:[%s1356_s0 + $0x2c] ss:$20 sps:$4 sm:$0xff]  }
   0xc   :  { %846 = vmatpush3.bf16.msra.mxu0 %v966_v11  ;;  %v983_v28 = vld [vmem:[%s1355_s1 + $0xb0] sm:$0xff]   ;;  %v987_v32 = vld [vmem:[%s1355_s1 + $0xb8] sm:$0xff]   ;;  %v1001_v40 = vld [vmem:[%s1355_s1 + $0x108] sm:$0xff]  }
   0xd   :  { %886 = vmatpush3.bf16.msra.mxu1 %v967_v12  ;;  %847 = vmatprep.subr.bf16.mxu0 %v968_v13  ;;  %v988_v33 = vld [vmem:[%s1356_s0] ss:$20 sps:$4 sm:$0xff]   ;;  %v990_v34 = vld [vmem:[%s1356_s0 + $0x4] ss:$20 sps:$4 sm:$0xff]   ;;  %v991_v35 = vld [vmem:[%s1356_s0 + $0x8] ss:$20 sps:$4 sm:$0xff]  }
   0xe   :  { %887 = vmatprep.subr.bf16.mxu1 %v969_v14  ;;  %502 = vmatprep.mubr.bf16.mxu0 %v990_v34  ;;  %v997_v39 = vld [vmem:[%s1356_s0 + $0x34] ss:$20 sps:$4 sm:$0xff]   ;;  %v1000_v42 = vld [vmem:[%s1356_s0 + $0x30] ss:$20 sps:$4 sm:$0xff]   ;;  %v1015_v46 = vld [vmem:[%s1355_s1 + $0x118] sm:$0xff]  }
   0xf   :  { %v999_v41 = vld [vmem:[%s1356_s0 + $0x28] ss:$20 sps:$4 sm:$0xff]   ;;  %v1008_v45 = vld [vmem:[%s1355_s1 + $0x110] sm:$0xff]   ;;  %v1007_v48 = vld [vmem:[%s1356_s0 + $0x58] ss:$20 sps:$4 sm:$0xff]  }
  0x10   :  { %848 = vmatpush3.bf16.msra.mxu0 %v970_v15  ;;  %v1002_v43 = vld [vmem:[%s1356_s0 + $0x54] ss:$20 sps:$4 sm:$0xff]   ;;  %v1004_v44 = vld [vmem:[%s1356_s0 + $0x5c] ss:$20 sps:$4 sm:$0xff]   ;;  %v1011_v50 = vld [vmem:[%s1356_s0 + $0x84] ss:$20 sps:$4 sm:$0xff]  }
  0x11   :  { %888 = vmatpush3.bf16.msra.mxu1 %v971_v16  ;;  %849 = vmatprep.subr.bf16.mxu0 %v972_v17  ;;  %v1006_v47 = vld [vmem:[%s1356_s0 + $0x50] ss:$20 sps:$4 sm:$0xff]   ;;  %v24_v53 = vld [vmem:[%s1357_s2 + $0x18] sm:$0xff]  ;;  %v22_v54 = vld [vmem:[%s1357_s2 + $0x8] sm:$0xff] }
  0x12   :  { %889 = vmatprep.subr.bf16.mxu1 %v973_v18  ;;  %v1009_v49 = vld [vmem:[%s1356_s0 + $0x7c] ss:$20 sps:$4 sm:$0xff]   ;;  %v21_v52 = vld [vmem:[%s1357_s2] sm:$0xff]  ;;  %v1013_v55 = vld [vmem:[%s1356_s0 + $0x78] ss:$20 sps:$4 sm:$0xff]  }
  0x13   :  { %v23_v51 = vld [vmem:[%s1357_s2 + $0x10] sm:$0xff]  ;;  %667 = vperm.xlu0 %954, %v21_v52   ;;  %v26_v58 = vld [vmem:[%s1357_s2 + $0x28] sm:$0xff]  ;;  %v25_v60 = vld [vmem:[%s1357_s2 + $0x20] sm:$0xff] }
  0x14   :  { %850 = vmatpush3.bf16.msra.mxu0 %v974_v19  ;;  %677 = vperm.xlu1 %955, %v23_v51   ;;  %v1014_v56 = vld [vmem:[%s1356_s0 + $0x80] ss:$20 sps:$4 sm:$0xff]   ;;  %v1016_v57 = vld [vmem:[%s1356_s0 + $0x10] ss:$20 sps:$4 sm:$0xff]   ;;  %v28_v61 = vld [vmem:[%s1357_s2 + $0x38] sm:$0xff] }
  0x15   :  { %890 = vmatpush3.bf16.msra.mxu1 %v975_v20  ;;  %851 = vmatprep.subr.bf16.mxu0 %v976_v21  ;;  %v1017_v59 = vld [vmem:[%s1356_s0 + $0x60] ss:$20 sps:$4 sm:$0xff]   ;;  %v1018_v63 = vld [vmem:[%s1356_s0 + $0x38] ss:$20 sps:$4 sm:$0xff]   ;;  %v1019_v0 = vld [vmem:[%s1356_s0 + $0x88] ss:$20 sps:$4 sm:$0xff]  }
  0x16   :  { %891 = vmatprep.subr.bf16.mxu1 %v977_v22  ;;  %v27_v62 = vld [vmem:[%s1357_s2 + $0x30] sm:$0xff]  ;;  %v30_v1 = vld [vmem:[%s1358_s3 + $0x8] sm:$0xff]  ;;  %v29_v2 = vld [vmem:[%s1358_s3] sm:$0xff] }
  0x17   :  { %672 = vperm.xlu0 %954, %v22_v54   ;;  %v32_v3 = vld [vmem:[%s1358_s3 + $0x18] sm:$0xff]  ;;  %v31_v4 = vld [vmem:[%s1358_s3 + $0x10] sm:$0xff]  ;;  %v34_v5 = vld [vmem:[%s1358_s3 + $0x28] sm:$0xff] }
  0x18   :  { %852 = vmatpush3.bf16.msra.mxu0 %v978_v23  ;;  %682 = vperm.xlu1 %955, %v24_v53   ;;  %v33_v6 = vld [vmem:[%s1358_s3 + $0x20] sm:$0xff]  ;;  %v36_v7 = vld [vmem:[%s1358_s3 + $0x38] sm:$0xff]  ;;  %v35_v8 = vld [vmem:[%s1358_s3 + $0x30] sm:$0xff] }
  0x19   :  { %892 = vmatpush3.bf16.msra.mxu1 %v979_v24  ;;  %853 = vmatprep.subr.bf16.mxu0 %v980_v25  ;;  %v133_v17 = vld [vmem:[%s1359_s4] sm:$0xff]  ;;  %v134_v24 = vld [vmem:[%s1359_s4 + $0x8] sm:$0xff] }
  0x1a   :  { %893 = vmatprep.subr.bf16.mxu1 %v981_v26 }
  0x1b   :  { %687 = vperm.xlu0 %954, %v25_v60  }
  0x1c   :  { %854 = vmatpush3.bf16.msra.mxu0 %v982_v27  ;;  %692 = vperm.xlu1 %955, %v26_v58  }
  0x1d   :  { %894 = vmatpush3.bf16.msra.mxu1 %v983_v28  ;;  %855 = vmatprep.subr.bf16.mxu0 %v984_v29 }
  0x1e   :  { %895 = vmatprep.subr.bf16.mxu1 %v985_v30 }
  0x1f   :  { %697 = vperm.xlu0 %954, %v27_v62  }
  0x20   :  { %856 = vmatpush3.bf16.msra.mxu0 %v986_v31  ;;  %702 = vperm.xlu1 %955, %v28_v61  }
  0x21   :  { %896 = vmatpush3.bf16.msra.mxu1 %v987_v32  ;;  %929 = vmatprep.subr.bf16.mxu0 %v994_v37 }
  0x22   :  { %945 = vmatprep.subr.bf16.mxu1 %v994_v37 }
  0x23   :  { %503 = vmatmul.mubr.bf16.vlgmr.msra.gmra.mrb[0].mxu0 %v988_v33  ;;  %715 = vperm.xlu0 %954, %v29_v2  }
  0x24   :  { %568 = vmatmul.mubr.bf16.vlgmr.msra.gmra.mrb[0].mxu1 %v991_v35  ;;  %930 = vmatpush3.bf16.msra.mxu0 %v994_v37 }
  0x25   :  { %949 = vmatpush3.bf16.msra.mxu1 %v994_v37  ;;  %510 = vmatprep.mubr.bf16.mxu0 %v995_v38  ;;  %v135_v37 = vld [vmem:[%s1359_s4 + $0x10] sm:$0xff] }
  0x26   :  { %575 = vmatprep.mubr.bf16.mxu1 %v997_v39  ;;  %931 = vmatprep.subr.bf16.mxu0 %v1001_v40 }
  0x27   :  { %946 = vmatprep.subr.bf16.mxu1 %v1001_v40  ;;  %720 = vperm.xlu1 %955, %v30_v1  }
  0x28   :  { %932 = vmatpush3.bf16.msra.mxu0 %v1001_v40  ;;  %725 = vperm.xlu0 %954, %v31_v4  }
  0x29   :  { %950 = vmatpush3.bf16.msra.mxu1 %v1001_v40  ;;  %933 = vmatprep.subr.bf16.mxu0 %v1008_v45 }
  0x2a   :  { %947 = vmatprep.subr.bf16.mxu1 %v1008_v45 }
  0x2b   :  { %511 = vmatmul.mubr.bf16.gmra.mrb[4].mxu0 %v999_v41  ;;  %730 = vperm.xlu1 %955, %v32_v3  }
  0x2c   :  { %576 = vmatmul.mubr.bf16.gmra.mrb[4].mxu1 %v1000_v42  ;;  %518 = vmatprep.mubr.bf16.mxu0 %v1002_v43 }
  0x2d   :  { %583 = vmatprep.mubr.bf16.mxu1 %v1004_v44  ;;  %934 = vmatpush3.bf16.msra.mxu0 %v1008_v45  ;;  %v136_v44 = vld [vmem:[%s1359_s4 + $0x18] sm:$0xff] }
  0x2e   :  { %951 = vmatpush3.bf16.msra.mxu1 %v1008_v45  ;;  %935 = vmatprep.subr.bf16.mxu0 %v1015_v46 }
  0x2f   :  { %948 = vmatprep.subr.bf16.mxu1 %v1015_v46  ;;  %740 = vperm.xlu1 %955, %v34_v5  }
  0x30   :  { %735 = vperm.xlu0 %954, %v33_v6  }
  0x31   :  { %936 = vmatpush3.bf16.msra.mxu0 %v1015_v46 }
  0x32   :  { %952 = vmatpush3.bf16.msra.mxu1 %v1015_v46 }
  0x33   :  { %519 = vmatmul.mubr.bf16.gmra.mrb[8].mxu0 %v1006_v47  ;;  %750 = vperm.xlu1 %955, %v36_v7  }
  0x34   :  { %584 = vmatmul.mubr.bf16.gmra.mrb[8].mxu1 %v1007_v48  ;;  %526 = vmatprep.mubr.bf16.mxu0 %v1009_v49 }
  0x35   :  { %591 = vmatprep.mubr.bf16.mxu1 %v1011_v50  ;;  %745 = vperm.xlu0 %954, %v35_v8  }
  0x3b   :  { %527 = vmatmul.mubr.bf16.gmra.mrb[12].mxu0 %v1013_v55 }
  0x3c   :  { %592 = vmatmul.mubr.bf16.gmra.mrb[12].mxu1 %v1014_v56  ;;  %937 = vmatprep.mubr.msk.bf16.mxu0 %vm457_vm0, %v1016_v57  ;;  %v137_v57 = vld [vmem:[%s1359_s4 + $0x20] sm:$0xff] }
  0x3d   :  { %941 = vmatprep.mubr.msk.bf16.mxu1 %vm457_vm0, %v1017_v59 }
  0x43   :  { %938 = vmatmul.mubr.msk.bf16.vlgmr.msra.gmra.mrb[16].mxu0 %vm457_vm0, %v1018_v63 }
  0x44   :  { %942 = vmatmul.mubr.msk.bf16.vlgmr.msra.gmra.mrb[16].mxu1 %vm457_vm0, %v1019_v0  ;;  %v138_v0 = vld [vmem:[%s1359_s4 + $0x28] sm:$0xff] }
  0x92   :  { %v1273_v10 = vpop.permute.xlu0 %667 }
  0x93   :  { %v1271_v9 = vpop.permute.xlu1 %677 }
  0x96   :  { %v1277_v12 = vpop.permute.xlu0 %672 }
  0x97   :  { %v1275_v11 = vpop.permute.xlu1 %682 }
  0x9a   :  { %v1281_v14 = vpop.permute.xlu0 %687 }
  0x9b   :  { %v1279_v13 = vpop.permute.xlu1 %692 }
  0x9e   :  { %v1293_v33 = vpop.permute.xlu0 %697 }
  0x9f   :  { %v1291_v32 = vpop.permute.xlu1 %702 }
  0xa2   :  { %v1305_v53 = vpop.permute.xlu0 %715 }
  0xa6   :  { %v1303_v52 = vpop.permute.xlu1 %720 }
  0xaa   :  { %v731_v8 = vpop.permute.xlu1 %730 }
  0xf6   :  { %v857_v15 = vpop.f32.mrb[0].mxu0 }
  0xf7   :  { %v897_v16 = vpop.f32.mrb[0].mxu1  ;;  %v858_v18 = vpop.f32.mrb[1].mxu0 }
  0xf8   :  { %v859_v19 = vadd.f32 %v858_v18, %v857_v15  ;;  %v898_v20 = vpop.f32.mrb[1].mxu1  ;;  %v860_v21 = vpop.f32.mrb[2].mxu0 }
  0xf9   :  { %v899_v22 = vadd.f32 %v898_v20, %v897_v16  ;;  %v900_v23 = vpop.f32.mrb[2].mxu1  ;;  %v861_v25 = vpop.f32.mrb[3].mxu0 }
  0xfa   :  { %v505_v26 = vadd.f32 %v859_v19, %v133_v17  ;;  %v862_v27 = vadd.f32 %v861_v25, %v860_v21  ;;  %v901_v28 = vpop.f32.mrb[3].mxu1  ;;  %v726_v15 = vpop.permute.xlu0 %725  ;;  %v139_v19 = vld [vmem:[%s1359_s4 + $0x30] sm:$0xff] }
  0xfb   :  { %v902_v29 = vadd.f32 %v901_v28, %v900_v23 }
  0xfc   :  { %v508_v30 = vadd.f32 %v862_v27, %v134_v24  ;;  %v1289_v31 = vadd.f32 %v899_v22, %v505_v26  ;;  %v140_v26 = vld [vmem:[%s1359_s4 + $0x38] sm:$0xff] }
  0xfe   :  { %v863_v34 = vpop.f32.mrb[4].mxu0  ;;  %v1295_v35 = vadd.f32 %v902_v29, %v508_v30 }
  0xff   :  { %v903_v36 = vpop.f32.mrb[4].mxu1  ;;  %v864_v38 = vpop.f32.mrb[5].mxu0 }
 0x100   :  { %v865_v39 = vadd.f32 %v864_v38, %v863_v34  ;;  %v904_v40 = vpop.f32.mrb[5].mxu1  ;;  %v866_v41 = vpop.f32.mrb[6].mxu0 }
 0x101   :  { %v905_v42 = vadd.f32 %v904_v40, %v903_v36  ;;  %v906_v43 = vpop.f32.mrb[6].mxu1  ;;  %v867_v45 = vpop.f32.mrb[7].mxu0 }
 0x102   :  { %v513_v46 = vadd.f32 %v865_v39, %v135_v37  ;;  %v868_v47 = vadd.f32 %v867_v45, %v866_v41  ;;  %v907_v48 = vpop.f32.mrb[7].mxu1  ;;  %v736_v38 = vpop.permute.xlu0 %735 }
 0x103   :  { %v908_v49 = vadd.f32 %v907_v48, %v906_v43  ;;  %v741_v39 = vpop.permute.xlu1 %740 }
 0x104   :  { %v516_v50 = vadd.f32 %v868_v47, %v136_v44  ;;  %v578_v51 = vadd.f32 %v905_v42, %v513_v46 }
 0x106   :  { %v869_v54 = vpop.f32.mrb[8].mxu0  ;;  %v581_v55 = vadd.f32 %v908_v49, %v516_v50 }
 0x107   :  { %v909_v56 = vpop.f32.mrb[8].mxu1  ;;  %v870_v58 = vpop.f32.mrb[9].mxu0 }
 0x108   :  { %v871_v59 = vadd.f32 %v870_v58, %v869_v54  ;;  %v910_v60 = vpop.f32.mrb[9].mxu1  ;;  %v872_v61 = vpop.f32.mrb[10].mxu0 }
 0x109   :  { %v911_v62 = vadd.f32 %v910_v60, %v909_v56  ;;  %v912_v63 = vpop.f32.mrb[10].mxu1  ;;  %v873_v1 = vpop.f32.mrb[11].mxu0 }
 0x10a   :  { %v521_v2 = vadd.f32 %v871_v59, %v137_v57  ;;  %v874_v3 = vadd.f32 %v873_v1, %v872_v61  ;;  %v913_v4 = vpop.f32.mrb[11].mxu1 }
 0x10b   :  { %v914_v5 = vadd.f32 %v913_v4, %v912_v63 }
 0x10c   :  { %v524_v6 = vadd.f32 %v874_v3, %v138_v0  ;;  %v586_v7 = vadd.f32 %v911_v62, %v521_v2  ;;  %v746_v62 = vpop.permute.xlu0 %745  ;;  %v751_v3 = vpop.permute.xlu1 %750 }
 0x10e   :  { %v875_v16 = vpop.f32.mrb[12].mxu0  ;;  %v589_v17 = vadd.f32 %v914_v5, %v524_v6 }
 0x10f   :  { %v915_v18 = vpop.f32.mrb[12].mxu1  ;;  %v876_v20 = vpop.f32.mrb[13].mxu0 }
 0x110   :  { %v877_v21 = vadd.f32 %v876_v20, %v875_v16  ;;  %v916_v22 = vpop.f32.mrb[13].mxu1  ;;  %v878_v23 = vpop.f32.mrb[14].mxu0 }
 0x111   :  { %v917_v24 = vadd.f32 %v916_v22, %v915_v18  ;;  %v918_v25 = vpop.f32.mrb[14].mxu1  ;;  %v879_v27 = vpop.f32.mrb[15].mxu0 }
 0x112   :  { %v529_v28 = vadd.f32 %v877_v21, %v139_v19  ;;  %v880_v29 = vadd.f32 %v879_v27, %v878_v23  ;;  %v919_v30 = vpop.f32.mrb[15].mxu1 }
 0x113   :  { %v920_v34 = vadd.f32 %v919_v30, %v918_v25 }
 0x114   :  { %v532_v36 = vadd.f32 %v880_v29, %v140_v26  ;;  %v594_v37 = vadd.f32 %v917_v24, %v529_v28 }
 0x116   :  { %v939_v40 = vpop.f32.mrb[16].mxu0  ;;  %v597_v41 = vadd.f32 %v920_v34, %v532_v36 }
 0x117   :  { %v643_v42 = vadd.f32 %v939_v40, %v578_v51  ;;  %v943_v43 = vpop.f32.mrb[16].mxu1  ;;  %v634_v44 = vpop.f32.mrb[17].mxu0 }
 0x118   :  { %v659_v45 = vadd.f32 %v943_v43, %v594_v37  ;;  %v635_v46 = vadd.f32 %v634_v44, %v1289_v31  ;;  %v650_v47 = vpop.f32.mrb[17].mxu1  ;;  %v940_v48 = vpop.f32.mrb[18].mxu0 }
 0x119   :  { %v707_v49 = vmul.f32 %v1271_v9, %v643_v42  ;;  %v651_v50 = vadd.f32 %v650_v47, %v586_v7  ;;  %v646_v54 = vadd.f32 %v940_v48, %v581_v55  ;;  %v944_v56 = vpop.f32.mrb[18].mxu1  ;;  %v637_v57 = vpop.f32.mrb[19].mxu0 }
 0x11a   :  { %v711_v58 = vmul.f32 %v1293_v33, %v659_v45  ;;  %v705_v59 = vmul.f32 %v1273_v10, %v635_v46  ;;  %v662_v60 = vadd.f32 %v944_v56, %v597_v41  ;;  %v638_v51 = vadd.f32 %v637_v57, %v1295_v35  ;;  %v653_v61 = vpop.f32.mrb[19].mxu1 }
 0x11b   :  { %v755_v63 = vadd.f32 %v726_v15, %v707_v49  ;;  %v709_v31 = vmul.f32 %v1281_v14, %v651_v50  ;;  %v708_v0 = vmul.f32 %v1275_v11, %v646_v54  ;;  %v654_v1 = vadd.f32 %v653_v61, %v589_v17 }
 0x11c   :  { %v759_v9 = vadd.f32 %v746_v62, %v711_v58  ;;  %v753_v55 = vadd.f32 %v1305_v53, %v705_v59  ;;  %v712_v2 = vmul.f32 %v1291_v32, %v662_v60  ;;  %v706_v33 = vmul.f32 %v1277_v12, %v638_v51 }
 0x11d   :  { %v763_v10 = vmax.f32 %v755_v63, 0.0  ;;  %v757_v4 = vadd.f32 %v736_v38, %v709_v31  ;;  %v756_v5 = vadd.f32 %v731_v8, %v708_v0  ;;  %v710_v35 = vmul.f32 %v1279_v13, %v654_v1 }
 0x11e   :  { %v767_v6 = vmax.f32 %v759_v9, 0.0  ;;  %v761_v7 = vmax.f32 %v753_v55, 0.0  ;;  %v760_v15 = vadd.f32 %v751_v3, %v712_v2  ;;  %v754_v14 = vadd.f32 %v1303_v52, %v706_v33 }
 0x11f   :  { %771 = vst [vmem:[%s1360_s5 + $0x10] sm:$0xff] %v763_v10  ;;  %v765_v11 = vmax.f32 %v757_v4, 0.0  ;;  %v764_v53 = vmax.f32 %v756_v5, 0.0  ;;  %v758_v32 = vadd.f32 %v741_v39, %v710_v35 }
 0x120   :  { %775 = vst [vmem:[%s1360_s5 + $0x30] sm:$0xff] %v767_v6  ;;  %769 = vst [vmem:[%s1360_s5] sm:$0xff] %v761_v7  ;;  %v768_v12 = vmax.f32 %v760_v15, 0.0  ;;  %v762_v13 = vmax.f32 %v754_v14, 0.0 }
 0x121   :  { %773 = vst [vmem:[%s1360_s5 + $0x20] sm:$0xff] %v765_v11  ;;  %772 = vst [vmem:[%s1360_s5 + $0x18] sm:$0xff] %v764_v53  ;;  %v766_v52 = vmax.f32 %v758_v32, 0.0 }
 0x122   :  { %776 = vst [vmem:[%s1360_s5 + $0x38] sm:$0xff] %v768_v12  ;;  %770 = vst [vmem:[%s1360_s5 + $0x8] sm:$0xff] %v762_v13 }
 0x123   :  { %774 = vst [vmem:[%s1360_s5 + $0x28] sm:$0xff] %v766_v52 }

// kernel: _lambda_.19
= control target key start
LH: loop header
LB: loop body
LE: loop exit
PB: predicated region body
PF: predicated region fallthrough
CT: control target
= control target key end

     0   :  { %vm78_vm0 = vcmask 517120   ;;  %vm743_vm1 = vcmask 523264   ;;  %vm672_vm2 = vcmask 1041409   ;;  %vm674_vm3 = vcmask 1042434   ;;  %s1434_s0 = inlined_call_operand.vmem [shape: f32[64,2,64], index: 0, kind: input, shape index: {}]   ;;  %s1435_s1 = inlined_call_operand.vmem [shape: f32[10,64], index: 1, kind: input, shape index: {}]   ;;  %s1436_s2 = inlined_call_operand.vmem [shape: f32[10,1], index: 2, kind: input, shape index: {}]   ;;  %s1437_s3 = inlined_call_operand.vmem [shape: f32[10,2], index: 3, kind: output, shape index: {}]  }
   0x1   :  { %v22_v0 = vld [vmem:[%s1434_s0 + $0x10] sm:$0x3]  ;;  %v14_v1 = vld [vmem:[%s1434_s0] sm:$0x3]  ;;  %v23_v2 = vld [vmem:[%s1434_s0 + $0x12] sm:$0x3] }
   0x2   :  { %v103_v3 = vsel %vm78_vm0, %v22_v0, 0.0  ;;  %v79_v4 = vsel %vm78_vm0, %v14_v1, 0.0  ;;  %v15_v5 = vld [vmem:[%s1434_s0 + $0x2] sm:$0x3]  ;;  %v106_v6 = vsel %vm78_vm0, %v23_v2, 0.0  ;;  %vm676_vm4 = vcmask 1043459  }
   0x3   :  { %104 = vadd.xlane.f32.xlu1 %v103_v3  ;;  %80 = vadd.xlane.f32.xlu0 %v79_v4  ;;  %v82_v7 = vsel %vm78_vm0, %v15_v5, 0.0  ;;  %v24_v8 = vld [vmem:[%s1434_s0 + $0x14] sm:$0x3]  ;;  %v16_v9 = vld [vmem:[%s1434_s0 + $0x4] sm:$0x3]  ;;  %vm678_vm5 = vcmask 1044484  }
   0x4   :  { %v109_v10 = vsel %vm78_vm0, %v24_v8, 0.0  ;;  %v85_v11 = vsel %vm78_vm0, %v16_v9, 0.0  ;;  %v25_v12 = vld [vmem:[%s1434_s0 + $0x16] sm:$0x3]  ;;  %v17_v13 = vld [vmem:[%s1434_s0 + $0x6] sm:$0x3] }
   0x5   :  { %v112_v14 = vsel %vm78_vm0, %v25_v12, 0.0  ;;  %v88_v15 = vsel %vm78_vm0, %v17_v13, 0.0  ;;  %v26_v16 = vld [vmem:[%s1434_s0 + $0x18] sm:$0x3]  ;;  %v18_v17 = vld [vmem:[%s1434_s0 + $0x8] sm:$0x3] }
   0x6   :  { %v27_v18 = vld [vmem:[%s1434_s0 + $0x1a] sm:$0x3]  ;;  %v19_v19 = vld [vmem:[%s1434_s0 + $0xa] sm:$0x3]  ;;  %v31_v20 = vld [vmem:[%s1434_s0 + $0x22] sm:$0x3] }
   0x7   :  { %107 = vadd.xlane.f32.xlu1 %v106_v6  ;;  %83 = vadd.xlane.f32.xlu0 %v82_v7  ;;  %v30_v21 = vld [vmem:[%s1434_s0 + $0x20] sm:$0x3]  ;;  %v39_v22 = vld [vmem:[%s1434_s0 + $0x32] sm:$0x3]  ;;  %v38_v23 = vld [vmem:[%s1434_s0 + $0x30] sm:$0x3] }
   0x8   :  { %v28_v24 = vld [vmem:[%s1434_s0 + $0x1c] sm:$0x3]  ;;  %v20_v25 = vld [vmem:[%s1434_s0 + $0xc] sm:$0x3]  ;;  %v115_v26 = vsel %vm78_vm0, %v26_v16, 0.0  ;;  %v91_v27 = vsel %vm78_vm0, %v18_v17, 0.0 }
   0x9   :  { %v118_v28 = vsel %vm78_vm0, %v27_v18, 0.0  ;;  %v94_v29 = vsel %vm78_vm0, %v19_v19, 0.0  ;;  %v130_v30 = vsel %vm78_vm0, %v31_v20, 0.0  ;;  %v127_v31 = vsel %vm78_vm0, %v30_v21, 0.0  ;;  %v44_v36 = vld [vmem:[%s1434_s0 + $0x3c] sm:$0x3] }
   0xa   :  { %v973_v32 = vsel %vm78_vm0, %v39_v22, 0.0  ;;  %v976_v33 = vsel %vm78_vm0, %v38_v23, 0.0  ;;  %v979_v34 = vsel %vm78_vm0, %v28_v24, 0.0  ;;  %v982_v35 = vsel %vm78_vm0, %v20_v25, 0.0  ;;  %v36_v37 = vld [vmem:[%s1434_s0 + $0x2c] sm:$0x3] }
   0xb   :  { %110 = vadd.xlane.f32.xlu1 %v109_v10  ;;  %86 = vadd.xlane.f32.xlu0 %v85_v11  ;;  %v991_v38 = vsel %vm78_vm0, %v44_v36, 0.0  ;;  %v994_v39 = vsel %vm78_vm0, %v36_v37, 0.0  ;;  %v56_v40 = vld [vmem:[%s1434_s0 + $0x54] sm:$0x3]  ;;  %v48_v41 = vld [vmem:[%s1434_s0 + $0x44] sm:$0x3] }
   0xc   :  { %v1003_v42 = vsel %vm78_vm0, %v56_v40, 0.0  ;;  %v1006_v43 = vsel %vm78_vm0, %v48_v41, 0.0  ;;  %v45_v44 = vld [vmem:[%s1434_s0 + $0x3e] sm:$0x3]  ;;  %v37_v45 = vld [vmem:[%s1434_s0 + $0x2e] sm:$0x3] }
   0xd   :  { %v1015_v46 = vsel %vm78_vm0, %v45_v44, 0.0  ;;  %v1018_v47 = vsel %vm78_vm0, %v37_v45, 0.0  ;;  %v57_v48 = vld [vmem:[%s1434_s0 + $0x56] sm:$0x3]  ;;  %v49_v49 = vld [vmem:[%s1434_s0 + $0x46] sm:$0x3] }
   0xe   :  { %v1027_v50 = vsel %vm78_vm0, %v57_v48, 0.0  ;;  %v1030_v51 = vsel %vm78_vm0, %v49_v49, 0.0  ;;  %v58_v52 = vld [vmem:[%s1434_s0 + $0x58] sm:$0x3]  ;;  %v50_v53 = vld [vmem:[%s1434_s0 + $0x48] sm:$0x3] }
   0xf   :  { %113 = vadd.xlane.f32.xlu1 %v112_v14  ;;  %89 = vadd.xlane.f32.xlu0 %v88_v15  ;;  %v1039_v54 = vsel %vm78_vm0, %v58_v52, 0.0  ;;  %v1042_v55 = vsel %vm78_vm0, %v50_v53, 0.0  ;;  %v59_v56 = vld [vmem:[%s1434_s0 + $0x5a] sm:$0x3]  ;;  %v51_v57 = vld [vmem:[%s1434_s0 + $0x4a] sm:$0x3] }
  0x10   :  { %v1051_v58 = vsel %vm78_vm0, %v59_v56, 0.0  ;;  %v1054_v59 = vsel %vm78_vm0, %v51_v57, 0.0  ;;  %v63_v60 = vld [vmem:[%s1434_s0 + $0x62] sm:$0x3]  ;;  %v62_v61 = vld [vmem:[%s1434_s0 + $0x60] sm:$0x3] }
  0x11   :  { %v1063_v62 = vsel %vm78_vm0, %v63_v60, 0.0  ;;  %v1066_v63 = vsel %vm78_vm0, %v62_v61, 0.0  ;;  %v71_v0 = vld [vmem:[%s1434_s0 + $0x72] sm:$0x3]  ;;  %v70_v1 = vld [vmem:[%s1434_s0 + $0x70] sm:$0x3] }
  0x12   :  { %v1075_v2 = vsel %vm78_vm0, %v71_v0, 0.0  ;;  %v1078_v3 = vsel %vm78_vm0, %v70_v1, 0.0  ;;  %v60_v4 = vld [vmem:[%s1434_s0 + $0x5c] sm:$0x3]  ;;  %v52_v5 = vld [vmem:[%s1434_s0 + $0x4c] sm:$0x3] }
  0x13   :  { %116 = vadd.xlane.f32.xlu1 %v115_v26  ;;  %92 = vadd.xlane.f32.xlu0 %v91_v27  ;;  %v1087_v6 = vsel %vm78_vm0, %v60_v4, 0.0  ;;  %v1090_v7 = vsel %vm78_vm0, %v52_v5, 0.0  ;;  %v72_v8 = vld [vmem:[%s1434_s0 + $0x74] sm:$0x3]  ;;  %v64_v9 = vld [vmem:[%s1434_s0 + $0x64] sm:$0x3] }
  0x14   :  { %v1099_v10 = vsel %vm78_vm0, %v72_v8, 0.0  ;;  %v1102_v11 = vsel %vm78_vm0, %v64_v9, 0.0  ;;  %v61_v12 = vld [vmem:[%s1434_s0 + $0x5e] sm:$0x3]  ;;  %v53_v13 = vld [vmem:[%s1434_s0 + $0x4e] sm:$0x3] }
  0x15   :  { %v1111_v14 = vsel %vm78_vm0, %v61_v12, 0.0  ;;  %v1114_v15 = vsel %vm78_vm0, %v53_v13, 0.0  ;;  %v73_v16 = vld [vmem:[%s1434_s0 + $0x76] sm:$0x3]  ;;  %v65_v17 = vld [vmem:[%s1434_s0 + $0x66] sm:$0x3] }
  0x16   :  { %v1123_v18 = vsel %vm78_vm0, %v73_v16, 0.0  ;;  %v1126_v19 = vsel %vm78_vm0, %v65_v17, 0.0  ;;  %v74_v20 = vld [vmem:[%s1434_s0 + $0x78] sm:$0x3]  ;;  %v66_v21 = vld [vmem:[%s1434_s0 + $0x68] sm:$0x3] }
  0x17   :  { %119 = vadd.xlane.f32.xlu1 %v118_v28  ;;  %95 = vadd.xlane.f32.xlu0 %v94_v29  ;;  %v1135_v22 = vsel %vm78_vm0, %v74_v20, 0.0  ;;  %v1138_v23 = vsel %vm78_vm0, %v66_v21, 0.0  ;;  %v75_v24 = vld [vmem:[%s1434_s0 + $0x7a] sm:$0x3]  ;;  %v67_v25 = vld [vmem:[%s1434_s0 + $0x6a] sm:$0x3] }
  0x18   :  { %v1149_v26 = vsel %vm78_vm0, %v75_v24, 0.0  ;;  %v1152_v27 = vsel %vm78_vm0, %v67_v25, 0.0  ;;  %v76_v28 = vld [vmem:[%s1434_s0 + $0x7c] sm:$0x3]  ;;  %v68_v29 = vld [vmem:[%s1434_s0 + $0x6c] sm:$0x3] }
  0x19   :  { %v40_v36 = vld [vmem:[%s1434_s0 + $0x34] sm:$0x3]  ;;  %v32_v37 = vld [vmem:[%s1434_s0 + $0x24] sm:$0x3]  ;;  %v29_v48 = vld [vmem:[%s1434_s0 + $0x1e] sm:$0x3] }
  0x1a   :  { %v157_v44 = vsel %vm78_vm0, %v40_v36, 0.0  ;;  %v133_v45 = vsel %vm78_vm0, %v32_v37, 0.0  ;;  %v21_v49 = vld [vmem:[%s1434_s0 + $0xe] sm:$0x3]  ;;  %v124_v52 = vsel %vm78_vm0, %v29_v48, 0.0  ;;  %vm680_vm6 = vcmask 1045509  }
  0x1b   :  { %131 = vadd.xlane.f32.xlu1 %v130_v30  ;;  %128 = vadd.xlane.f32.xlu0 %v127_v31  ;;  %v1161_v30 = vsel %vm78_vm0, %v76_v28, 0.0  ;;  %v1164_v31 = vsel %vm78_vm0, %v68_v29, 0.0  ;;  %v33_v53 = vld [vmem:[%s1434_s0 + $0x26] sm:$0x3]  ;;  %v42_v60 = vld [vmem:[%s1434_s0 + $0x38] sm:$0x3] }
  0x1c   :  { %v136_v57 = vsel %vm78_vm0, %v33_v53, 0.0  ;;  %v34_v61 = vld [vmem:[%s1434_s0 + $0x28] sm:$0x3]  ;;  %v163_v0 = vsel %vm78_vm0, %v42_v60, 0.0  ;;  %v43_v4 = vld [vmem:[%s1434_s0 + $0x3a] sm:$0x3] }
  0x1d   :  { %v139_v1 = vsel %vm78_vm0, %v34_v61, 0.0  ;;  %v35_v5 = vld [vmem:[%s1434_s0 + $0x2a] sm:$0x3]  ;;  %v166_v8 = vsel %vm78_vm0, %v43_v4, 0.0  ;;  %v47_v12 = vld [vmem:[%s1434_s0 + $0x42] sm:$0x3] }
  0x1e   :  { %v142_v9 = vsel %vm78_vm0, %v35_v5, 0.0  ;;  %v46_v13 = vld [vmem:[%s1434_s0 + $0x40] sm:$0x3]  ;;  %v178_v16 = vsel %vm78_vm0, %v47_v12, 0.0  ;;  %v55_v20 = vld [vmem:[%s1434_s0 + $0x52] sm:$0x3] }
  0x1f   :  { %155 = vadd.xlane.f32.xlu1 %v973_v32  ;;  %152 = vadd.xlane.f32.xlu0 %v976_v33  ;;  %v77_v32 = vld [vmem:[%s1434_s0 + $0x7e] sm:$0x3]  ;;  %v69_v33 = vld [vmem:[%s1434_s0 + $0x6e] sm:$0x3]  ;;  %v175_v17 = vsel %vm78_vm0, %v46_v13, 0.0  ;;  %v202_v24 = vsel %vm78_vm0, %v55_v20, 0.0 }
  0x20   :  { %v1179_v40 = vsel %vm78_vm0, %v77_v32, 0.0  ;;  %v1182_v41 = vsel %vm78_vm0, %v69_v33, 0.0  ;;  %v54_v21 = vld [vmem:[%s1434_s0 + $0x50] sm:$0x3]  ;;  %vm682_vm7 = vcmask 1046534   ;;  %vm684_vm8 = vcmask 1047559  }
  0x21   :  { %v199_v25 = vsel %vm78_vm0, %v54_v21, 0.0  ;;  %vm827_vm9 = vcmask 9216   ;;  %vm825_vm10 = vcmask 15360  }
  0x23   :  { %122 = vadd.xlane.f32.xlu1 %v979_v34  ;;  %98 = vadd.xlane.f32.xlu0 %v982_v35  ;;  %v100_v34 = vsel %vm78_vm0, %v21_v49, 0.0  ;;  %v41_v35 = vld [vmem:[%s1434_s0 + $0x36] sm:$0x3] }
  0x24   :  { %v160_v56 = vsel %vm78_vm0, %v41_v35, 0.0 }
  0x27   :  { %158 = vadd.xlane.f32.xlu1 %v157_v44  ;;  %134 = vadd.xlane.f32.xlu0 %v133_v45 }
  0x2b   :  { %125 = vadd.xlane.f32.xlu1 %v124_v52  ;;  %101 = vadd.xlane.f32.xlu0 %v100_v34 }
  0x2f   :  { %161 = vadd.xlane.f32.xlu1 %v160_v56  ;;  %137 = vadd.xlane.f32.xlu0 %v136_v57 }
  0x33   :  { %164 = vadd.xlane.f32.xlu1 %v163_v0  ;;  %140 = vadd.xlane.f32.xlu0 %v139_v1 }
  0x37   :  { %167 = vadd.xlane.f32.xlu1 %v166_v8  ;;  %143 = vadd.xlane.f32.xlu0 %v142_v9 }
  0x3b   :  { %179 = vadd.xlane.f32.xlu1 %v178_v16  ;;  %176 = vadd.xlane.f32.xlu0 %v175_v17 }
  0x3f   :  { %203 = vadd.xlane.f32.xlu1 %v202_v24  ;;  %200 = vadd.xlane.f32.xlu0 %v199_v25 }
  0x43   :  { %170 = vadd.xlane.f32.xlu1 %v991_v38  ;;  %146 = vadd.xlane.f32.xlu0 %v994_v39 }
  0x47   :  { %206 = vadd.xlane.f32.xlu1 %v1003_v42  ;;  %182 = vadd.xlane.f32.xlu0 %v1006_v43 }
  0x4b   :  { %173 = vadd.xlane.f32.xlu1 %v1015_v46  ;;  %149 = vadd.xlane.f32.xlu0 %v1018_v47  ;;  %v336_v46 = vld [vmem:[%s1435_s1] sm:$0xff] }
  0x4c   :  { %861 = vmatprep.mubr.msk.f32.mxu0 %vm743_vm1, %v336_v46 }
  0x4f   :  { %209 = vadd.xlane.f32.xlu1 %v1027_v50  ;;  %185 = vadd.xlane.f32.xlu0 %v1030_v51  ;;  %v883_v51 = vmov 0  }
  0x50   :  { %882 = vset.pattern.permute.xlu1 %v883_v51  ;;  %881 = vset.pattern.permute.xlu0 %v883_v51 }
  0x53   :  { %212 = vadd.xlane.f32.xlu1 %v1039_v54  ;;  %188 = vadd.xlane.f32.xlu0 %v1042_v55  ;;  %v339_v54 = vld [vmem:[%s1436_s2 + $0x8] sm:$0x3]  ;;  %v338_v55 = vld [vmem:[%s1436_s2] sm:$0xff] }
  0x57   :  { %215 = vadd.xlane.f32.xlu1 %v1051_v58  ;;  %191 = vadd.xlane.f32.xlu0 %v1054_v59 }
  0x5b   :  { %227 = vadd.xlane.f32.xlu1 %v1063_v62  ;;  %224 = vadd.xlane.f32.xlu0 %v1066_v63 }
  0x5f   :  { %251 = vadd.xlane.f32.xlu1 %v1075_v2  ;;  %248 = vadd.xlane.f32.xlu0 %v1078_v3 }
  0x63   :  { %218 = vadd.xlane.f32.xlu1 %v1087_v6  ;;  %194 = vadd.xlane.f32.xlu0 %v1090_v7  ;;  %v414_v6 = vlaneseq }
  0x67   :  { %254 = vadd.xlane.f32.xlu1 %v1099_v10  ;;  %230 = vadd.xlane.f32.xlu0 %v1102_v11  ;;  %v415_v11 = vand.u32 127, %v414_v6 }
  0x6b   :  { %221 = vadd.xlane.f32.xlu1 %v1111_v14  ;;  %197 = vadd.xlane.f32.xlu0 %v1114_v15  ;;  %v417_v14 = vshrl.u32 %v414_v6, 7 }
  0x6f   :  { %257 = vadd.xlane.f32.xlu1 %v1123_v18  ;;  %233 = vadd.xlane.f32.xlu0 %v1126_v19  ;;  %v1286_v19 = vsub.s32 %v415_v11, %v417_v14 }
  0x73   :  { %260 = vadd.xlane.f32.xlu1 %v1135_v22  ;;  %236 = vadd.xlane.f32.xlu0 %v1138_v23 }
  0x77   :  { %263 = vadd.xlane.f32.xlu1 %v1149_v26  ;;  %239 = vadd.xlane.f32.xlu0 %v1152_v27 }
  0x7b   :  { %266 = vadd.xlane.f32.xlu1 %v1161_v30  ;;  %242 = vadd.xlane.f32.xlu0 %v1164_v31 }
  0x7f   :  { %269 = vadd.xlane.f32.xlu1 %v1179_v40  ;;  %245 = vadd.xlane.f32.xlu0 %v1182_v41 }
  0x90   :  { %v105_v38 = vpop.xlane.xlu1 %104  ;;  %v81_v39 = vpop.xlane.xlu0 %80  ;;  %347 = vperm.xlu1 %882, %v339_v54  }
  0x91   :  { %v280_v30 = vmul.f32 0.015625, %v105_v38  ;;  %v272_v31 = vmul.f32 0.015625, %v81_v39 }
  0x93   :  { %v451_v56 = vrot.slane %v280_v30, %v1286_v19  ;;  %v419_v57 = vrot.slane %v272_v31, %v1286_v19 }
  0x94   :  { %v108_v42 = vpop.xlane.xlu1 %107  ;;  %v84_v43 = vpop.xlane.xlu0 %83 }
  0x95   :  { %342 = vperm.xlu0 %881, %v338_v55   ;;  %v281_v22 = vmul.f32 0.015625, %v108_v42  ;;  %v273_v23 = vmul.f32 0.015625, %v84_v43 }
  0x97   :  { %v455_v40 = vrot.slane %v281_v22, %v1286_v19  ;;  %v423_v41 = vrot.slane %v273_v23, %v1286_v19 }
  0x98   :  { %v111_v47 = vpop.xlane.xlu1 %110  ;;  %v87_v50 = vpop.xlane.xlu0 %86 }
  0x99   :  { %v282_v26 = vmul.f32 0.015625, %v111_v47  ;;  %v274_v27 = vmul.f32 0.015625, %v87_v50  ;;  %v686_v4 = vsel %vm672_vm2, %v455_v40, %v451_v56  ;;  %v673_v5 = vsel %vm672_vm2, %v423_v41, %v419_v57 }
  0x9b   :  { %v459_v48 = vrot.slane %v282_v26, %v1286_v19  ;;  %v427_v49 = vrot.slane %v274_v27, %v1286_v19 }
  0x9c   :  { %v114_v58 = vpop.xlane.xlu1 %113  ;;  %v90_v59 = vpop.xlane.xlu0 %89 }
  0x9d   :  { %v283_v32 = vmul.f32 0.015625, %v114_v58  ;;  %v275_v33 = vmul.f32 0.015625, %v90_v59  ;;  %v687_v12 = vsel %vm674_vm3, %v459_v48, %v686_v4  ;;  %v675_v13 = vsel %vm674_vm3, %v427_v49, %v673_v5 }
  0x9f   :  { %v463_v60 = vrot.slane %v283_v32, %v1286_v19  ;;  %v431_v61 = vrot.slane %v275_v33, %v1286_v19 }
  0xa0   :  { %v117_v62 = vpop.xlane.xlu1 %116  ;;  %v93_v63 = vpop.xlane.xlu0 %92 }
  0xa1   :  { %v284_v36 = vmul.f32 0.015625, %v117_v62  ;;  %v276_v37 = vmul.f32 0.015625, %v93_v63  ;;  %v688_v24 = vsel %vm676_vm4, %v463_v60, %v687_v12  ;;  %v677_v25 = vsel %vm676_vm4, %v431_v61, %v675_v13 }
  0xa3   :  { %v467_v0 = vrot.slane %v284_v36, %v1286_v19  ;;  %v435_v1 = vrot.slane %v276_v37, %v1286_v19 }
  0xa4   :  { %v120_v2 = vpop.xlane.xlu1 %119  ;;  %v96_v3 = vpop.xlane.xlu0 %95 }
  0xa5   :  { %v285_v44 = vmul.f32 0.015625, %v120_v2  ;;  %v277_v45 = vmul.f32 0.015625, %v96_v3  ;;  %v689_v42 = vsel %vm678_vm5, %v467_v0, %v688_v24  ;;  %v679_v43 = vsel %vm678_vm5, %v435_v1, %v677_v25 }
  0xa7   :  { %v471_v8 = vrot.slane %v285_v44, %v1286_v19  ;;  %v439_v9 = vrot.slane %v277_v45, %v1286_v19 }
  0xa8   :  { %v1278_v7 = vpop.xlane.xlu1 %131  ;;  %v1280_v10 = vpop.xlane.xlu0 %128 }
  0xa9   :  { %v681_v50 = vsel %vm680_vm6, %v439_v9, %v679_v43  ;;  %v690_v51 = vsel %vm680_vm6, %v471_v8, %v689_v42 }
  0xac   :  { %v1282_v15 = vpop.xlane.xlu1 %155  ;;  %v1284_v18 = vpop.xlane.xlu0 %152 }
  0xad   :  { %v297_v30 = vmul.f32 0.015625, %v1282_v15  ;;  %v296_v31 = vmul.f32 0.015625, %v1284_v18 }
  0xb0   :  { %v123_v28 = vpop.xlane.xlu1 %122  ;;  %v99_v29 = vpop.xlane.xlu0 %98 }
  0xb1   :  { %v286_v52 = vmul.f32 0.015625, %v123_v28  ;;  %v278_v34 = vmul.f32 0.015625, %v99_v29  ;;  %v289_v28 = vmul.f32 0.015625, %v1278_v7  ;;  %v288_v29 = vmul.f32 0.015625, %v1280_v10 }
  0xb2   :  { %v519_v7 = vrot.slane %v297_v30, %v1286_v19  ;;  %v515_v10 = vrot.slane %v296_v31, %v1286_v19 }
  0xb3   :  { %v475_v16 = vrot.slane %v286_v52, %v1286_v19  ;;  %v443_v17 = vrot.slane %v278_v34, %v1286_v19  ;;  %v487_v44 = vrot.slane %v289_v28, %v1286_v19  ;;  %v483_v45 = vrot.slane %v288_v29, %v1286_v19 }
  0xb4   :  { %v159_v35 = vpop.xlane.xlu1 %158  ;;  %v135_v53 = vpop.xlane.xlu0 %134  ;;  %v700_v5 = vsel %vm672_vm2, %v519_v7, %v515_v10 }
  0xb5   :  { %v683_v58 = vsel %vm682_vm7, %v443_v17, %v681_v50  ;;  %v691_v59 = vsel %vm682_vm7, %v475_v16, %v690_v51  ;;  %v298_v32 = vmul.f32 0.015625, %v159_v35  ;;  %v290_v33 = vmul.f32 0.015625, %v135_v53 }
  0xb6   :  { %v693_v4 = vsel %vm672_vm2, %v487_v44, %v483_v45 }
  0xb7   :  { %v523_v18 = vrot.slane %v298_v32, %v1286_v19  ;;  %v491_v34 = vrot.slane %v290_v33, %v1286_v19 }
  0xb8   :  { %v126_v20 = vpop.xlane.xlu1 %125  ;;  %v102_v21 = vpop.xlane.xlu0 %101 }
  0xb9   :  { %v287_v38 = vmul.f32 0.015625, %v126_v20  ;;  %v279_v39 = vmul.f32 0.015625, %v102_v21  ;;  %v701_v12 = vsel %vm674_vm3, %v523_v18, %v700_v5  ;;  %v694_v13 = vsel %vm674_vm3, %v491_v34, %v693_v4 }
  0xbb   :  { %v479_v46 = vrot.slane %v287_v38, %v1286_v19  ;;  %v447_v47 = vrot.slane %v279_v39, %v1286_v19 }
  0xbc   :  { %v162_v54 = vpop.xlane.xlu1 %161  ;;  %v138_v55 = vpop.xlane.xlu0 %137 }
  0xbd   :  { %v685_v62 = vsel %vm684_vm8, %v447_v47, %v683_v58  ;;  %v692_v63 = vsel %vm684_vm8, %v479_v46, %v691_v59  ;;  %v299_v40 = vmul.f32 0.015625, %v162_v54  ;;  %v291_v41 = vmul.f32 0.015625, %v138_v55 }
  0xbe   :  { %v864_v2 = vpack.c.bf16 %v692_v63, %v685_v62 }
  0xbf   :  { %v527_v60 = vrot.slane %v299_v40, %v1286_v19  ;;  %v495_v61 = vrot.slane %v291_v41, %v1286_v19 }
  0xc0   :  { %v165_v3 = vpop.xlane.xlu1 %164  ;;  %865 = vmatprep.subr.bf16.mxu0 %v864_v2  ;;  %v141_v6 = vpop.xlane.xlu0 %140 }
  0xc1   :  { %867 = vmatpush3.bf16.msra.mxu0 %v864_v2  ;;  %v300_v48 = vmul.f32 0.015625, %v165_v3  ;;  %v292_v49 = vmul.f32 0.015625, %v141_v6  ;;  %v702_v24 = vsel %vm676_vm4, %v527_v60, %v701_v12  ;;  %v695_v25 = vsel %vm676_vm4, %v495_v61, %v694_v13 }
  0xc3   :  { %v531_v0 = vrot.slane %v300_v48, %v1286_v19  ;;  %v499_v1 = vrot.slane %v292_v49, %v1286_v19 }
  0xc4   :  { %v168_v11 = vpop.xlane.xlu1 %167  ;;  %v144_v14 = vpop.xlane.xlu0 %143 }
  0xc5   :  { %v301_v52 = vmul.f32 0.015625, %v168_v11  ;;  %v293_v15 = vmul.f32 0.015625, %v144_v14  ;;  %v703_v42 = vsel %vm678_vm5, %v531_v0, %v702_v24  ;;  %v696_v43 = vsel %vm678_vm5, %v499_v1, %v695_v25 }
  0xc7   :  { %v535_v8 = vrot.slane %v301_v52, %v1286_v19  ;;  %v503_v9 = vrot.slane %v293_v15, %v1286_v19 }
  0xc8   :  { %v1318_v22 = vpop.xlane.xlu1 %179  ;;  %v1320_v23 = vpop.xlane.xlu0 %176 }
  0xc9   :  { %v704_v46 = vsel %vm680_vm6, %v535_v8, %v703_v42  ;;  %v697_v47 = vsel %vm680_vm6, %v503_v9, %v696_v43  ;;  %v305_v32 = vmul.f32 0.015625, %v1318_v22  ;;  %v304_v33 = vmul.f32 0.015625, %v1320_v23 }
  0xcb   :  { %v551_v7 = vrot.slane %v305_v32, %v1286_v19  ;;  %v547_v10 = vrot.slane %v304_v33, %v1286_v19 }
  0xcc   :  { %v1322_v26 = vpop.xlane.xlu1 %203  ;;  %v1324_v27 = vpop.xlane.xlu0 %200 }
  0xcd   :  { %v707_v4 = vsel %vm672_vm2, %v551_v7, %v547_v10 }
  0xd0   :  { %v171_v36 = vpop.xlane.xlu1 %170  ;;  %v147_v37 = vpop.xlane.xlu0 %146 }
  0xd1   :  { %v302_v35 = vmul.f32 0.015625, %v171_v36  ;;  %v294_v53 = vmul.f32 0.015625, %v147_v37  ;;  %v313_v36 = vmul.f32 0.015625, %v1322_v26  ;;  %v312_v37 = vmul.f32 0.015625, %v1324_v27 }
  0xd3   :  { %v539_v16 = vrot.slane %v302_v35, %v1286_v19  ;;  %v507_v17 = vrot.slane %v294_v53, %v1286_v19  ;;  %v583_v22 = vrot.slane %v313_v36, %v1286_v19  ;;  %v579_v23 = vrot.slane %v312_v37, %v1286_v19 }
  0xd4   :  { %v207_v56 = vpop.xlane.xlu1 %206  ;;  %v183_v57 = vpop.xlane.xlu0 %182 }
  0xd5   :  { %v705_v54 = vsel %vm682_vm7, %v539_v16, %v704_v46  ;;  %v698_v55 = vsel %vm682_vm7, %v507_v17, %v697_v47  ;;  %v314_v40 = vmul.f32 0.015625, %v207_v56  ;;  %v306_v41 = vmul.f32 0.015625, %v183_v57 }
  0xd6   :  { %v714_v5 = vsel %vm672_vm2, %v583_v22, %v579_v23 }
  0xd7   :  { %v587_v27 = vrot.slane %v314_v40, %v1286_v19  ;;  %v555_v34 = vrot.slane %v306_v41, %v1286_v19 }
  0xd8   :  { %v174_v20 = vpop.xlane.xlu1 %173  ;;  %v150_v21 = vpop.xlane.xlu0 %149 }
  0xd9   :  { %v303_v38 = vmul.f32 0.015625, %v174_v20  ;;  %v295_v39 = vmul.f32 0.015625, %v150_v21  ;;  %v715_v12 = vsel %vm674_vm3, %v587_v27, %v714_v5  ;;  %v708_v13 = vsel %vm674_vm3, %v555_v34, %v707_v4 }
  0xdb   :  { %v543_v50 = vrot.slane %v303_v38, %v1286_v19  ;;  %v511_v51 = vrot.slane %v295_v39, %v1286_v19 }
  0xdc   :  { %v210_v58 = vpop.xlane.xlu1 %209  ;;  %v186_v59 = vpop.xlane.xlu0 %185 }
  0xdd   :  { %v699_v62 = vsel %vm684_vm8, %v511_v51, %v698_v55  ;;  %v706_v63 = vsel %vm684_vm8, %v543_v50, %v705_v54  ;;  %v315_v48 = vmul.f32 0.015625, %v210_v58  ;;  %v307_v49 = vmul.f32 0.015625, %v186_v59 }
  0xde   :  { %v868_v2 = vpack.c.bf16 %v706_v63, %v699_v62 }
  0xdf   :  { %v591_v60 = vrot.slane %v315_v48, %v1286_v19  ;;  %v559_v61 = vrot.slane %v307_v49, %v1286_v19 }
  0xe0   :  { %v213_v3 = vpop.xlane.xlu1 %212  ;;  %869 = vmatprep.subr.bf16.mxu0 %v868_v2  ;;  %v189_v6 = vpop.xlane.xlu0 %188 }
  0xe1   :  { %871 = vmatpush3.bf16.msra.mxu0 %v868_v2  ;;  %v316_v52 = vmul.f32 0.015625, %v213_v3  ;;  %v308_v15 = vmul.f32 0.015625, %v189_v6  ;;  %v716_v24 = vsel %vm676_vm4, %v591_v60, %v715_v12  ;;  %v709_v25 = vsel %vm676_vm4, %v559_v61, %v708_v13 }
  0xe3   :  { %v595_v0 = vrot.slane %v316_v52, %v1286_v19  ;;  %v563_v1 = vrot.slane %v308_v15, %v1286_v19 }
  0xe4   :  { %v216_v11 = vpop.xlane.xlu1 %215  ;;  %v192_v14 = vpop.xlane.xlu0 %191 }
  0xe5   :  { %v317_v18 = vmul.f32 0.015625, %v216_v11  ;;  %v309_v26 = vmul.f32 0.015625, %v192_v14  ;;  %v717_v42 = vsel %vm678_vm5, %v595_v0, %v716_v24  ;;  %v710_v43 = vsel %vm678_vm5, %v563_v1, %v709_v25 }
  0xe7   :  { %v599_v8 = vrot.slane %v317_v18, %v1286_v19  ;;  %v567_v9 = vrot.slane %v309_v26, %v1286_v19 }
  0xe8   :  { %v228_v28 = vpop.xlane.xlu1 %227  ;;  %v225_v29 = vpop.xlane.xlu0 %224 }
  0xe9   :  { %v718_v46 = vsel %vm680_vm6, %v599_v8, %v717_v42  ;;  %v711_v47 = vsel %vm680_vm6, %v567_v9, %v710_v43  ;;  %v321_v11 = vmul.f32 0.015625, %v228_v28  ;;  %v320_v14 = vmul.f32 0.015625, %v225_v29 }
  0xeb   :  { %v615_v48 = vrot.slane %v321_v11, %v1286_v19  ;;  %v611_v49 = vrot.slane %v320_v14, %v1286_v19 }
  0xec   :  { %v252_v30 = vpop.xlane.xlu1 %251  ;;  %v249_v31 = vpop.xlane.xlu0 %248 }
  0xed   :  { %v329_v32 = vmul.f32 0.015625, %v252_v30  ;;  %v328_v33 = vmul.f32 0.015625, %v249_v31 }
  0xef   :  { %v647_v52 = vrot.slane %v329_v32, %v1286_v19  ;;  %v643_v15 = vrot.slane %v328_v33, %v1286_v19 }
  0xf0   :  { %v219_v44 = vpop.xlane.xlu1 %218  ;;  %v195_v45 = vpop.xlane.xlu0 %194 }
  0xf1   :  { %v318_v35 = vmul.f32 0.015625, %v219_v44  ;;  %v310_v53 = vmul.f32 0.015625, %v195_v45 }
  0xf3   :  { %v603_v16 = vrot.slane %v318_v35, %v1286_v19  ;;  %v571_v17 = vrot.slane %v310_v53, %v1286_v19 }
  0xf4   :  { %v255_v56 = vpop.xlane.xlu1 %254  ;;  %v231_v57 = vpop.xlane.xlu0 %230 }
  0xf5   :  { %v719_v54 = vsel %vm682_vm7, %v603_v16, %v718_v46  ;;  %v712_v55 = vsel %vm682_vm7, %v571_v17, %v711_v47  ;;  %v330_v36 = vmul.f32 0.015625, %v255_v56  ;;  %v322_v37 = vmul.f32 0.015625, %v231_v57 }
  0xf6   :  { %v721_v56 = vsel %vm672_vm2, %v615_v48, %v611_v49  ;;  %v728_v57 = vsel %vm672_vm2, %v647_v52, %v643_v15 }
  0xf7   :  { %v651_v30 = vrot.slane %v330_v36, %v1286_v19  ;;  %v619_v31 = vrot.slane %v322_v37, %v1286_v19 }
  0xf8   :  { %v222_v20 = vpop.xlane.xlu1 %221  ;;  %v198_v21 = vpop.xlane.xlu0 %197 }
  0xf9   :  { %v319_v38 = vmul.f32 0.015625, %v222_v20  ;;  %v311_v39 = vmul.f32 0.015625, %v198_v21  ;;  %v729_v0 = vsel %vm674_vm3, %v651_v30, %v728_v57  ;;  %v722_v1 = vsel %vm674_vm3, %v619_v31, %v721_v56 }
  0xfb   :  { %v607_v50 = vrot.slane %v319_v38, %v1286_v19  ;;  %v575_v51 = vrot.slane %v311_v39, %v1286_v19 }
  0xfc   :  { %v258_v58 = vpop.xlane.xlu1 %257  ;;  %v234_v59 = vpop.xlane.xlu0 %233 }
  0xfd   :  { %v713_v62 = vsel %vm684_vm8, %v575_v51, %v712_v55  ;;  %v720_v63 = vsel %vm684_vm8, %v607_v50, %v719_v54  ;;  %v331_v44 = vmul.f32 0.015625, %v258_v58  ;;  %v323_v45 = vmul.f32 0.015625, %v234_v59  ;;  %v337_v51 = vld [vmem:[%s1435_s1 + $0x8] sm:$0x3] }
  0xfe   :  { %v872_v2 = vpack.c.bf16 %v720_v63, %v713_v62 }
  0xff   :  { %v655_v18 = vrot.slane %v331_v44, %v1286_v19  ;;  %v623_v26 = vrot.slane %v323_v45, %v1286_v19 }
 0x100   :  { %v261_v3 = vpop.xlane.xlu1 %260  ;;  %873 = vmatprep.subr.bf16.mxu0 %v872_v2  ;;  %v237_v6 = vpop.xlane.xlu0 %236 }
 0x101   :  { %875 = vmatpush3.bf16.msra.mxu0 %v872_v2  ;;  %v332_v7 = vmul.f32 0.015625, %v261_v3  ;;  %v324_v10 = vmul.f32 0.015625, %v237_v6  ;;  %v730_v12 = vsel %vm676_vm4, %v655_v18, %v729_v0  ;;  %v723_v13 = vsel %vm676_vm4, %v623_v26, %v722_v1 }
 0x103   :  { %v659_v35 = vrot.slane %v332_v7, %v1286_v19  ;;  %v627_v53 = vrot.slane %v324_v10, %v1286_v19 }
 0x104   :  { %v264_v40 = vpop.xlane.xlu1 %263  ;;  %v240_v41 = vpop.xlane.xlu0 %239 }
 0x105   :  { %v333_v28 = vmul.f32 0.015625, %v264_v40  ;;  %v325_v29 = vmul.f32 0.015625, %v240_v41  ;;  %v731_v20 = vsel %vm678_vm5, %v659_v35, %v730_v12  ;;  %v724_v21 = vsel %vm678_vm5, %v627_v53, %v723_v13 }
 0x107   :  { %v663_v60 = vrot.slane %v333_v28, %v1286_v19  ;;  %v631_v61 = vrot.slane %v325_v29, %v1286_v19 }
 0x108   :  { %v267_v22 = vpop.xlane.xlu1 %266  ;;  %v243_v23 = vpop.xlane.xlu0 %242 }
 0x109   :  { %v334_v27 = vmul.f32 0.015625, %v267_v22  ;;  %v326_v34 = vmul.f32 0.015625, %v243_v23  ;;  %v732_v24 = vsel %vm680_vm6, %v663_v60, %v731_v20  ;;  %v725_v25 = vsel %vm680_vm6, %v631_v61, %v724_v21 }
 0x10b   :  { %v667_v4 = vrot.slane %v334_v27, %v1286_v19  ;;  %v635_v5 = vrot.slane %v326_v34, %v1286_v19 }
 0x10c   :  { %v270_v8 = vpop.xlane.xlu1 %269  ;;  %v246_v9 = vpop.xlane.xlu0 %245 }
 0x10d   :  { %v335_v16 = vmul.f32 0.015625, %v270_v8  ;;  %v327_v17 = vmul.f32 0.015625, %v246_v9  ;;  %v733_v42 = vsel %vm682_vm7, %v667_v4, %v732_v24  ;;  %v726_v43 = vsel %vm682_vm7, %v635_v5, %v725_v25 }
 0x10f   :  { %v671_v38 = vrot.slane %v335_v16, %v1286_v19  ;;  %v639_v39 = vrot.slane %v327_v17, %v1286_v19 }
 0x110   :  { %v348_v54 = vpop.permute.xlu1 %347 }
 0x111   :  { %v727_v46 = vsel %vm684_vm8, %v639_v39, %v726_v43  ;;  %v734_v47 = vsel %vm684_vm8, %v671_v38, %v733_v42 }
 0x112   :  { %v876_v50 = vpack.c.bf16 %v734_v47, %v727_v46 }
 0x114   :  { %877 = vmatprep.subr.bf16.mxu0 %v876_v50  ;;  %v343_v55 = vpop.permute.xlu0 %342 }
 0x115   :  { %879 = vmatpush3.bf16.msra.mxu0 %v876_v50 }
 0x118   :  { %862 = vmatmul.mubr.msk.f32.vlgmr.msra.gmra.mrb[0].mxu0 %vm743_vm1, %v337_v51 }
 0x1eb   :  { %v863_v19 = vpop.f32.mrb[0].mxu0 }
 0x1ec   :  { %v822_v58 = vadd.f32 %v863_v19, %v348_v54  ;;  %v816_v59 = vpop.f32.mrb[1].mxu0 }
 0x1ed   :  { %v817_v62 = vadd.f32 %v816_v59, %v343_v55 }
 0x1ee   :  { %828 = vst.msk [vmem:[%s1437_s3 + $0x8] sm:$0x3] %vm827_vm9, %v822_v58 }
 0x1ef   :  { %826 = vst.msk [vmem:[%s1437_s3] sm:$0xff] %vm825_vm10, %v817_v62 }

</bundles_post_ra>
